<compile_context>
chip_gen: v6e
topology: v6e:2x2x1
jax: 0.10.0
libtpu: 0.0.40
codegen_flags: <defaults>
</compile_context>

<pallas_src>
import numpy as np
import jax
import jax.numpy as jnp
from jax.experimental import pallas as pl
from jax.experimental.pallas import tpu as pltpu

EPS = 1e-5                      # nn.BatchNorm2d default eps
LANE = 128                      # TPU lane width; channels padded to this
WOFF = 16                       # bf16 sublane-aligned interior offset in pad_scr
VMEM_LIMIT = 32 * 1024 * 1024   # explicit scoped-VMEM budget (re-derive per gen/shape)


def _bn_affine(s, ss, gamma, beta, count):
    """Finalize training-mode (biased) BN stats into a fused scale/shift."""
    # TODO(synk): one-pass variance (E[x^2]-E[x]^2, f32) can lose precision when
    #             |mean|^2 >> var; clamped at 0.  Exact two-pass would need an
    #             extra pass over the conv output.
    mean = s / count
    var = jnp.maximum(ss / count - mean * mean, 0.0)
    scale = gamma * jax.lax.rsqrt(var + EPS)
    shift = beta - mean * scale
    return scale, shift


def _im2col_conv(get_slab, w_ref, chunk_scr, H, W, Cp):
    """3x3 conv on one image tile: 3 accumulating matmuls, K = 3*Cp per dy."""
    rows = H * W
    acc = jnp.zeros((rows, Cp), jnp.float32)
    for dy in range(3):
        slab = get_slab(dy)                                   # (H, W+2, Cp) bf16
        for dx in range(3):
            chunk_scr[:, dx * Cp:(dx + 1) * Cp] = (
                slab[:, dx:dx + W, :].reshape(rows, Cp))
        acc = acc + jnp.dot(chunk_scr[...],
                            w_ref[dy * 3 * Cp:(dy + 1) * 3 * Cp, :],
                            preferred_element_type=jnp.float32)
    return acc


def basic_block(x_nchw, w1, g1, b1, w2, g2, b2):
    """BasicBlock forward. x_nchw: [N, C, H, W]; conv weights HWIO [3,3,C,C]."""
    N, C, H, W = x_nchw.shape
    Cp = ((C + LANE - 1) // LANE) * LANE
    rows = H * W
    count = float(N * H * W)

    # --- interface plumbing: NCHW -> NHWC, channel pad, bf16 staging ---
    x_nhwc = jnp.transpose(x_nchw, (0, 2, 3, 1)).astype(jnp.float32)
    xres = jnp.pad(x_nhwc, ((0, 0), (0, 0), (0, 0), (0, Cp - C))).astype(jnp.bfloat16)
    xpad = jnp.pad(xres, ((0, 0), (1, 1), (1, 1), (0, 0)))        # bf16, halo baked in

    def prep_w(w):    # HWIO -> pad channels -> (9*Cp, Cp) bf16
        wp = jnp.pad(w.astype(jnp.float32),
                     ((0, 0), (0, 0), (0, Cp - C), (0, Cp - C)))
        return wp.reshape(9 * Cp, Cp).astype(jnp.bfloat16)

    def prep_v(v):    # per-channel param -> (1, Cp) f32 (zero padded)
        return jnp.pad(v.astype(jnp.float32), (0, Cp - C)).reshape(1, Cp)

    w1p, w2p = prep_w(w1), prep_w(w2)
    g1p, b1p, g2p, b2p = prep_v(g1), prep_v(b1), prep_v(g2), prep_v(b2)

    stat_shape = jax.ShapeDtypeStruct((1, Cp), jnp.float32)
    img_in_spec = pl.BlockSpec((1, H + 2, W + 2, Cp), lambda n: (n, 0, 0, 0))
    img_out_spec = pl.BlockSpec((1, H, W, Cp), lambda n: (n, 0, 0, 0))
    w_spec = pl.BlockSpec((9 * Cp, Cp), lambda n: (0, 0))
    vec_spec = pl.BlockSpec((1, Cp), lambda n: (0, 0))
    seq_params = pltpu.CompilerParams(dimension_semantics=("arbitrary",),
                                      vmem_limit_bytes=VMEM_LIMIT)

    # ---------- kernel 1: conv1 (per-image tile) + BN1 stat accumulation ----------
    def conv1_kernel(xpad_ref, w_ref, y_ref, s_ref, ss_ref, chunk_scr):
        n = pl.program_id(0)
        xb = xpad_ref[...]                                    # (1, H+2, W+2, Cp) bf16
        acc = _im2col_conv(lambda dy: xb[0, dy:dy + H, :, :],
                           w_ref, chunk_scr, H, W, Cp)
        y_ref[...] = acc.reshape(1, H, W, Cp).astype(y_ref.dtype)

        @pl.when(n == 0)
        def _():
            s_ref[...] = jnp.zeros_like(s_ref)
            ss_ref[...] = jnp.zeros_like(ss_ref)

        s_ref[...] += jnp.sum(acc, axis=0, keepdims=True)
        ss_ref[...] += jnp.sum(acc * acc, axis=0, keepdims=True)

    y1, s1, ss1 = pl.pallas_call(
        conv1_kernel,
        grid=(N,),
        in_specs=[img_in_spec, w_spec],
        out_specs=(img_out_spec, vec_spec, vec_spec),
        out_shape=(jax.ShapeDtypeStruct((N, H, W, Cp), jnp.bfloat16),
                   stat_shape, stat_shape),
        scratch_shapes=[pltpu.VMEM((rows, 3 * Cp), jnp.bfloat16)],
        compiler_params=seq_params,
    )(xpad, w1p)

    scale1, shift1 = _bn_affine(s1, ss1, g1p, b1p, count)

    # ---------- kernel 2: BN1+ReLU (folded affine) -> conv2 + BN2 stats ----------
    def conv2_kernel(y1_ref, sc_ref, sh_ref, w_ref, y_ref, s_ref, ss_ref,
                     chunk_scr, pad_scr):
        n = pl.program_id(0)

        @pl.when(n == 0)
        def _():
            pad_scr[...] = jnp.zeros_like(pad_scr)   # halo zeroed once; interior overwritten
            s_ref[...] = jnp.zeros_like(s_ref)
            ss_ref[...] = jnp.zeros_like(ss_ref)

        out1 = jnp.maximum(
            y1_ref[...].astype(jnp.float32).reshape(rows, Cp) * sc_ref[...]
            + sh_ref[...], 0.0)
        pad_scr[0:1, 1:H + 1, WOFF:WOFF + W, :] = (
            out1.reshape(1, H, W, Cp).astype(pad_scr.dtype))

        def slab(dy):
            return pad_scr[0:1, dy:dy + H, WOFF - 1:WOFF + W + 1, :].reshape(
                H, W + 2, Cp)

        acc = _im2col_conv(slab, w_ref, chunk_scr, H, W, Cp)
        y_ref[...] = acc.reshape(1, H, W, Cp).astype(y_ref.dtype)
        s_ref[...] += jnp.sum(acc, axis=0, keepdims=True)
        ss_ref[...] += jnp.sum(acc * acc, axis=0, keepdims=True)

    y2, s2, ss2 = pl.pallas_call(
        conv2_kernel,
        grid=(N,),
        in_specs=[pl.BlockSpec((1, H, W, Cp), lambda n: (n, 0, 0, 0)),
                  vec_spec, vec_spec, w_spec],
        out_specs=(img_out_spec, vec_spec, vec_spec),
        out_shape=(jax.ShapeDtypeStruct((N, H, W, Cp), jnp.bfloat16),
                   stat_shape, stat_shape),
        scratch_shapes=[pltpu.VMEM((rows, 3 * Cp), jnp.bfloat16),
                        pltpu.VMEM((1, H + 2, WOFF + W + 1, Cp), jnp.bfloat16)],
        compiler_params=seq_params,
    )(y1, scale1, shift1, w2p)

    scale2, shift2 = _bn_affine(s2, ss2, g2p, b2p, count)

    # ---------- kernel 3: BN2 (folded affine) + residual + final ReLU ----------
    total = N * H * W
    TR = next((t for t in (256, 128, 64, 32, 16, 8) if total % t == 0), total)

    def epilogue_kernel(y2_ref, res_ref, sc_ref, sh_ref, o_ref):
        y = y2_ref[...].astype(jnp.float32) * sc_ref[...] + sh_ref[...]
        o_ref[...] = jnp.maximum(
            y + res_ref[...].astype(jnp.float32), 0.0).astype(o_ref.dtype)

    row_spec = pl.BlockSpec((TR, Cp), lambda i: (i, 0))
    vec_spec1 = pl.BlockSpec((1, Cp), lambda i: (0, 0))
    yflat = pl.pallas_call(
        epilogue_kernel,
        grid=(total // TR,),
        in_specs=[row_spec, row_spec, vec_spec1, vec_spec1],
        out_specs=row_spec,
        out_shape=jax.ShapeDtypeStruct((total, Cp), jnp.bfloat16),
        compiler_params=pltpu.CompilerParams(dimension_semantics=("parallel",),
                                             vmem_limit_bytes=VMEM_LIMIT),
    )(y2.reshape(total, Cp), xres.reshape(total, Cp), scale2, shift2)

    out = yflat.reshape(N, H, W, Cp)[..., :C]
    return jnp.transpose(out, (0, 3, 1, 2)).astype(jnp.float32)   # back to NCHW f32


def basic_block_ref(x_nchw, w1, g1, b1, w2, g2, b2):
    """Pure-JAX f32 reference (same semantics as the PyTorch module, training BN)."""
    x = jnp.transpose(x_nchw, (0, 2, 3, 1)).astype(jnp.float32)

    def conv(t, w):
        return jax.lax.conv_general_dilated(
            t, w, (1, 1), 'SAME', dimension_numbers=('NHWC', 'HWIO', 'NHWC'))

    def bn(t, g, b):
        m = jnp.mean(t, axis=(0, 1, 2), keepdims=True)
        v = jnp.mean((t - m) ** 2, axis=(0, 1, 2), keepdims=True)
        return (t - m) * jax.lax.rsqrt(v + EPS) * g + b

    out = jax.nn.relu(bn(conv(x, w1), g1, b1))
    out = bn(conv(out, w2), g2, b2)
    out = jax.nn.relu(out + x)
    return jnp.transpose(out, (0, 3, 1, 2))


if __name__ == "__main__":
    key = jax.random.PRNGKey(0)
    kx, kw1, kw2 = jax.random.split(key, 3)
    N, C, H, W = 2, 4, 16, 16                     # inplanes = planes = 4

    x = jax.random.normal(kx, (N, C, H, W), jnp.float32)

    # conv3x3 weights (HWIO == PyTorch OIHW permuted (2,3,1,0)), bias=False
    fan_in = 3 * 3 * C
    w1 = jax.random.normal(kw1, (3, 3, C, C), jnp.float32) * (2.0 / fan_in) ** 0.5
    w2 = jax.random.normal(kw2, (3, 3, C, C), jnp.float32) * (2.0 / fan_in) ** 0.5

    # BatchNorm affine params (deterministic, non-trivial)
    g1 = 1.0 + 0.10 * jnp.arange(C, dtype=jnp.float32)
    b1 = 0.05 * jnp.arange(C, dtype=jnp.float32)
    g2 = 1.0 - 0.05 * jnp.arange(C, dtype=jnp.float32)
    b2 = -0.02 * jnp.arange(C, dtype=jnp.float32)

    y = basic_block(x, w1, g1, b1, w2, g2, b2)
    jax.block_until_ready(y)

    y_ref = basic_block_ref(x, w1, g1, b1, w2, g2, b2)
    # Conv operands, intermediates, residual and output are bf16-staged (f32
    # accumulation / BN stats), so compare with a bf16-appropriate tolerance.
    np.testing.assert_allclose(np.asarray(y), np.asarray(y_ref),
                               rtol=2e-2, atol=4e-2)
    print("KERNEL_OK")
</pallas_src>

<mosaic_0001>
module attributes {stable_mosaic.version = 11 : i64} {
  func.func @conv1_kernel(%arg0: i32, %arg1: memref<1x18x18x128xbf16, #tpu.memory_space<vmem>>, %arg2: memref<1152x128xbf16, #tpu.memory_space<vmem>>, %arg3: memref<1x16x16x128xbf16, #tpu.memory_space<vmem>>, %arg4: memref<1x128xf32, #tpu.memory_space<vmem>>, %arg5: memref<1x128xf32, #tpu.memory_space<vmem>>, %arg6: memref<256x384xbf16, #tpu.memory_space<vmem>>) attributes {dimension_semantics = [#tpu.dimension_semantics<arbitrary>], iteration_bounds = array<i64: 2>, scalar_prefetch = 0 : i64, scratch_operands = 1 : i64, tpu.core_type = #tpu.core_type<tc>, window_params = [{transform_indices = @transform_0, window_bounds = array<i64: 1, 18, 18, 128>}, {pipeline_mode = #tpu.pipeline_mode<synchronous>, transform_indices = @transform_1, window_bounds = array<i64: 1152, 128>}, {transform_indices = @transform_2, window_bounds = array<i64: 1, 16, 16, 128>}, {pipeline_mode = #tpu.pipeline_mode<synchronous>, transform_indices = @transform_3, window_bounds = array<i64: 1, 128>}, {pipeline_mode = #tpu.pipeline_mode<synchronous>, transform_indices = @transform_4, window_bounds = array<i64: 1, 128>}]} {
    %c0 = arith.constant 0 : index
    %c0_0 = arith.constant 0 : index
    %c0_1 = arith.constant 0 : index
    %c0_2 = arith.constant 0 : index
    %0 = vector.load %arg1[%c0, %c0_0, %c0_1, %c0_2] : memref<1x18x18x128xbf16, #tpu.memory_space<vmem>>, vector<1x18x18x128xbf16>
    %cst = arith.constant 0.000000e+00 : f32
    %1 = vector.broadcast %cst : f32 to vector<256x128xf32>
    %2 = vector.extract_strided_slice %0 {offsets = [0, 0, 0, 0], sizes = [1, 16, 18, 128], strides = [1, 1, 1, 1]} : vector<1x18x18x128xbf16> to vector<1x16x18x128xbf16>
    %3 = vector.shape_cast %2 : vector<1x16x18x128xbf16> to vector<16x18x128xbf16>
    %4 = vector.extract_strided_slice %3 {offsets = [0, 0, 0], sizes = [16, 16, 128], strides = [1, 1, 1]} : vector<16x18x128xbf16> to vector<16x16x128xbf16>
    %5 = vector.shape_cast %4 : vector<16x16x128xbf16> to vector<256x128xbf16>
    %c0_3 = arith.constant 0 : index
    %c0_4 = arith.constant 0 : index
    %6 = vector.load %arg6[%c0_3, %c0_4] : memref<256x384xbf16, #tpu.memory_space<vmem>>, vector<256x128xbf16>
    tpu.vector_store %arg6[%c0_3, %c0_4], %5 {strides = array<i32>} : memref<256x384xbf16, #tpu.memory_space<vmem>>, vector<256x128xbf16>,
    %7 = vector.extract_strided_slice %3 {offsets = [0, 1, 0], sizes = [16, 16, 128], strides = [1, 1, 1]} : vector<16x18x128xbf16> to vector<16x16x128xbf16>
    %8 = vector.shape_cast %7 : vector<16x16x128xbf16> to vector<256x128xbf16>
    %c0_5 = arith.constant 0 : index
    %c128 = arith.constant 128 : index
    %9 = vector.load %arg6[%c0_5, %c128] : memref<256x384xbf16, #tpu.memory_space<vmem>>, vector<256x128xbf16>
    tpu.vector_store %arg6[%c0_5, %c128], %8 {strides = array<i32>} : memref<256x384xbf16, #tpu.memory_space<vmem>>, vector<256x128xbf16>,
    %10 = vector.extract_strided_slice %3 {offsets = [0, 2, 0], sizes = [16, 16, 128], strides = [1, 1, 1]} : vector<16x18x128xbf16> to vector<16x16x128xbf16>
    %11 = vector.shape_cast %10 : vector<16x16x128xbf16> to vector<256x128xbf16>
    %c0_6 = arith.constant 0 : index
    %c256 = arith.constant 256 : index
    %12 = vector.load %arg6[%c0_6, %c256] : memref<256x384xbf16, #tpu.memory_space<vmem>>, vector<256x128xbf16>
    tpu.vector_store %arg6[%c0_6, %c256], %11 {strides = array<i32>} : memref<256x384xbf16, #tpu.memory_space<vmem>>, vector<256x128xbf16>,
    %c0_7 = arith.constant 0 : index
    %c0_8 = arith.constant 0 : index
    %13 = vector.load %arg6[%c0_7, %c0_8] : memref<256x384xbf16, #tpu.memory_space<vmem>>, vector<256x384xbf16>
    %c0_9 = arith.constant 0 : index
    %c0_10 = arith.constant 0 : index
    %14 = vector.load %arg2[%c0_9, %c0_10] : memref<1152x128xbf16, #tpu.memory_space<vmem>>, vector<384x128xbf16>
    %cst_11 = arith.constant dense<0.000000e+00> : vector<256x128xf32>
    %15 = tpu.matmul %13, %14, %cst_11 {dimension_numbers = #tpu.dot_dimension_numbers<[1], [0], [0], [1], [0, 0, 1, 1], [], []>} : vector<256x384xbf16>, vector<384x128xbf16>, vector<256x128xf32> -> vector<256x128xf32>
    %16 = arith.addf %1, %15 : vector<256x128xf32>
    %17 = vector.extract_strided_slice %0 {offsets = [0, 1, 0, 0], sizes = [1, 16, 18, 128], strides = [1, 1, 1, 1]} : vector<1x18x18x128xbf16> to vector<1x16x18x128xbf16>
    %18 = vector.shape_cast %17 : vector<1x16x18x128xbf16> to vector<16x18x128xbf16>
    %19 = vector.extract_strided_slice %18 {offsets = [0, 0, 0], sizes = [16, 16, 128], strides = [1, 1, 1]} : vector<16x18x128xbf16> to vector<16x16x128xbf16>
    %20 = vector.shape_cast %19 : vector<16x16x128xbf16> to vector<256x128xbf16>
    %c0_12 = arith.constant 0 : index
    %c0_13 = arith.constant 0 : index
    %21 = vector.load %arg6[%c0_12, %c0_13] : memref<256x384xbf16, #tpu.memory_space<vmem>>, vector<256x128xbf16>
    tpu.vector_store %arg6[%c0_12, %c0_13], %20 {strides = array<i32>} : memref<256x384xbf16, #tpu.memory_space<vmem>>, vector<256x128xbf16>,
    %22 = vector.extract_strided_slice %18 {offsets = [0, 1, 0], sizes = [16, 16, 128], strides = [1, 1, 1]} : vector<16x18x128xbf16> to vector<16x16x128xbf16>
    %23 = vector.shape_cast %22 : vector<16x16x128xbf16> to vector<256x128xbf16>
    %c0_14 = arith.constant 0 : index
    %c128_15 = arith.constant 128 : index
    %24 = vector.load %arg6[%c0_14, %c128_15] : memref<256x384xbf16, #tpu.memory_space<vmem>>, vector<256x128xbf16>
    tpu.vector_store %arg6[%c0_14, %c128_15], %23 {strides = array<i32>} : memref<256x384xbf16, #tpu.memory_space<vmem>>, vector<256x128xbf16>,
    %25 = vector.extract_strided_slice %18 {offsets = [0, 2, 0], sizes = [16, 16, 128], strides = [1, 1, 1]} : vector<16x18x128xbf16> to vector<16x16x128xbf16>
    %26 = vector.shape_cast %25 : vector<16x16x128xbf16> to vector<256x128xbf16>
    %c0_16 = arith.constant 0 : index
    %c256_17 = arith.constant 256 : index
    %27 = vector.load %arg6[%c0_16, %c256_17] : memref<256x384xbf16, #tpu.memory_space<vmem>>, vector<256x128xbf16>
    tpu.vector_store %arg6[%c0_16, %c256_17], %26 {strides = array<i32>} : memref<256x384xbf16, #tpu.memory_space<vmem>>, vector<256x128xbf16>,
    %c0_18 = arith.constant 0 : index
    %c0_19 = arith.constant 0 : index
    %28 = vector.load %arg6[%c0_18, %c0_19] : memref<256x384xbf16, #tpu.memory_space<vmem>>, vector<256x384xbf16>
    %c384 = arith.constant 384 : index
    %c0_20 = arith.constant 0 : index
    %29 = vector.load %arg2[%c384, %c0_20] : memref<1152x128xbf16, #tpu.memory_space<vmem>>, vector<384x128xbf16>
    %cst_21 = arith.constant dense<0.000000e+00> : vector<256x128xf32>
    %30 = tpu.matmul %28, %29, %cst_21 {dimension_numbers = #tpu.dot_dimension_numbers<[1], [0], [0], [1], [0, 0, 1, 1], [], []>} : vector<256x384xbf16>, vector<384x128xbf16>, vector<256x128xf32> -> vector<256x128xf32>
    %31 = arith.addf %16, %30 : vector<256x128xf32>
    %32 = vector.extract_strided_slice %0 {offsets = [0, 2, 0, 0], sizes = [1, 16, 18, 128], strides = [1, 1, 1, 1]} : vector<1x18x18x128xbf16> to vector<1x16x18x128xbf16>
    %33 = vector.shape_cast %32 : vector<1x16x18x128xbf16> to vector<16x18x128xbf16>
    %34 = vector.extract_strided_slice %33 {offsets = [0, 0, 0], sizes = [16, 16, 128], strides = [1, 1, 1]} : vector<16x18x128xbf16> to vector<16x16x128xbf16>
    %35 = vector.shape_cast %34 : vector<16x16x128xbf16> to vector<256x128xbf16>
    %c0_22 = arith.constant 0 : index
    %c0_23 = arith.constant 0 : index
    %36 = vector.load %arg6[%c0_22, %c0_23] : memref<256x384xbf16, #tpu.memory_space<vmem>>, vector<256x128xbf16>
    tpu.vector_store %arg6[%c0_22, %c0_23], %35 {strides = array<i32>} : memref<256x384xbf16, #tpu.memory_space<vmem>>, vector<256x128xbf16>,
    %37 = vector.extract_strided_slice %33 {offsets = [0, 1, 0], sizes = [16, 16, 128], strides = [1, 1, 1]} : vector<16x18x128xbf16> to vector<16x16x128xbf16>
    %38 = vector.shape_cast %37 : vector<16x16x128xbf16> to vector<256x128xbf16>
    %c0_24 = arith.constant 0 : index
    %c128_25 = arith.constant 128 : index
    %39 = vector.load %arg6[%c0_24, %c128_25] : memref<256x384xbf16, #tpu.memory_space<vmem>>, vector<256x128xbf16>
    tpu.vector_store %arg6[%c0_24, %c128_25], %38 {strides = array<i32>} : memref<256x384xbf16, #tpu.memory_space<vmem>>, vector<256x128xbf16>,
    %40 = vector.extract_strided_slice %33 {offsets = [0, 2, 0], sizes = [16, 16, 128], strides = [1, 1, 1]} : vector<16x18x128xbf16> to vector<16x16x128xbf16>
    %41 = vector.shape_cast %40 : vector<16x16x128xbf16> to vector<256x128xbf16>
    %c0_26 = arith.constant 0 : index
    %c256_27 = arith.constant 256 : index
    %42 = vector.load %arg6[%c0_26, %c256_27] : memref<256x384xbf16, #tpu.memory_space<vmem>>, vector<256x128xbf16>
    tpu.vector_store %arg6[%c0_26, %c256_27], %41 {strides = array<i32>} : memref<256x384xbf16, #tpu.memory_space<vmem>>, vector<256x128xbf16>,
    %c0_28 = arith.constant 0 : index
    %c0_29 = arith.constant 0 : index
    %43 = vector.load %arg6[%c0_28, %c0_29] : memref<256x384xbf16, #tpu.memory_space<vmem>>, vector<256x384xbf16>
    %c768 = arith.constant 768 : index
    %c0_30 = arith.constant 0 : index
    %44 = vector.load %arg2[%c768, %c0_30] : memref<1152x128xbf16, #tpu.memory_space<vmem>>, vector<384x128xbf16>
    %cst_31 = arith.constant dense<0.000000e+00> : vector<256x128xf32>
    %45 = tpu.matmul %43, %44, %cst_31 {dimension_numbers = #tpu.dot_dimension_numbers<[1], [0], [0], [1], [0, 0, 1, 1], [], []>} : vector<256x384xbf16>, vector<384x128xbf16>, vector<256x128xf32> -> vector<256x128xf32>
    %46 = arith.addf %31, %45 : vector<256x128xf32>
    %47 = vector.shape_cast %46 : vector<256x128xf32> to vector<1x16x16x128xf32>
    %48 = arith.truncf %47 : vector<1x16x16x128xf32> to vector<1x16x16x128xbf16>
    %c0_32 = arith.constant 0 : index
    %c0_33 = arith.constant 0 : index
    %c0_34 = arith.constant 0 : index
    %c0_35 = arith.constant 0 : index
    %49 = vector.load %arg3[%c0_32, %c0_33, %c0_34, %c0_35] : memref<1x16x16x128xbf16, #tpu.memory_space<vmem>>, vector<1x16x16x128xbf16>
    tpu.vector_store %arg3[%c0_32, %c0_33, %c0_34, %c0_35], %48 {strides = array<i32>} : memref<1x16x16x128xbf16, #tpu.memory_space<vmem>>, vector<1x16x16x128xbf16>,
    %c0_i32 = arith.constant 0 : i32
    %50 = arith.cmpi eq, %arg0, %c0_i32 : i32
    %51 = arith.extui %50 : i1 to i32
    %c0_i32_36 = arith.constant 0 : i32
    %52 = arith.cmpi ne, %51, %c0_i32_36 : i32
    scf.if %52 {
      %cst_47 = arith.constant 0.000000e+00 : f32
      %64 = vector.broadcast %cst_47 : f32 to vector<1x128xf32>
      %c0_48 = arith.constant 0 : index
      %c0_49 = arith.constant 0 : index
      %65 = vector.load %arg4[%c0_48, %c0_49] : memref<1x128xf32, #tpu.memory_space<vmem>>, vector<1x128xf32>
      tpu.vector_store %arg4[%c0_48, %c0_49], %64 {strides = array<i32>} : memref<1x128xf32, #tpu.memory_space<vmem>>, vector<1x128xf32>,
      %cst_50 = arith.constant 0.000000e+00 : f32
      %66 = vector.broadcast %cst_50 : f32 to vector<1x128xf32>
      %c0_51 = arith.constant 0 : index
      %c0_52 = arith.constant 0 : index
      %67 = vector.load %arg5[%c0_51, %c0_52] : memref<1x128xf32, #tpu.memory_space<vmem>>, vector<1x128xf32>
      tpu.vector_store %arg5[%c0_51, %c0_52], %66 {strides = array<i32>} : memref<1x128xf32, #tpu.memory_space<vmem>>, vector<1x128xf32>,
    } else {
    }
    %c0_37 = arith.constant 0 : index
    %c0_38 = arith.constant 0 : index
    %53 = vector.load %arg4[%c0_37, %c0_38] : memref<1x128xf32, #tpu.memory_space<vmem>>, vector<1x128xf32>
    %cst_39 = arith.constant dense<0.000000e+00> : vector<128xf32>
    %54 = vector.multi_reduction <add>, %46, %cst_39 [0] : vector<256x128xf32> to vector<128xf32>
    %55 = vector.shape_cast %54 : vector<128xf32> to vector<1x128xf32>
    %56 = arith.addf %53, %55 : vector<1x128xf32>
    %c0_40 = arith.constant 0 : index
    %c0_41 = arith.constant 0 : index
    %57 = vector.load %arg4[%c0_40, %c0_41] : memref<1x128xf32, #tpu.memory_space<vmem>>, vector<1x128xf32>
    tpu.vector_store %arg4[%c0_40, %c0_41], %56 {strides = array<i32>} : memref<1x128xf32, #tpu.memory_space<vmem>>, vector<1x128xf32>,
    %c0_42 = arith.constant 0 : index
    %c0_43 = arith.constant 0 : index
    %58 = vector.load %arg5[%c0_42, %c0_43] : memref<1x128xf32, #tpu.memory_space<vmem>>, vector<1x128xf32>
    %59 = arith.mulf %46, %46 : vector<256x128xf32>
    %cst_44 = arith.constant dense<0.000000e+00> : vector<128xf32>
    %60 = vector.multi_reduction <add>, %59, %cst_44 [0] : vector<256x128xf32> to vector<128xf32>
    %61 = vector.shape_cast %60 : vector<128xf32> to vector<1x128xf32>
    %62 = arith.addf %58, %61 : vector<1x128xf32>
    %c0_45 = arith.constant 0 : index
    %c0_46 = arith.constant 0 : index
    %63 = vector.load %arg5[%c0_45, %c0_46] : memref<1x128xf32, #tpu.memory_space<vmem>>, vector<1x128xf32>
    tpu.vector_store %arg5[%c0_45, %c0_46], %62 {strides = array<i32>} : memref<1x128xf32, #tpu.memory_space<vmem>>, vector<1x128xf32>,
    return
  }
  func.func @transform_0(%arg0: i32) -> (i32, i32, i32, i32) {
    %c0_i32 = arith.constant 0 : i32
    %c0_i32_0 = arith.constant 0 : i32
    %c0_i32_1 = arith.constant 0 : i32
    %c0_i32_2 = arith.constant 0 : i32
    return %arg0, %c0_i32, %c0_i32_0, %c0_i32_1 : i32, i32, i32, i32
  }
  func.func @transform_1(%arg0: i32) -> (i32, i32) {
    %c0_i32 = arith.constant 0 : i32
    %c0_i32_0 = arith.constant 0 : i32
    %c0_i32_1 = arith.constant 0 : i32
    return %c0_i32, %c0_i32_0 : i32, i32
  }
  func.func @transform_2(%arg0: i32) -> (i32, i32, i32, i32) {
    %c0_i32 = arith.constant 0 : i32
    %c0_i32_0 = arith.constant 0 : i32
    %c0_i32_1 = arith.constant 0 : i32
    %c0_i32_2 = arith.constant 0 : i32
    return %arg0, %c0_i32, %c0_i32_0, %c0_i32_1 : i32, i32, i32, i32
  }
  func.func @transform_3(%arg0: i32) -> (i32, i32) {
    %c0_i32 = arith.constant 0 : i32
    %c0_i32_0 = arith.constant 0 : i32
    %c0_i32_1 = arith.constant 0 : i32
    return %c0_i32, %c0_i32_0 : i32, i32
  }
  func.func @transform_4(%arg0: i32) -> (i32, i32) {
    %c0_i32 = arith.constant 0 : i32
    %c0_i32_0 = arith.constant 0 : i32
    %c0_i32_1 = arith.constant 0 : i32
    return %c0_i32, %c0_i32_0 : i32, i32
  }
}

</mosaic_0001>

<bundles_post_ra>
// kernel: tpu_custom_call.1
= control target key start
LH: loop header
LB: loop body
LE: loop exit
PB: predicated region body
PF: predicated region fallthrough
CT: control target
= control target key end

     0   :  { %10 = vsyncpa [#allocation4], 0  ;;  %s7626_s0 = inlined_call_operand.vmem [shape: bf16[2,18,18,128], index: 0, kind: input, shape index: {}]   ;;  %s7627_s1 = inlined_call_operand.vmem [shape: bf16[1152,128], index: 1, kind: input, shape index: {}]   ;;  %s7628_s2 = inlined_call_operand.hbm [shape: bf16[2,16,16,128], index: 2, kind: output, shape index: {0}]   ;;  %s7629_s3 = inlined_call_operand.hbm [shape: f32[1,128], index: 3, kind: output, shape index: {1}]   ;;  %s7630_s4 = inlined_call_operand.hbm [shape: f32[1,128], index: 4, kind: output, shape index: {2}]  }
   0x1   :  { %12 = vsyncpa [#allocation4 + $0x1], 0 }
   0x2   :  { %13 = vsyncpa [#allocation6], 0  ;;  %s5526_s15 = smov 0   ;;  %s5528_s16 = smov 0  }
   0x3   :  { %s5530_s17 = smov 0   ;;  %s5532_s18 = smov 0  }
   0x4 LB: > { %s5547_s19 = sadd.s32 4294967295, %s5493_s18   ;;  %s4156_s20 = sadd.s32 4294967294, %s5493_s18   ;;  %s5493_s18 = sphi %s5532_s18, %s7823_s18   ;;  %s5489_s17 = sphi %s5530_s17, %s7822_s17   ;;  %s5485_s16 = sphi %s5528_s16, %s7821_s16   ;;  %s5481_s15 = sphi %s5526_s15, %s7820_s15  }
   0x5   : > { %s5551_s21 = sadd.s32 1, %s5493_s18   ;;  %s73_s22 = sadd.s32 1, %s5489_s17 }
   0x6   : > { %s70_s23 = ssub.s32 %s5493_s18, %s5551_s21  ;;  %p83_p0 = scmp.ne.s32.totalorder %s5489_s17, %s5485_s16 }
   0x7   : > { %p71_p1 = scmp.eq.s32.totalorder %s70_s23, 0  ;;  %p84_p2 = scmp.eq.s32.totalorder %s5547_s19, 1 }
   0x8   : > { %p89_p3 = scmp.ne.s32.totalorder %s5485_s16, %s5481_s15  ;;  %p90_p4 = scmp.eq.s32.totalorder %s4156_s20, 1 }
   0x9   : > { %s5562_s24 = scalar_select %p71_p1, %s5489_s17, %s73_s22  }
   0xa   : > { %p5566_p5 = por %p84_p2, %p83_p0  ;;  %p5570_p6 = por %p90_p4, %p89_p3 }
   0xb   : > { %p4159_p7 = scmp.ge.s32.totalorder %s5493_s18, 1  ;;  %p161_p8 = scmp.lt.s32.totalorder %s5493_s18, 3 }
   0xd   : > { %p162_p9 = pnand %p4159_p7, %p161_p8 }
   0xf   : > { %165 = sbr.rel (%p162_p9) target bundleno = 746 (0x2ea), region = 28 }
  0x14   : > { %v5191_v0 = vld [vmem:[%s7627_s1 + $0x138] sm:$0xff]   ;;  %p187_p10 = scmp.lt.s32.totalorder %s5547_s19, 1  ;;  %v5193_v2 = vld [vmem:[%s7627_s1 + $0x130] sm:$0xff]   ;;  %v5195_v4 = vld [vmem:[%s7627_s1 + $0x128] sm:$0xff]   ;;  %vm279_vm0 = vsmask.f32 3328 }
  0x15   : > { %v5192_v1 = vld [vmem:[%s7627_s1 + $0xf8] sm:$0xff]   ;;  %4566 = vmatprep.subr.bf16.mxu0 %v5191_v0  ;;  %5118 = vmatprep.subr.bf16.mxu1 %v5191_v0  ;;  %v5194_v3 = vld [vmem:[%s7627_s1 + $0xf0] sm:$0xff]   ;;  %v5196_v5 = vld [vmem:[%s7627_s1 + $0xe8] sm:$0xff]   ;;  %vm280_vm1 = vsmask.f32 7440  ;;  %vm778_vm3 = vcmask 1042432  }
  0x16   : > { %4567 = vmatpush3.bf16.msra.mxu0 %v5192_v1  ;;  %5126 = vmatpush3.bf16.msra.mxu1 %v5192_v1  ;;  %s188_s11 = scalar_select %p187_p10, %s5547_s19, 1  ;;  %v5197_v6 = vld [vmem:[%s7627_s1 + $0x120] sm:$0xff]   ;;  %v5199_v8 = vld [vmem:[%s7627_s1 + $0x118] sm:$0xff]   ;;  %v5201_v10 = vld [vmem:[%s7627_s1 + $0x110] sm:$0xff]   ;;  %vm779_vm4 = vcmask 1046532  }
  0x17   : > { %4568 = vmatprep.subr.bf16.mxu0 %v5193_v2  ;;  %5119 = vmatprep.subr.bf16.mxu1 %v5193_v2  ;;  %v5198_v7 = vld [vmem:[%s7627_s1 + $0xe0] sm:$0xff]   ;;  %v5200_v9 = vld [vmem:[%s7627_s1 + $0xd8] sm:$0xff]   ;;  %v5202_v13 = vld [vmem:[%s7627_s1 + $0xd0] sm:$0xff]   ;;  %s180_s27 = sand.u32 1, %s5485_s16   ;;  %p4428_p11 = scmp.ne.s32.totalorder %s5547_s19, 0 }
  0x18   : > { %s5134_s22 = smul.u32 216, %s188_s11  ;;  %v5203_v17 = vld [vmem:[%s7627_s1 + $0x108] sm:$0xff]   ;;  %v5205_v43 = vld [vmem:[%s7627_s1 + $0x100] sm:$0xff]   ;;  %vm5680_vm2 = vmor %vm279_vm0, %vm280_vm1  ;;  %s4160_s28 = sshll.u32 %s180_s27, 7 }
  0x19   : > { %v5204_v37 = vld [vmem:[%s7627_s1 + $0xc8] sm:$0xff]   ;;  %v5206_v50 = vld [vmem:[%s7627_s1 + $0xc0] sm:$0xff]   ;;  %vm6087_vm5 = vmor %vm778_vm3, %vm779_vm4  ;;  %s7269_s29 = scalar_lea.vmem [#allocation3], %s4160_s28 }
  0x1a   : > { %4569 = vmatpush3.bf16.msra.mxu0 %v5194_v3  ;;  %5127 = vmatpush3.bf16.msra.mxu1 %v5194_v3  ;;  %s5608_s6 = scalar_lea.vmem %s7626_s0, %s5134_s22  ;;  %v5712_v3 = vld [vmem:[%s7627_s1 + $0xb8] sm:$0xff]   ;;  %v5273_v44 = vld [vmem:[%s7627_s1 + $0x10] sm:$0xff]  }
  0x1b   : > { %4570 = vmatprep.subr.bf16.mxu0 %v5195_v4  ;;  %5120 = vmatprep.subr.bf16.mxu1 %v5195_v4  ;;  %v5617_v11 = vld [vmem:[%s5608_s6] sm:$0xf]  ;;  %v5620_v12 = vld [vmem:[%s5608_s6 + $0x4] sm:$0xf]  ;;  %v5626_v14 = vld [vmem:[%s5608_s6 + $0x8] sm:$0x1] }
  0x1c   : > { %v5629_v15 = vld [vmem:[%s5608_s6 + $0xc] sm:$0xf]  ;;  %v5632_v16 = vld [vmem:[%s5608_s6 + $0x10] sm:$0xf]  ;;  %247 = vst [vmem:[#allocation2] sm:$0xf] %v5617_v11 }
  0x1d   : > { %248 = vst [vmem:[#allocation2 + $0xc] sm:$0xf] %v5620_v12  ;;  %v5640_v18 = vld [vmem:[%s5608_s6 + $0x18] sm:$0xf]  ;;  %v5643_v19 = vld [vmem:[%s5608_s6 + $0x1c] sm:$0xf] }
  0x1e   : > { %4571 = vmatpush3.bf16.msra.mxu0 %v5196_v5  ;;  %5128 = vmatpush3.bf16.msra.mxu1 %v5196_v5  ;;  %249 = vst [vmem:[#allocation2 + $0x18] sm:$0xf] %v5629_v15  ;;  %250 = vst [vmem:[#allocation2 + $0x24] sm:$0xf] %v5632_v16  ;;  %v5648_v20 = vld [vmem:[%s5608_s6 + $0x14] sm:$0x1] }
  0x1f   : > { %4572 = vmatprep.subr.bf16.mxu0 %v5197_v6  ;;  %5121 = vmatprep.subr.bf16.mxu1 %v5197_v6  ;;  %v283_v21 = vshrl.u32 %v5617_v11, 16  ;;  %v286_v22 = vshll.u32 %v5617_v11, 16  ;;  %251 = vst [vmem:[#allocation2 + $0x30] sm:$0xf] %v5640_v18  ;;  %252 = vst [vmem:[#allocation2 + $0x3c] sm:$0xf] %v5643_v19 }
  0x20   : > { %v292_v23 = vshll.u32 %v5620_v12, 16  ;;  %v296_v24 = vshrl.u32 %v5620_v12, 16  ;;  %v302_v25 = vshll.u32 %v5626_v14, 16  ;;  %v307_v26 = vshrl.u32 %v5629_v15, 16  ;;  %v5659_v27 = vld [vmem:[%s5608_s6 + $0x90] sm:$0xf] }
  0x21   : > { %v285_v28 = vrot.slane %v283_v21, 4  ;;  %v288_v29 = vrot.slane %v286_v22, 5  ;;  %v310_v30 = vshll.u32 %v5629_v15, 16  ;;  %v316_v31 = vshll.u32 %v5632_v16, 16  ;;  %v5664_v32 = vld [vmem:[%s5608_s6 + $0x94] sm:$0xf] }
  0x22   : > { %4573 = vmatpush3.bf16.msra.mxu0 %v5198_v7  ;;  %5129 = vmatpush3.bf16.msra.mxu1 %v5198_v7  ;;  %271 = vst [vmem:[#allocation2 + $0x120] sm:$0xf] %v5659_v27  ;;  %v294_v33 = vrot.slane %v292_v23, 5  ;;  %v298_v34 = vrot.slane %v296_v24, 4  ;;  %v304_v35 = vrot.slane %v302_v25, 5  ;;  %v309_v36 = vrot.slane %v307_v26, 4 }
  0x23   : > { %4574 = vmatprep.subr.bf16.mxu0 %v5199_v8  ;;  %5122 = vmatprep.subr.bf16.mxu1 %v5199_v8  ;;  %272 = vst [vmem:[#allocation2 + $0x12c] sm:$0xf] %v5664_v32  ;;  %v289_v38 = vor.u32 %v288_v29, %v285_v28  ;;  %v312_v39 = vrot.slane %v310_v30, 5  ;;  %v318_v40 = vrot.slane %v316_v31, 5  ;;  %v320_v41 = vshrl.u32 %v5632_v16, 16  ;;  %v5717_v4 = vld [vmem:[%s7627_s1 + $0x178] sm:$0xff]  }
  0x24   : > { %v5673_v42 = vld [vmem:[%s5608_s6 + $0x9c] sm:$0xf]  ;;  %v299_v45 = vor.u32 %v298_v34, %v294_v33  ;;  %v326_v46 = vshll.u32 %v5648_v20, 16  ;;  %v331_v47 = vshrl.u32 %v5640_v18, 16  ;;  %v334_v48 = vshll.u32 %v5640_v18, 16 }
  0x25   : > { %v5688_v49 = vld [vmem:[%s5608_s6 + $0xa0] sm:$0xf]  ;;  %273 = vst [vmem:[#allocation2 + $0x138] sm:$0xf] %v5673_v42  ;;  %v290_v52 = vrot.slane %v289_v38, 4  ;;  %v313_v53 = vor.u32 %v312_v39, %v309_v36  ;;  %v322_v54 = vrot.slane %v320_v41, 4 }
  0x26   : > { %4575 = vmatpush3.bf16.msra.mxu0 %v5200_v9  ;;  %5130 = vmatpush3.bf16.msra.mxu1 %v5200_v9  ;;  %v5695_v51 = vld [vmem:[%s5608_s6 + $0x20] sm:$0x1]  ;;  %v340_v55 = vshll.u32 %v5643_v19, 16  ;;  %274 = vst [vmem:[#allocation2 + $0x144] sm:$0xf] %v5688_v49  ;;  %v300_v56 = vrot.slane %v299_v45, 4 }
  0x27   : > { %4576 = vmatprep.subr.bf16.mxu0 %v5201_v10  ;;  %5123 = vmatprep.subr.bf16.mxu1 %v5201_v10  ;;  %v328_v57 = vrot.slane %v326_v46, 5  ;;  %v333_v58 = vrot.slane %v331_v47, 4  ;;  %v336_v59 = vrot.slane %v334_v48, 5  ;;  %v5700_v60 = vld [vmem:[%s5608_s6 + $0xa8] sm:$0xf]  ;;  %v295_v61 = vsel %vm5680_vm2, %v290_v52, %v294_v33 }
  0x28   : > { %v314_v62 = vrot.slane %v313_v53, 4  ;;  %v323_v63 = vor.u32 %v322_v54, %v318_v40  ;;  %v342_v0 = vrot.slane %v340_v55, 5  ;;  %v231_v1 = vld [vmem:[%s5608_s6 + $0x98] sm:$0x1]  ;;  %v5706_v2 = vld [vmem:[%s5608_s6 + $0xac] sm:$0xf]  ;;  %v305_v5 = vsel %vm5680_vm2, %v300_v56, %v304_v35 }
  0x29   : > { %275 = vst [vmem:[#allocation2 + $0x150] sm:$0xf] %v5700_v60  ;;  %v337_v6 = vor.u32 %v336_v59, %v333_v58  ;;  %v344_v7 = vshrl.u32 %v5643_v19, 16  ;;  %v350_v8 = vshll.u32 %v5695_v51, 16  ;;  %698 = vst [vmem:[#allocation2 + $0x4] sm:$0xf] %v295_v61 }
  0x2a   : > { %4577 = vmatpush3.bf16.msra.mxu0 %v5202_v13  ;;  %5131 = vmatpush3.bf16.msra.mxu1 %v5202_v13  ;;  %276 = vst [vmem:[#allocation2 + $0x15c] sm:$0xf] %v5706_v2  ;;  %v319_v9 = vsel %vm5680_vm2, %v314_v62, %v318_v40  ;;  %v324_v10 = vrot.slane %v323_v63, 4  ;;  %699 = vst [vmem:[#allocation2 + $0x10] sm:$0xf] %v305_v5  ;;  %v571_v13 = vshrl.u32 %v5659_v27, 16 }
  0x2b   : > { %4578 = vmatprep.subr.bf16.mxu0 %v5203_v17  ;;  %5124 = vmatprep.subr.bf16.mxu1 %v5203_v17  ;;  %v574_v17 = vshll.u32 %v5659_v27, 16  ;;  %v338_v21 = vrot.slane %v337_v6, 4  ;;  %v346_v22 = vrot.slane %v344_v7, 4  ;;  %v352_v23 = vrot.slane %v350_v8, 5  ;;  %700 = vst [vmem:[#allocation2 + $0x1c] sm:$0xf] %v319_v9 }
  0x2c   : > { %v580_v24 = vshll.u32 %v5664_v32, 16  ;;  %v329_v25 = vsel %vm5680_vm2, %v324_v10, %v328_v57  ;;  %v234_v26 = vld [vmem:[%s5608_s6 + $0xa4] sm:$0x1]  ;;  %v573_v28 = vrot.slane %v571_v13, 4  ;;  %v584_v30 = vshrl.u32 %v5664_v32, 16 }
  0x2d   : > { %v576_v29 = vrot.slane %v574_v17, 5  ;;  %v5735_v31 = vsel %vm5680_vm2, %v338_v21, %v342_v0  ;;  %v347_v33 = vor.u32 %v346_v22, %v342_v0  ;;  %701 = vst [vmem:[#allocation2 + $0x28] sm:$0xf] %v329_v25  ;;  %v590_v35 = vshll.u32 %v231_v1, 16  ;;  %v5740_v36 = vld [vmem:[%s5608_s6 + $0x24] sm:$0xf] }
  0x2e   : > { %4579 = vmatpush3.bf16.msra.mxu0 %v5204_v37  ;;  %5132 = vmatpush3.bf16.msra.mxu1 %v5204_v37  ;;  %v582_v34 = vrot.slane %v580_v24, 5  ;;  %702 = vst [vmem:[#allocation2 + $0x34] sm:$0xf] %v5735_v31  ;;  %v586_v38 = vrot.slane %v584_v30, 4  ;;  %v595_v39 = vshrl.u32 %v5673_v42, 16  ;;  %v598_v40 = vshll.u32 %v5673_v42, 16 }
  0x2f   : > { %4580 = vmatprep.subr.bf16.mxu0 %v5205_v43  ;;  %5125 = vmatprep.subr.bf16.mxu1 %v5205_v43  ;;  %v577_v37 = vor.u32 %v576_v29, %v573_v28  ;;  %v5746_v41 = vld [vmem:[%s5608_s6 + $0x28] sm:$0xf]  ;;  %253 = vst [vmem:[#allocation2 + $0x48] sm:$0xf] %v5740_v36  ;;  %v348_v43 = vrot.slane %v347_v33, 4  ;;  %v592_v45 = vrot.slane %v590_v35, 5 }
  0x30   : > { %v604_v46 = vshll.u32 %v5688_v49, 16  ;;  %v608_v47 = vshrl.u32 %v5688_v49, 16  ;;  %254 = vst [vmem:[#allocation2 + $0x54] sm:$0xf] %v5746_v41  ;;  %v5752_v48 = vld [vmem:[#allocation2] sm:$0xff]  ;;  %v587_v52 = vor.u32 %v586_v38, %v582_v34  ;;  %v597_v53 = vrot.slane %v595_v39, 4 }
  0x31   : > { %7681 = vst [vmem:[#allocation10_spill] sm:$0xff] %v5752_v48  ;;  %v600_v54 = vrot.slane %v598_v40, 5  ;;  %v5755_v55 = vld [vmem:[%s5608_s6 + $0xb4] sm:$0xf]  ;;  %v5759_v56 = vsel %vm5680_vm2, %v348_v43, %v352_v23  ;;  %v5761_v57 = vld [vmem:[#allocation2 + $0xc] sm:$0xff]  ;;  %v614_v61 = vshll.u32 %v234_v26, 16 }
  0x32   : > { %4581 = vmatpush3.bf16.msra.mxu0 %v5206_v50  ;;  %5133 = vmatpush3.bf16.msra.mxu1 %v5206_v50  ;;  %v578_v50 = vrot.slane %v577_v37, 4  ;;  %7682 = vst [vmem:[#allocation11_spill] sm:$0xff] %v5761_v57  ;;  %1069 = vst [vmem:[#allocation2] sm:$0xf] %v5629_v15  ;;  %v606_v58 = vrot.slane %v604_v46, 5  ;;  %v610_v59 = vrot.slane %v608_v47, 4 }
  0x33   : > { %5022 = vmatprep.subr.bf16.mxu0 %v5712_v3  ;;  %4974 = vmatprep.subr.bf16.mxu1 %v5717_v4  ;;  %1127 = vst [vmem:[#allocation2 + $0x4] sm:$0xf] %v319_v9  ;;  %v5765_v62 = vld [vmem:[%s5608_s6 + $0xb8] sm:$0xf]  ;;  %277 = vst [vmem:[#allocation2 + $0x168] sm:$0xf] %v5755_v55  ;;  %v601_v6 = vor.u32 %v600_v54, %v597_v53 }
  0x34   : > { %703 = vst [vmem:[#allocation2 + $0x40] sm:$0xf] %v5759_v56  ;;  %v5769_v63 = vld [vmem:[#allocation2 + $0x18] sm:$0xff]  ;;  %1070 = vst [vmem:[#allocation2 + $0xc] sm:$0xf] %v5632_v16  ;;  %v5775_v1 = vsel %vm5680_vm2, %v578_v50, %v582_v34  ;;  %v588_v5 = vrot.slane %v587_v52, 4  ;;  %v611_v8 = vor.u32 %v610_v59, %v606_v58 }
  0x35   : > { %1128 = vst [vmem:[#allocation2 + $0x10] sm:$0xf] %v329_v25  ;;  %v237_v0 = vld [vmem:[%s5608_s6 + $0xb0] sm:$0x1]  ;;  %v619_v7 = vshrl.u32 %v5700_v60, 16  ;;  %v616_v9 = vrot.slane %v614_v61, 5 }
  0x36   : > { %278 = vst [vmem:[#allocation2 + $0x174] sm:$0xf] %v5765_v62  ;;  %1129 = vst [vmem:[#allocation2 + $0x1c] sm:$0xf] %v5735_v31  ;;  %v622_v10 = vshll.u32 %v5700_v60, 16  ;;  %v628_v13 = vshll.u32 %v5706_v2, 16  ;;  %v5788_v21 = vsel %vm5680_vm2, %v588_v5, %v592_v45 }
  0x37   : > { %1071 = vst [vmem:[#allocation2 + $0x18] sm:$0xf] %v5640_v18  ;;  %722 = vst [vmem:[#allocation2 + $0x124] sm:$0xf] %v5775_v1  ;;  %v5784_v17 = vld [vmem:[#allocation2 + $0x24] sm:$0xff]  ;;  %v602_v22 = vrot.slane %v601_v6, 4 }
  0x38   : > { %7683 = vst [vmem:[#allocation12_spill] sm:$0xff] %v5784_v17  ;;  %7684 = vst [vmem:[#allocation13_spill] sm:$0xff] %v5788_v21  ;;  %v621_v23 = vrot.slane %v619_v7, 4  ;;  %v632_v24 = vshrl.u32 %v5706_v2, 16  ;;  %v5792_v25 = vld [vmem:[%s5608_s6 + $0x2c] sm:$0x1] }
  0x39   : > { %1130 = vst [vmem:[#allocation2 + $0x28] sm:$0xf] %v5759_v56  ;;  %1072 = vst [vmem:[#allocation2 + $0x24] sm:$0xf] %v5643_v19  ;;  %v612_v26 = vrot.slane %v611_v8, 4  ;;  %v624_v28 = vrot.slane %v622_v10, 5  ;;  %v5799_v33 = vsel %vm5680_vm2, %v602_v22, %v606_v58 }
  0x3a   : > { %v630_v29 = vrot.slane %v628_v13, 5  ;;  %v638_v30 = vshll.u32 %v237_v0, 16  ;;  %723 = vst [vmem:[#allocation2 + $0x130] sm:$0xf] %v5788_v21  ;;  %7685 = vst [vmem:[#allocation14_spill] sm:$0xff] %v5799_v33  ;;  %v634_v34 = vrot.slane %v632_v24, 4 }
  0x3b   : > { %v355_v35 = vshrl.u32 %v5740_v36, 16  ;;  %v358_v37 = vshll.u32 %v5740_v36, 16  ;;  %v5803_v38 = vld [vmem:[#allocation2 + $0x30] sm:$0xff]  ;;  %v5807_v39 = vsel %vm5680_vm2, %v612_v26, %v616_v9  ;;  %v625_v40 = vor.u32 %v624_v28, %v621_v23  ;;  %724 = vst [vmem:[#allocation2 + $0x13c] sm:$0xf] %v5799_v33  ;;  %v1203_v46 = vld [vmem:[#allocation2] sm:$0xff] }
  0x3c   : > { %7686 = vst [vmem:[#allocation15_spill] sm:$0xff] %v5803_v38  ;;  %7687 = vst [vmem:[#allocation16_spill] sm:$0xff] %v5807_v39  ;;  %v640_v43 = vrot.slane %v638_v30, 5  ;;  %v364_v45 = vshll.u32 %v5746_v41, 16  ;;  %v635_v47 = vor.u32 %v634_v34, %v630_v29  ;;  %v368_v53 = vshrl.u32 %v5746_v41, 16  ;;  %v1205_v59 = vld [vmem:[#allocation2 + $0xc] sm:$0xff] }
  0x3d   : > { %1073 = vst [vmem:[#allocation2 + $0x30] sm:$0xf] %v5740_v36  ;;  %725 = vst [vmem:[#allocation2 + $0x148] sm:$0xf] %v5807_v39  ;;  %v357_v50 = vrot.slane %v355_v35, 4  ;;  %v360_v52 = vrot.slane %v358_v37, 5  ;;  %v4179_v10 = vcombine.low %v1203_v46, %v1205_v59 }
  0x3e   : > { %v5815_v54 = vld [vmem:[%s5608_s6 + $0xbc] sm:$0x1]  ;;  %v5818_v58 = vld [vmem:[%s5608_s6 + $0x30] sm:$0xf]  ;;  %v626_v0 = vrot.slane %v625_v40, 4  ;;  %v366_v5 = vrot.slane %v364_v45, 5 }
  0x3f   : > { %v5207_v61 = vld [vmem:[#allocation2 + $0x4] ss:$12 sps:$4 sm:$0xff]   ;;  %v374_v6 = vshll.u32 %v5792_v25, 16  ;;  %255 = vst [vmem:[#allocation2 + $0x60] sm:$0xf] %v5818_v58  ;;  %v636_v8 = vrot.slane %v635_v47, 4  ;;  %v361_v13 = vor.u32 %v360_v52, %v357_v50 }
  0x40   : > { %2759 = vst [vmem:[#allocation2] sm:$0xf] %v5640_v18  ;;  %2760 = vst [vmem:[#allocation2 + $0xc] sm:$0xf] %v5643_v19  ;;  %v5828_v9 = vld [vmem:[#allocation2 + $0x120] sm:$0xff]  ;;  %v370_v22 = vrot.slane %v368_v53, 4  ;;  %1747 = vmatprep.mubr.bf16.mxu0 %v5207_v61  ;;  %v5840_v26 = vsel %vm5680_vm2, %v626_v0, %v630_v29 }
  0x41   : > { %2817 = vst [vmem:[#allocation2 + $0x4] sm:$0xf] %v5735_v31  ;;  %2818 = vst [vmem:[#allocation2 + $0x10] sm:$0xf] %v5759_v56  ;;  %v5833_v23 = vld [vmem:[%s7627_s1 + $0xb0] sm:$0xff]   ;;  %v376_v31 = vrot.slane %v374_v6, 5  ;;  %v5853_v35 = vsel %vm5680_vm2, %v636_v8, %v640_v43  ;;  %1748 = vmatmul.mubr.bf16.vlgmr.msra.gmra.mxu0 %v4179_v10 }
  0x42   : > { %7688 = vst [vmem:[#allocation17_spill] sm:$0xff] %v5828_v9  ;;  %v5836_v24 = vld [vmem:[%s5608_s6 + $0x34] sm:$0xf]  ;;  %1093 = vst [vmem:[#allocation2 + $0x120] sm:$0xf] %v5673_v42  ;;  %v5844_v56 = vld [vmem:[#allocation2 + $0x18] sm:$0xff]  ;;  %v371_v40 = vor.u32 %v370_v22, %v366_v5  ;;  %5023 = vmatpush3.bf16.msra.mxu0 %v5712_v3 }
  0x43   : > { %1151 = vst [vmem:[#allocation2 + $0x124] sm:$0xf] %v5799_v33  ;;  %v643_v28 = vshrl.u32 %v5755_v55, 16  ;;  %v646_v30 = vshll.u32 %v5755_v55, 16  ;;  %v5848_v34 = vld [vmem:[#allocation2 + $0x3c] sm:$0xff]  ;;  %v5856_v29 = vld [vmem:[#allocation2 + $0x12c] sm:$0xff]  ;;  %5024 = vmatprep.subr.bf16.mxu0 %v5833_v23 }
  0x44   : > { %7689 = vst [vmem:[#allocation18_spill] sm:$0xff] %v5848_v34  ;;  %256 = vst [vmem:[#allocation2 + $0x6c] sm:$0xf] %v5836_v24  ;;  %v362_v37 = vrot.slane %v361_v13, 4  ;;  %v5858_v45 = vld [vmem:[#allocation2 + $0x24] sm:$0xff]  ;;  %v652_v47 = vshll.u32 %v5765_v62, 16 }
  0x45   : > { %726 = vst [vmem:[#allocation2 + $0x154] sm:$0xf] %v5840_v26  ;;  %7690 = vst [vmem:[#allocation19_spill] sm:$0xff] %v5856_v29  ;;  %v5214_v46 = vld [vmem:[#allocation2 + $0x1c] ss:$12 sps:$4 sm:$0xff]   ;;  %v645_v43 = vrot.slane %v643_v28, 4  ;;  %v4182_v8 = vcombine.low %v5844_v56, %v5858_v45 }
  0x46   : > { %1074 = vst [vmem:[#allocation2 + $0x3c] sm:$0xf] %v5746_v41  ;;  %727 = vst [vmem:[#allocation2 + $0x160] sm:$0xf] %v5853_v35  ;;  %v648_v50 = vrot.slane %v646_v30, 5  ;;  %v656_v52 = vshrl.u32 %v5765_v62, 16  ;;  %v367_v0 = vsel %vm5680_vm2, %v362_v37, %v366_v5  ;;  %1755 = vmatprep.mubr.bf16.mxu0 %v5214_v46  ;;  %5025 = vmatpush3.bf16.msra.mxu0 %v5833_v23 }
  0x47   : > { %1094 = vst [vmem:[#allocation2 + $0x12c] sm:$0xf] %v5688_v49  ;;  %1152 = vst [vmem:[#allocation2 + $0x130] sm:$0xf] %v5807_v39  ;;  %v662_v53 = vshll.u32 %v5815_v54, 16  ;;  %v5873_v61 = vld [vmem:[#allocation2 + $0x138] sm:$0xff] }
  0x48   : > { %2761 = vst [vmem:[#allocation2 + $0x18] sm:$0xf] %v5740_v36  ;;  %2762 = vst [vmem:[#allocation2 + $0x24] sm:$0xf] %v5746_v41  ;;  %v5871_v59 = vld [vmem:[%s5608_s6 + $0x38] sm:$0x1]  ;;  %v649_v5 = vor.u32 %v648_v50, %v645_v43 }
  0x49   : > { %7691 = vst [vmem:[#allocation20_spill] sm:$0xff] %v5873_v61  ;;  %v372_v6 = vrot.slane %v371_v40, 4  ;;  %v654_v3 = vrot.slane %v652_v47, 5  ;;  %v5881_v10 = vld [vmem:[%s5608_s6 + $0xc0] sm:$0xf]  ;;  %v5231_v54 = vld [vmem:[%s7627_s1 + $0xa8] sm:$0xff]   ;;  %1756 = vmatmul.mubr.bf16.gmra.mxu0 %v4182_v8 }
  0x4a   : > { %v5886_v13 = vld [vmem:[#allocation2 + $0x144] sm:$0xff]  ;;  %1153 = vst [vmem:[#allocation2 + $0x13c] sm:$0xf] %v5840_v26  ;;  %1095 = vst [vmem:[#allocation2 + $0x138] sm:$0xf] %v5700_v60  ;;  %v658_v22 = vrot.slane %v656_v52, 4  ;;  %5026 = vmatprep.subr.bf16.mxu0 %v5231_v54 }
  0x4b   : > { %7692 = vst [vmem:[#allocation21_spill] sm:$0xff] %v5886_v13  ;;  %2819 = vst [vmem:[#allocation2 + $0x1c] sm:$0xf] %v367_v0  ;;  %v664_v28 = vrot.slane %v662_v53, 5  ;;  %v379_v56 = vshrl.u32 %v5818_v58, 16  ;;  %v377_v37 = vsel %vm5680_vm2, %v372_v6, %v376_v31  ;;  %v382_v40 = vshll.u32 %v5818_v58, 16  ;;  %5027 = vmatpush3.bf16.msra.mxu0 %v5231_v54 }
  0x4c   : > { %704 = vst [vmem:[#allocation2 + $0x4c] sm:$0xf] %v367_v0  ;;  %1131 = vst [vmem:[#allocation2 + $0x34] sm:$0xf] %v367_v0  ;;  %v5892_v30 = vld [vmem:[%s5608_s6 + $0xc4] sm:$0xf]  ;;  %v659_v43 = vor.u32 %v658_v22, %v654_v3 }
  0x4d   : > { %1154 = vst [vmem:[#allocation2 + $0x148] sm:$0xf] %v5853_v35  ;;  %1096 = vst [vmem:[#allocation2 + $0x144] sm:$0xf] %v5706_v2  ;;  %v388_v45 = vshll.u32 %v5836_v24, 16  ;;  %v392_v46 = vshrl.u32 %v5836_v24, 16 }
  0x4e   : > { %2820 = vst [vmem:[#allocation2 + $0x28] sm:$0xf] %v377_v37  ;;  %705 = vst [vmem:[#allocation2 + $0x58] sm:$0xf] %v377_v37  ;;  %v650_v47 = vrot.slane %v649_v5, 4  ;;  %v381_v50 = vrot.slane %v379_v56, 4 }
  0x4f   : > { %v398_v52 = vshll.u32 %v5871_v59, 16  ;;  %1132 = vst [vmem:[#allocation2 + $0x40] sm:$0xf] %v377_v37  ;;  %v5904_v53 = vld [vmem:[%s5608_s6 + $0xc8] sm:$0x1]  ;;  %v1251_v0 = vld [vmem:[#allocation2 + $0x120] sm:$0xff] }
  0x50   : > { %v384_v31 = vrot.slane %v382_v40, 5  ;;  %v390_v6 = vrot.slane %v388_v45, 5  ;;  %v394_v7 = vrot.slane %v392_v46, 4  ;;  %v1102_v61 = vshrl.u32 %v5881_v10, 16  ;;  %v5910_v5 = vld [vmem:[%s7627_s1 + $0x170] sm:$0xff]   ;;  %v5917_v29 = vld [vmem:[#allocation2 + $0x15c] sm:$0xff] }
  0x51   : > { %v655_v23 = vsel %vm5680_vm2, %v650_v47, %v654_v3  ;;  %v660_v22 = vrot.slane %v659_v43, 4  ;;  %v400_v56 = vrot.slane %v398_v52, 5  ;;  %v5914_v37 = vld [vmem:[#allocation2 + $0x150] sm:$0xff]  ;;  %v1105_v13 = vshll.u32 %v5881_v10, 16  ;;  %7694 = vst [vmem:[#allocation23_spill] sm:$0xff] %v5917_v29  ;;  %v5943_v54 = vld [vmem:[%s7627_s1 + $0x168] sm:$0xff]  }
  0x52   : > { %7693 = vst [vmem:[#allocation22_spill] sm:$0xff] %v5914_v37  ;;  %v1253_v40 = vld [vmem:[#allocation2 + $0x12c] sm:$0xff]  ;;  %728 = vst [vmem:[#allocation2 + $0x16c] sm:$0xf] %v655_v23  ;;  %v385_v46 = vor.u32 %v384_v31, %v381_v50  ;;  %v395_v9 = vor.u32 %v394_v7, %v390_v6  ;;  %v1104_v39 = vrot.slane %v1102_v61, 4  ;;  %v1111_v3 = vshll.u32 %v5892_v30, 16 }
  0x53   : > { %v5209_v45 = vld [vmem:[#allocation2 + $0x124] ss:$12 sps:$4 sm:$0xff]   ;;  %1097 = vst [vmem:[#allocation2 + $0x150] sm:$0xf] %v5755_v55  ;;  %1155 = vst [vmem:[#allocation2 + $0x154] sm:$0xf] %v655_v23  ;;  %v4215_v8 = vcombine.low %v1251_v0, %v1253_v40  ;;  %v665_v7 = vsel %vm5680_vm2, %v660_v22, %v664_v28 }
  0x54   : > { %2783 = vst [vmem:[#allocation2 + $0x120] sm:$0xf] %v5700_v60  ;;  %2784 = vst [vmem:[#allocation2 + $0x12c] sm:$0xf] %v5706_v2  ;;  %v1107_v47 = vrot.slane %v1105_v13, 5  ;;  %v1115_v61 = vshrl.u32 %v5892_v30, 16  ;;  %1843 = vmatprep.mubr.bf16.mxu1 %v5209_v45 }
  0x55   : > { %2841 = vst [vmem:[#allocation2 + $0x124] sm:$0xf] %v5840_v26  ;;  %2842 = vst [vmem:[#allocation2 + $0x130] sm:$0xf] %v5853_v35  ;;  %v5930_v43 = vld [vmem:[%s5608_s6 + $0x3c] sm:$0xf]  ;;  %1844 = vmatmul.mubr.bf16.vlgmr.msra.gmra.mxu1 %v4215_v8 }
  0x56   : > { %1098 = vst [vmem:[#allocation2 + $0x15c] sm:$0xf] %v5765_v62  ;;  %v5932_v50 = vld [vmem:[#allocation2 + $0x138] sm:$0xff]  ;;  %729 = vst [vmem:[#allocation2 + $0x178] sm:$0xf] %v665_v7  ;;  %v386_v26 = vrot.slane %v385_v46, 4  ;;  %v1108_v22 = vor.u32 %v1107_v47, %v1104_v39  ;;  %4975 = vmatpush3.bf16.msra.mxu1 %v5717_v4 }
  0x57   : > { %v396_v52 = vrot.slane %v395_v9, 4  ;;  %v5934_v35 = vld [vmem:[#allocation2 + $0x30] sm:$0xff]  ;;  %v1113_v0 = vrot.slane %v1111_v3, 5  ;;  %v1121_v28 = vshll.u32 %v5904_v53, 16  ;;  %1156 = vst [vmem:[#allocation2 + $0x160] sm:$0xf] %v665_v7  ;;  %4976 = vmatprep.subr.bf16.mxu1 %v5910_v5 }
  0x58   : > { %257 = vst [vmem:[#allocation2 + $0x78] sm:$0xf] %v5930_v43  ;;  %v5938_v13 = vld [vmem:[#allocation2 + $0x144] sm:$0xff]  ;;  %v1117_v9 = vrot.slane %v1115_v61, 4  ;;  %v5946_v40 = vld [vmem:[%s5608_s6 + $0x40] sm:$0xf]  ;;  %v391_v46 = vsel %vm5680_vm2, %v386_v26, %v390_v6 }
  0x59   : > { %v5216_v31 = vld [vmem:[#allocation2 + $0x13c] ss:$12 sps:$4 sm:$0xff]   ;;  %2785 = vst [vmem:[#allocation2 + $0x138] sm:$0xf] %v5755_v55  ;;  %2786 = vst [vmem:[#allocation2 + $0x144] sm:$0xf] %v5765_v62  ;;  %v401_v3 = vsel %vm5680_vm2, %v396_v52, %v400_v56 }
  0x5a   : > { %2843 = vst [vmem:[#allocation2 + $0x13c] sm:$0xf] %v655_v23  ;;  %2844 = vst [vmem:[#allocation2 + $0x148] sm:$0xf] %v665_v7  ;;  %v1213_v8 = vld [vmem:[#allocation2 + $0x3c] sm:$0xff]  ;;  %v1123_v61 = vrot.slane %v1121_v28, 5  ;;  %1851 = vmatprep.mubr.bf16.mxu1 %v5216_v31  ;;  %v1118_v6 = vor.u32 %v1117_v9, %v1113_v0  ;;  %4977 = vmatpush3.bf16.msra.mxu1 %v5910_v5 }
  0x5b   : > { %v5221_v47 = vld [vmem:[#allocation2 + $0x34] ss:$12 sps:$4 sm:$0xff]   ;;  %v5962_v45 = vld [vmem:[%s5608_s6 + $0x44] sm:$0x1]  ;;  %258 = vst [vmem:[#allocation2 + $0x84] sm:$0xf] %v5946_v40  ;;  %v4185_v23 = vcombine.low %v5934_v35, %v1213_v8  ;;  %4978 = vmatprep.subr.bf16.mxu1 %v5943_v54 }
  0x5c   : > { %2763 = vst [vmem:[#allocation2 + $0x30] sm:$0xf] %v5818_v58  ;;  %2764 = vst [vmem:[#allocation2 + $0x3c] sm:$0xf] %v5836_v24  ;;  %v1109_v4 = vrot.slane %v1108_v22, 4  ;;  %v403_v56 = vshrl.u32 %v5930_v43, 16  ;;  %1763 = vmatprep.mubr.bf16.mxu0 %v5221_v47 }
  0x5d   : > { %2821 = vst [vmem:[#allocation2 + $0x34] sm:$0xf] %v391_v46  ;;  %2822 = vst [vmem:[#allocation2 + $0x40] sm:$0xf] %v401_v3  ;;  %v5970_v7 = vld [vmem:[#allocation2 + $0x48] sm:$0xff]  ;;  %v5972_v26 = vld [vmem:[#allocation2 + $0x54] sm:$0xff]  ;;  %1764 = vmatmul.mubr.bf16.gmra.mxu0 %v4185_v23 }
  0x5e   : > { %706 = vst [vmem:[#allocation2 + $0x64] sm:$0xf] %v391_v46  ;;  %707 = vst [vmem:[#allocation2 + $0x70] sm:$0xf] %v401_v3  ;;  %v5975_v52 = vld [vmem:[%s5608_s6 + $0xcc] sm:$0xf]  ;;  %v1114_v47 = vsel %vm5680_vm2, %v1109_v4, %v1113_v0  ;;  %4979 = vmatpush3.bf16.msra.mxu1 %v5943_v54 }
  0x5f   : > { %7695 = vst [vmem:[#allocation24_spill] sm:$0xff] %v5970_v7  ;;  %7696 = vst [vmem:[#allocation25_spill] sm:$0xff] %v5972_v26  ;;  %v406_v28 = vshll.u32 %v5930_v43, 16  ;;  %v412_v31 = vshll.u32 %v5946_v40, 16  ;;  %v416_v22 = vshrl.u32 %v5946_v40, 16  ;;  %v422_v9 = vshll.u32 %v5962_v45, 16 }
  0x60   : > { %1075 = vst [vmem:[#allocation2 + $0x48] sm:$0xf] %v5818_v58  ;;  %1076 = vst [vmem:[#allocation2 + $0x54] sm:$0xf] %v5836_v24  ;;  %v5984_v35 = vld [vmem:[%s5608_s6 + $0xd0] sm:$0xf] }
  0x61   : > { %1133 = vst [vmem:[#allocation2 + $0x4c] sm:$0xf] %v391_v46  ;;  %1134 = vst [vmem:[#allocation2 + $0x58] sm:$0xf] %v401_v3  ;;  %v5989_v8 = vld [vmem:[%s7627_s1 + $0x160] sm:$0xff]   ;;  %v1119_v53 = vrot.slane %v1118_v6, 4 }
  0x62   : > { %v5993_v39 = vld [vmem:[#allocation2 + $0x150] sm:$0xff]  ;;  %v405_v37 = vrot.slane %v403_v56, 4  ;;  %v5996_v57 = vld [vmem:[#allocation2 + $0x168] sm:$0xff]  ;;  %v408_v3 = vrot.slane %v406_v28, 5  ;;  %v414_v48 = vrot.slane %v412_v31, 5  ;;  %v418_v33 = vrot.slane %v416_v22, 4  ;;  %4980 = vmatprep.subr.bf16.mxu1 %v5989_v8 }
  0x63   : > { %v246_v29 = vld [vmem:[%s5608_s6 + $0xd4] sm:$0x1]  ;;  %7697 = vst [vmem:[#allocation26_spill] sm:$0xff] %v5996_v57  ;;  %v424_v21 = vrot.slane %v422_v9, 5  ;;  %1099 = vst [vmem:[#allocation2 + $0x168] sm:$0xf] %v5881_v10  ;;  %v1124_v0 = vsel %vm5680_vm2, %v1119_v53, %v1123_v61  ;;  %v7699_v9 = vcombine.low %v5932_v50, %v5938_v13  ;;  %4981 = vmatpush3.bf16.msra.mxu1 %v5989_v8 }
  0x64   : > { %1157 = vst [vmem:[#allocation2 + $0x16c] sm:$0xf] %v1114_v47  ;;  %v6005_v4 = vld [vmem:[#allocation2 + $0x15c] sm:$0xff]  ;;  %v6007_v56 = vld [vmem:[#allocation2 + $0x174] sm:$0xff]  ;;  %v2792_v5 = vshrl.u32 %v5975_v52, 16  ;;  %v2795_v23 = vshll.u32 %v5975_v52, 16  ;;  %v409_v61 = vor.u32 %v408_v3, %v405_v37  ;;  %v419_v31 = vor.u32 %v418_v33, %v414_v48 }
  0x65   : > { %v5223_v6 = vld [vmem:[#allocation2 + $0x154] ss:$12 sps:$4 sm:$0xff]   ;;  %7698 = vst [vmem:[#allocation27_spill] sm:$0xff] %v6007_v56  ;;  %2787 = vst [vmem:[#allocation2 + $0x150] sm:$0xf] %v5881_v10  ;;  %v2801_v22 = vshll.u32 %v5984_v35, 16  ;;  %1852 = vmatmul.mubr.bf16.gmra.mxu1 %v7699_v9 }
  0x66   : > { %2788 = vst [vmem:[#allocation2 + $0x15c] sm:$0xf] %v5892_v30  ;;  %2845 = vst [vmem:[#allocation2 + $0x154] sm:$0xf] %v1114_v47  ;;  %v6025_v28 = vld [vmem:[%s7627_s1 + $0x158] sm:$0xff]   ;;  %v2794_v47 = vrot.slane %v2792_v5, 4  ;;  %1859 = vmatprep.mubr.bf16.mxu1 %v5223_v6 }
  0x67   : > { %2846 = vst [vmem:[#allocation2 + $0x160] sm:$0xf] %v1124_v0  ;;  %1100 = vst [vmem:[#allocation2 + $0x174] sm:$0xf] %v5892_v30  ;;  %v2797_v46 = vrot.slane %v2795_v23, 5  ;;  %v2805_v53 = vshrl.u32 %v5984_v35, 16  ;;  %4982 = vmatprep.subr.bf16.mxu1 %v6025_v28 }
  0x68   : > { %1158 = vst [vmem:[#allocation2 + $0x178] sm:$0xf] %v1124_v0  ;;  %v2811_v37 = vshll.u32 %v246_v29, 16  ;;  %v410_v33 = vrot.slane %v409_v61, 4  ;;  %v420_v3 = vrot.slane %v419_v31, 4  ;;  %v2803_v0 = vrot.slane %v2801_v22, 5  ;;  %4983 = vmatpush3.bf16.msra.mxu1 %v6025_v28 }
  0x69   : > { %v6029_v57 = vld [vmem:[#allocation2 + $0x60] sm:$0xff]  ;;  %v1215_v13 = vld [vmem:[#allocation2 + $0x48] sm:$0xff]  ;;  %v1217_v5 = vld [vmem:[#allocation2 + $0x54] sm:$0xff]  ;;  %v2798_v9 = vor.u32 %v2797_v46, %v2794_v47  ;;  %v2807_v29 = vrot.slane %v2805_v53, 4  ;;  %v4162_v22 = vrot.slane %v5617_v11, 9  ;;  %v4164_v28 = vrot.slane %v5640_v18, 9 }
  0x6a   : > { %v5227_v23 = vld [vmem:[#allocation2 + $0x4c] ss:$12 sps:$4 sm:$0xff]   ;;  %v2813_v56 = vrot.slane %v2811_v37, 5  ;;  %1077 = vst [vmem:[#allocation2 + $0x60] sm:$0xf] %v5930_v43  ;;  %v415_v6 = vsel %vm5680_vm2, %v410_v33, %v414_v48  ;;  %v425_v61 = vsel %vm5680_vm2, %v420_v3, %v424_v21  ;;  %v4188_v31 = vcombine.low %v1215_v13, %v1217_v5  ;;  %v6054_v48 = vld [vmem:[%s7627_s1 + $0x150] sm:$0xff]  }
  0x6b   : > { %2765 = vst [vmem:[#allocation2 + $0x48] sm:$0xf] %v5930_v43  ;;  %2766 = vst [vmem:[#allocation2 + $0x54] sm:$0xf] %v5946_v40  ;;  %v6044_v46 = vld [vmem:[%s5608_s6 + $0x48] sm:$0xf]  ;;  %1771 = vmatprep.mubr.bf16.mxu0 %v5227_v23  ;;  %v2808_v37 = vor.u32 %v2807_v29, %v2803_v0  ;;  %4984 = vmatprep.subr.bf16.mxu1 %v6054_v48 }
  0x6c   : > { %v6047_v53 = vld [vmem:[%s5608_s6 + $0x4c] sm:$0xf]  ;;  %2823 = vst [vmem:[#allocation2 + $0x4c] sm:$0xf] %v415_v6  ;;  %2824 = vst [vmem:[#allocation2 + $0x58] sm:$0xf] %v425_v61  ;;  %1772 = vmatmul.mubr.bf16.gmra.mxu0 %v4188_v31  ;;  %4985 = vmatpush3.bf16.msra.mxu1 %v6054_v48 }
  0x6d   : > { %708 = vst [vmem:[#allocation2 + $0x7c] sm:$0xf] %v415_v6  ;;  %709 = vst [vmem:[#allocation2 + $0x88] sm:$0xf] %v425_v61  ;;  %v6056_v21 = vld [vmem:[#allocation2 + $0x168] sm:$0xff]  ;;  %v2799_v47 = vrot.slane %v2798_v9, 4 }
  0x6e   : > { %v6059_v33 = vld [vmem:[%s5608_s6 + $0x50] sm:$0x1]  ;;  %v427_v3 = vshrl.u32 %v6044_v46, 16  ;;  %v430_v13 = vshll.u32 %v6044_v46, 16  ;;  %1135 = vst [vmem:[#allocation2 + $0x64] sm:$0xf] %v415_v6 }
  0x6f   : > { %259 = vst [vmem:[#allocation2 + $0x90] sm:$0xf] %v6044_v46  ;;  %260 = vst [vmem:[#allocation2 + $0x9c] sm:$0xf] %v6047_v53  ;;  %v436_v5 = vshll.u32 %v6047_v53, 16  ;;  %v440_v23 = vshrl.u32 %v6047_v53, 16  ;;  %v2804_v31 = vsel %vm5680_vm2, %v2799_v47, %v2803_v0 }
  0x70   : > { %v446_v9 = vshll.u32 %v6059_v33, 16  ;;  %v6069_v29 = vld [vmem:[#allocation2 + $0x6c] sm:$0xff]  ;;  %v5240_v6 = vld [vmem:[%s7627_s1 + $0xa0] sm:$0xff]   ;;  %v6076_v54 = vld [vmem:[#allocation2 + $0x174] sm:$0xff]  ;;  %v2809_v50 = vrot.slane %v2808_v37, 4  ;;  %v429_v26 = vrot.slane %v427_v3, 4 }
  0x71   : > { %7700 = vst [vmem:[#allocation28_spill] sm:$0xff] %v6069_v29  ;;  %v5229_v8 = vld [vmem:[#allocation2 + $0x16c] ss:$12 sps:$4 sm:$0xff]   ;;  %v432_v7 = vrot.slane %v430_v13, 5  ;;  %1078 = vst [vmem:[#allocation2 + $0x6c] sm:$0xf] %v5946_v40  ;;  %v4224_v11 = vcombine.low %v6056_v21, %v6076_v54  ;;  %5028 = vmatprep.subr.bf16.mxu0 %v5240_v6 }
  0x72   : > { %1136 = vst [vmem:[#allocation2 + $0x70] sm:$0xf] %v425_v61  ;;  %2789 = vst [vmem:[#allocation2 + $0x168] sm:$0xf] %v5975_v52  ;;  %v438_v34 = vrot.slane %v436_v5, 5  ;;  %v442_v38 = vrot.slane %v440_v23, 4  ;;  %v7703_v61 = vcombine.low %v5993_v39, %v6005_v4  ;;  %v2814_v47 = vsel %vm5680_vm2, %v2809_v50, %v2813_v56  ;;  %5029 = vmatpush3.bf16.msra.mxu0 %v5240_v6 }
  0x73   : > { %2790 = vst [vmem:[#allocation2 + $0x174] sm:$0xf] %v5984_v35  ;;  %2847 = vst [vmem:[#allocation2 + $0x16c] sm:$0xf] %v2804_v31  ;;  %v448_v17 = vrot.slane %v446_v9, 5  ;;  %v433_v37 = vor.u32 %v432_v7, %v429_v26  ;;  %v783_v3 = vrot.slane %v5620_v12, 5 }
  0x74   : > { %1860 = vmatmul.mubr.bf16.gmra.mxu1 %v7703_v61  ;;  %v786_v13 = vrot.slane %v5626_v14, 5  ;;  %2848 = vst [vmem:[#allocation2 + $0x178] sm:$0xf] %v2814_v47  ;;  %v6102_v5 = vld [vmem:[%s7627_s1 + $0x148] sm:$0xff]   ;;  %v443_v39 = vor.u32 %v442_v38, %v438_v34  ;;  %v4163_v4 = vrot.slane %v5629_v15, 9  ;;  %v790_v56 = vrot.slane %v5632_v16, 5 }
  0x75   : > { %1867 = vmatprep.mubr.bf16.mxu1 %v5229_v8  ;;  %v793_v7 = vrot.slane %v5648_v20, 5  ;;  %v434_v12 = vrot.slane %v433_v37, 4  ;;  %v784_v14 = vsel %vm6087_vm5, %v4162_v22, %v783_v3  ;;  %v785_v26 = vrot.slane %v783_v3, 4  ;;  %v5250_v38 = vld [vmem:[%s7627_s1 + $0x98] sm:$0xff]   ;;  %v1219_v50 = vld [vmem:[#allocation2 + $0x60] sm:$0xff]  ;;  %4986 = vmatprep.subr.bf16.mxu1 %v6102_v5 }
  0x76   : > { %v444_v15 = vrot.slane %v443_v39, 4  ;;  %v6116_v16 = vsel %vm6087_vm5, %v4163_v4, %v790_v56  ;;  %v792_v20 = vrot.slane %v790_v56, 4  ;;  %v797_v23 = vrot.slane %v5643_v19, 5  ;;  %925 = vst [vmem:[#allocation2 + $0x8] sm:$0xf] %v784_v14  ;;  %v6122_v22 = vld [vmem:[%s7627_s1 + $0x140] sm:$0xff]   ;;  %5030 = vmatprep.subr.bf16.mxu0 %v5250_v38  ;;  %4987 = vmatpush3.bf16.msra.mxu1 %v6102_v5 }
  0x77   : > { %v439_v18 = vsel %vm5680_vm2, %v434_v12, %v438_v34  ;;  %v787_v9 = vsel %vm6087_vm5, %v785_v26, %v786_v13  ;;  %v800_v6 = vrot.slane %v5695_v51, 5  ;;  %927 = vst [vmem:[#allocation2 + $0x20] sm:$0xf] %v6116_v16  ;;  %v6131_v8 = vld [vmem:[%s5608_s6 + $0x54] sm:$0xf]  ;;  %v6136_v31 = vld [vmem:[#allocation2 + $0x78] sm:$0xff]  ;;  %5031 = vmatpush3.bf16.msra.mxu0 %v5250_v38  ;;  %4988 = vmatprep.subr.bf16.mxu1 %v6122_v22 }
  0x78   : > { %v6134_v19 = vld [vmem:[%s5608_s6 + $0x58] sm:$0xf]  ;;  %7704 = vst [vmem:[#allocation29_spill] sm:$0xff] %v6136_v31  ;;  %v449_v34 = vsel %vm5680_vm2, %v444_v15, %v448_v17  ;;  %710 = vst [vmem:[#allocation2 + $0x94] sm:$0xf] %v439_v18  ;;  %v6145_v37 = vsel %vm6087_vm5, %v792_v20, %v793_v7  ;;  %v6149_v3 = vsel %vm6087_vm5, %v4164_v28, %v797_v23  ;;  %v799_v13 = vrot.slane %v797_v23, 4 }
  0x79   : > { %v1221_v47 = vld [vmem:[#allocation2 + $0x6c] sm:$0xff]  ;;  %926 = vst [vmem:[#allocation2 + $0x14] sm:$0xf] %v787_v9  ;;  %v6152_v39 = vld [vmem:[%s5608_s6 + $0x5c] sm:$0x1]  ;;  %v451_v48 = vshrl.u32 %v6131_v8, 16 }
  0x7a   : > { %v5234_v51 = vld [vmem:[#allocation2 + $0x64] ss:$12 sps:$4 sm:$0xff]   ;;  %1079 = vst [vmem:[#allocation2 + $0x78] sm:$0xf] %v6044_v46  ;;  %1137 = vst [vmem:[#allocation2 + $0x7c] sm:$0xf] %v439_v18  ;;  %v4191_v17 = vcombine.low %v1219_v50, %v1221_v47  ;;  %v6169_v12 = vsel %vm6087_vm5, %v799_v13, %v800_v6  ;;  %4989 = vmatpush3.bf16.msra.mxu1 %v6122_v22 }
  0x7b   : > { %261 = vst [vmem:[#allocation2 + $0xa8] sm:$0xf] %v6131_v8  ;;  %262 = vst [vmem:[#allocation2 + $0xb4] sm:$0xf] %v6134_v19  ;;  %v454_v4 = vshll.u32 %v6131_v8, 16  ;;  %v460_v56 = vshll.u32 %v6134_v19, 16  ;;  %1779 = vmatprep.mubr.bf16.mxu0 %v5234_v51 }
  0x7c   : > { %2767 = vst [vmem:[#allocation2 + $0x60] sm:$0xf] %v6044_v46  ;;  %2768 = vst [vmem:[#allocation2 + $0x6c] sm:$0xf] %v6047_v53  ;;  %v6165_v7 = vld [vmem:[#allocation2 + $0x84] sm:$0xff]  ;;  %v464_v14 = vshrl.u32 %v6134_v19, 16  ;;  %1868 = vmatmul.mubr.bf16.gmra.mxu1 %v4224_v11  ;;  %1780 = vmatmul.mubr.bf16.gmra.mxu0 %v4191_v17 }
  0x7d   : > { %2825 = vst [vmem:[#allocation2 + $0x64] sm:$0xf] %v439_v18  ;;  %2826 = vst [vmem:[#allocation2 + $0x70] sm:$0xf] %v449_v34  ;;  %v470_v26 = vshll.u32 %v6152_v39, 16  ;;  %v4165_v28 = vrot.slane %v5740_v36, 9 }
  0x7e   : > { %711 = vst [vmem:[#allocation2 + $0xa0] sm:$0xf] %v449_v34  ;;  %928 = vst [vmem:[#allocation2 + $0x2c] sm:$0xf] %v6145_v37  ;;  %v5238_v38 = vld [vmem:[%s7627_s1 + $0x78] sm:$0xff]   ;;  %v453_v15 = vrot.slane %v451_v48, 4 }
  0x7f   : > { %929 = vst [vmem:[#allocation2 + $0x38] sm:$0xf] %v6149_v3  ;;  %7705 = vst [vmem:[#allocation30_spill] sm:$0xff] %v6165_v7  ;;  %v456_v50 = vrot.slane %v454_v4, 5  ;;  %v462_v20 = vrot.slane %v460_v56, 5  ;;  %v804_v23 = vrot.slane %v5746_v41, 5  ;;  %4702 = vmatprep.subr.bf16.mxu1 %v5238_v38 }
  0x80   : > { %1080 = vst [vmem:[#allocation2 + $0x84] sm:$0xf] %v6047_v53  ;;  %1138 = vst [vmem:[#allocation2 + $0x88] sm:$0xf] %v449_v34  ;;  %v466_v36 = vrot.slane %v464_v14, 4  ;;  %v472_v18 = vrot.slane %v470_v26, 5 }
  0x81   : > { %930 = vst [vmem:[#allocation2 + $0x44] sm:$0xf] %v6169_v12  ;;  %v807_v54 = vrot.slane %v5792_v25, 5  ;;  %v4166_v21 = vrot.slane %v5818_v58, 9  ;;  %v6187_v11 = vld [vmem:[#allocation2 + $0x8] sm:$0xf]  ;;  %v457_v9 = vor.u32 %v456_v50, %v453_v15  ;;  %v6191_v6 = vsel %vm6087_vm5, %v4165_v28, %v804_v23 }
  0x82   : > { %v806_v34 = vrot.slane %v804_v23, 4  ;;  %v811_v41 = vrot.slane %v5836_v24, 5  ;;  %v6195_v47 = vld [vmem:[%s5608_s6 + $0x60] sm:$0xf]  ;;  %1171 = vst [vmem:[#allocation2 + $0x8] sm:$0xf] %v6116_v16  ;;  %v467_v25 = vor.u32 %v466_v36, %v462_v20 }
  0x83   : > { %v6197_v5 = vld [vmem:[#allocation2 + $0x20] sm:$0xf]  ;;  %v814_v58 = vrot.slane %v5871_v59, 5  ;;  %931 = vst [vmem:[#allocation2 + $0x50] sm:$0xf] %v6191_v6  ;;  %v4167_v51 = vrot.slane %v5930_v43, 9 }
  0x84   : > { %v818_v13 = vrot.slane %v5946_v40, 5  ;;  %263 = vst [vmem:[#allocation2 + $0xc0] sm:$0xf] %v6195_v47  ;;  %v6205_v17 = vld [vmem:[#allocation2 + $0x14] sm:$0xf]  ;;  %v458_v24 = vrot.slane %v457_v9, 4  ;;  %v6210_v16 = vsel %vm6087_vm5, %v806_v34, %v807_v54  ;;  %v6214_v59 = vsel %vm6087_vm5, %v4166_v21, %v811_v41 }
  0x85   : > { %1173 = vst [vmem:[#allocation2 + $0x20] sm:$0xf] %v6149_v3  ;;  %v1223_v48 = vld [vmem:[#allocation2 + $0x78] sm:$0xff]  ;;  %v813_v4 = vrot.slane %v811_v41, 4  ;;  %v6216_v43 = vld [vmem:[#allocation2 + $0x90] sm:$0xff]  ;;  %v468_v56 = vrot.slane %v467_v25, 4 }
  0x86   : > { %7706 = vst [vmem:[#allocation31_spill] sm:$0xff] %v6216_v43  ;;  %v6219_v40 = vld [vmem:[#allocation2 + $0x2c] sm:$0xf]  ;;  %1172 = vst [vmem:[#allocation2 + $0x14] sm:$0xf] %v6145_v37  ;;  %v6228_v26 = vsel %vm6087_vm5, %v4167_v51, %v818_v13  ;;  %v820_v28 = vrot.slane %v818_v13, 4  ;;  %v463_v37 = vsel %vm5680_vm2, %v458_v24, %v462_v20 }
  0x87   : > { %v6222_v14 = vld [vmem:[#allocation2 + $0x38] sm:$0xf]  ;;  %932 = vst [vmem:[#allocation2 + $0x5c] sm:$0xf] %v6210_v16  ;;  %933 = vst [vmem:[#allocation2 + $0x68] sm:$0xf] %v6214_v59  ;;  %v6238_v23 = vsel %vm6087_vm5, %v813_v4, %v814_v58  ;;  %v473_v20 = vsel %vm5680_vm2, %v468_v56, %v472_v18 }
  0x88   : > { %1081 = vst [vmem:[#allocation2 + $0x90] sm:$0xf] %v6131_v8  ;;  %1174 = vst [vmem:[#allocation2 + $0x2c] sm:$0xf] %v6169_v12  ;;  %v1225_v15 = vld [vmem:[#allocation2 + $0x84] sm:$0xff]  ;;  %v821_v36 = vrot.slane %v5962_v45, 5 }
  0x89   : > { %v5241_v50 = vld [vmem:[#allocation2 + $0x7c] ss:$12 sps:$4 sm:$0xff]   ;;  %1175 = vst [vmem:[#allocation2 + $0x38] sm:$0xf] %v6191_v6  ;;  %935 = vst [vmem:[#allocation2 + $0x80] sm:$0xf] %v6228_v26  ;;  %v4194_v45 = vcombine.low %v1223_v48, %v1225_v15 }
  0x8a   : > { %v6244_v54 = vld [vmem:[%s5608_s6 + $0x64] sm:$0xf]  ;;  %2769 = vst [vmem:[#allocation2 + $0x78] sm:$0xf] %v6131_v8  ;;  %2770 = vst [vmem:[#allocation2 + $0x84] sm:$0xf] %v6134_v19  ;;  %1787 = vmatprep.mubr.bf16.mxu0 %v5241_v50  ;;  %v6264_v18 = vsel %vm6087_vm5, %v820_v28, %v821_v36 }
  0x8b   : > { %2827 = vst [vmem:[#allocation2 + $0x7c] sm:$0xf] %v463_v37  ;;  %712 = vst [vmem:[#allocation2 + $0xac] sm:$0xf] %v463_v37  ;;  %v6252_v21 = vld [vmem:[#allocation2 + $0x44] sm:$0xf]  ;;  %1788 = vmatmul.mubr.bf16.gmra.mxu0 %v4194_v45 }
  0x8c   : > { %934 = vst [vmem:[#allocation2 + $0x74] sm:$0xf] %v6238_v23  ;;  %v6256_v9 = vld [vmem:[%s5608_s6 + $0x68] sm:$0x1]  ;;  %v475_v34 = vshrl.u32 %v6195_v47, 16  ;;  %v478_v41 = vshll.u32 %v6195_v47, 16 }
  0x8d   : > { %1139 = vst [vmem:[#allocation2 + $0x94] sm:$0xf] %v463_v37  ;;  %264 = vst [vmem:[#allocation2 + $0xcc] sm:$0xf] %v6244_v54  ;;  %v484_v25 = vshll.u32 %v6244_v54, 16  ;;  %v488_v58 = vshrl.u32 %v6244_v54, 16 }
  0x8e   : > { %2828 = vst [vmem:[#allocation2 + $0x88] sm:$0xf] %v473_v20  ;;  %713 = vst [vmem:[#allocation2 + $0xb8] sm:$0xf] %v473_v20  ;;  %v494_v51 = vshll.u32 %v6256_v9, 16  ;;  %v6269_v13 = vld [vmem:[#allocation2 + $0x9c] sm:$0xff] }
  0x8f   : > { %1176 = vst [vmem:[#allocation2 + $0x44] sm:$0xf] %v6210_v16  ;;  %7707 = vst [vmem:[#allocation32_spill] sm:$0xff] %v6269_v13  ;;  %v477_v24 = vrot.slane %v475_v34, 4  ;;  %v480_v48 = vrot.slane %v478_v41, 5  ;;  %v4168_v4 = vrot.slane %v6044_v46, 9 }
  0x90   : > { %936 = vst [vmem:[#allocation2 + $0x8c] sm:$0xf] %v6264_v18  ;;  %1082 = vst [vmem:[#allocation2 + $0x9c] sm:$0xf] %v6134_v19  ;;  %v825_v56 = vrot.slane %v6047_v53, 5  ;;  %v5239_v28 = vld [vmem:[%s7627_s1 + $0x38] sm:$0xff]  }
  0x91   : > { %1140 = vst [vmem:[#allocation2 + $0xa0] sm:$0xf] %v473_v20  ;;  %v6278_v37 = vld [vmem:[#allocation2 + $0x50] sm:$0xf]  ;;  %v486_v15 = vrot.slane %v484_v25, 5  ;;  %v490_v50 = vrot.slane %v488_v58, 4  ;;  %v481_v53 = vor.u32 %v480_v48, %v477_v24 }
  0x92   : > { %1177 = vst [vmem:[#allocation2 + $0x50] sm:$0xf] %v6214_v59  ;;  %v5245_v46 = vld [vmem:[%s7627_s1 + $0x70] sm:$0xff]   ;;  %v496_v20 = vrot.slane %v494_v51, 5  ;;  %v6290_v34 = vsel %vm6087_vm5, %v4168_v4, %v825_v56  ;;  %v827_v41 = vrot.slane %v825_v56, 4  ;;  %v828_v51 = vrot.slane %v6059_v33, 5 }
  0x93   : > { %v5236_v25 = vld [vmem:[#allocation2 + $0x8] ss:$12 sps:$4 sm:$0xff]   ;;  %v6292_v58 = vld [vmem:[#allocation2 + $0x5c] sm:$0xf]  ;;  %v491_v61 = vor.u32 %v490_v50, %v486_v15  ;;  %937 = vst [vmem:[#allocation2 + $0x98] sm:$0xf] %v6290_v34 }
  0x94   : > { %2861 = vst [vmem:[#allocation2 + $0x8] sm:$0xf] %v6149_v3  ;;  %2862 = vst [vmem:[#allocation2 + $0x14] sm:$0xf] %v6169_v12  ;;  %v5237_v24 = vld [vmem:[#allocation2 + $0x20] ss:$12 sps:$4 sm:$0xff]   ;;  %4990 = vmatprep.mubr.bf16.mxu1 %v5236_v25  ;;  %v829_v25 = vsel %vm6087_vm5, %v827_v41, %v828_v51 }
  0x95   : > { %1178 = vst [vmem:[#allocation2 + $0x5c] sm:$0xf] %v6238_v23  ;;  %2863 = vst [vmem:[#allocation2 + $0x20] sm:$0xf] %v6191_v6  ;;  %v5246_v3 = vld [vmem:[%s7627_s1 + $0x30] sm:$0xff]   ;;  %v482_v56 = vrot.slane %v481_v53, 4  ;;  %4991 = vmatmul.mubr.bf16.vlgmr.msra.gmra.mxu1 %v5237_v24 }
  0x96   : > { %2864 = vst [vmem:[#allocation2 + $0x2c] sm:$0xf] %v6210_v16  ;;  %v492_v12 = vrot.slane %v491_v61, 4  ;;  %v1227_v50 = vld [vmem:[#allocation2 + $0x90] sm:$0xff]  ;;  %v6314_v36 = vld [vmem:[#allocation2 + $0x68] sm:$0xf]  ;;  %4703 = vmatpush3.bf16.msra.mxu1 %v5239_v28 }
  0x97   : > { %v5243_v45 = vld [vmem:[#allocation2 + $0x38] ss:$12 sps:$4 sm:$0xff]   ;;  %v6316_v48 = vld [vmem:[#allocation2 + $0x74] sm:$0xf]  ;;  %1179 = vst [vmem:[#allocation2 + $0x68] sm:$0xf] %v6228_v26  ;;  %v487_v33 = vsel %vm5680_vm2, %v482_v56, %v486_v15  ;;  %4704 = vmatprep.subr.bf16.mxu1 %v5245_v46 }
  0x98   : > { %v5252_v6 = vld [vmem:[%s7627_s1 + $0x68] sm:$0xff]   ;;  %2865 = vst [vmem:[#allocation2 + $0x38] sm:$0xf] %v6214_v59  ;;  %2866 = vst [vmem:[#allocation2 + $0x44] sm:$0xf] %v6238_v23  ;;  %v497_v61 = vsel %vm5680_vm2, %v492_v12, %v496_v20  ;;  %v1229_v16 = vld [vmem:[#allocation2 + $0x9c] sm:$0xff]  ;;  %4994 = vmatprep.mubr.bf16.mxu1 %v5243_v45 }
  0x99   : > { %v5247_v53 = vld [vmem:[#allocation2 + $0x94] ss:$12 sps:$4 sm:$0xff]   ;;  %1180 = vst [vmem:[#allocation2 + $0x74] sm:$0xf] %v6264_v18  ;;  %v4169_v24 = vrot.slane %v6131_v8, 9  ;;  %v4197_v59 = vcombine.low %v1227_v50, %v1229_v16  ;;  %v832_v23 = vrot.slane %v6134_v19, 5 }
  0x9a   : > { %v6332_v28 = vld [vmem:[#allocation2 + $0x80] sm:$0xf]  ;;  %2771 = vst [vmem:[#allocation2 + $0x90] sm:$0xf] %v6195_v47  ;;  %2772 = vst [vmem:[#allocation2 + $0x9c] sm:$0xf] %v6244_v54  ;;  %1795 = vmatprep.mubr.bf16.mxu0 %v5247_v53  ;;  %4705 = vmatpush3.bf16.msra.mxu1 %v5246_v3 }
  0x9b   : > { %2829 = vst [vmem:[#allocation2 + $0x94] sm:$0xf] %v487_v33  ;;  %2830 = vst [vmem:[#allocation2 + $0xa0] sm:$0xf] %v497_v61  ;;  %v835_v8 = vrot.slane %v6152_v39, 5  ;;  %v5253_v46 = vld [vmem:[%s7627_s1 + $0x28] sm:$0xff]   ;;  %1796 = vmatmul.mubr.bf16.gmra.mxu0 %v4197_v59  ;;  %v833_v19 = vsel %vm6087_vm5, %v4169_v24, %v832_v23  ;;  %4706 = vmatprep.subr.bf16.mxu1 %v5252_v6 }
  0x9c   : > { %714 = vst [vmem:[#allocation2 + $0xc4] sm:$0xf] %v487_v33  ;;  %715 = vst [vmem:[#allocation2 + $0xd0] sm:$0xf] %v497_v61  ;;  %v6338_v15 = vld [vmem:[#allocation2 + $0x8c] sm:$0xf] }
  0x9d   : > { %938 = vst [vmem:[#allocation2 + $0xa4] sm:$0xf] %v829_v25  ;;  %1181 = vst [vmem:[#allocation2 + $0x80] sm:$0xf] %v6290_v34  ;;  %v834_v39 = vrot.slane %v832_v23, 4  ;;  %v6356_v56 = vld [vmem:[#allocation2 + $0xa8] sm:$0xff] }
  0x9e   : > { %1182 = vst [vmem:[#allocation2 + $0x8c] sm:$0xf] %v829_v25  ;;  %v6351_v41 = vld [vmem:[%s5608_s6 + $0x6c] sm:$0xf]  ;;  %v6354_v51 = vld [vmem:[%s5608_s6 + $0x70] sm:$0xf]  ;;  %4707 = vmatpush3.bf16.msra.mxu1 %v5253_v46 }
  0x9f   : > { %7708 = vst [vmem:[#allocation33_spill] sm:$0xff] %v6356_v56  ;;  %v5244_v12 = vld [vmem:[#allocation2 + $0x50] ss:$12 sps:$4 sm:$0xff]   ;;  %939 = vst [vmem:[#allocation2 + $0xb0] sm:$0xf] %v833_v19  ;;  %v836_v16 = vsel %vm6087_vm5, %v834_v39, %v835_v8  ;;  %v499_v3 = vshrl.u32 %v6351_v41, 16 }
  0xa0   : > { %v6359_v50 = vld [vmem:[%s5608_s6 + $0x74] sm:$0x1]  ;;  %1083 = vst [vmem:[#allocation2 + $0xa8] sm:$0xf] %v6195_v47  ;;  %1141 = vst [vmem:[#allocation2 + $0xac] sm:$0xf] %v487_v33  ;;  %4995 = vmatmul.mubr.bf16.gmra.mxu1 %v5244_v12 }
  0xa1   : > { %265 = vst [vmem:[#allocation2 + $0xd8] sm:$0xf] %v6351_v41  ;;  %266 = vst [vmem:[#allocation2 + $0xe4] sm:$0xf] %v6354_v51  ;;  %v502_v53 = vshll.u32 %v6351_v41, 16  ;;  %v508_v24 = vshll.u32 %v6354_v51, 16 }
  0xa2   : > { %2867 = vst [vmem:[#allocation2 + $0x50] sm:$0xf] %v6228_v26  ;;  %2868 = vst [vmem:[#allocation2 + $0x5c] sm:$0xf] %v6264_v18  ;;  %v6371_v59 = vld [vmem:[#allocation2 + $0xb4] sm:$0xff]  ;;  %v512_v23 = vshrl.u32 %v6354_v51, 16 }
  0xa3   : > { %7709 = vst [vmem:[#allocation34_spill] sm:$0xff] %v6371_v59  ;;  %v6373_v33 = vld [vmem:[#allocation2 + $0x98] sm:$0xf]  ;;  %940 = vst [vmem:[#allocation2 + $0xbc] sm:$0xf] %v836_v16  ;;  %v518_v26 = vshll.u32 %v6359_v50, 16 }
  0xa4   : > { %1084 = vst [vmem:[#allocation2 + $0xb4] sm:$0xf] %v6244_v54  ;;  %1142 = vst [vmem:[#allocation2 + $0xb8] sm:$0xf] %v497_v61  ;;  %v4170_v18 = vrot.slane %v6195_v47, 9  ;;  %v839_v6 = vrot.slane %v6244_v54, 5 }
  0xa5   : > { %1183 = vst [vmem:[#allocation2 + $0x98] sm:$0xf] %v833_v19  ;;  %v5249_v8 = vld [vmem:[#allocation2 + $0x68] ss:$12 sps:$4 sm:$0xff]   ;;  %v501_v39 = vrot.slane %v499_v3, 4  ;;  %v504_v4 = vrot.slane %v502_v53, 5 }
  0xa6   : > { %2869 = vst [vmem:[#allocation2 + $0x68] sm:$0xf] %v6290_v34  ;;  %2870 = vst [vmem:[#allocation2 + $0x74] sm:$0xf] %v829_v25  ;;  %v510_v61 = vrot.slane %v508_v24, 5  ;;  %v514_v38 = vrot.slane %v512_v23, 4  ;;  %v6387_v54 = vsel %vm6087_vm5, %v4170_v18, %v839_v6  ;;  %4998 = vmatprep.mubr.bf16.mxu1 %v5249_v8 }
  0xa7   : > { %v520_v47 = vrot.slane %v518_v26, 5  ;;  %v5258_v12 = vld [vmem:[%s7627_s1 + $0x60] sm:$0xff]   ;;  %v505_v53 = vor.u32 %v504_v4, %v501_v39  ;;  %v841_v20 = vrot.slane %v839_v6, 4  ;;  %v842_v45 = vrot.slane %v6256_v9, 5  ;;  %941 = vst [vmem:[#allocation2 + $0xc8] sm:$0xf] %v6387_v54 }
  0xa8   : > { %v5251_v3 = vld [vmem:[#allocation2 + $0x80] ss:$12 sps:$4 sm:$0xff]   ;;  %v515_v34 = vor.u32 %v514_v38, %v510_v61  ;;  %v6394_v25 = vld [vmem:[#allocation2 + $0xa4] sm:$0xf]  ;;  %v4171_v46 = vrot.slane %v6351_v41, 9  ;;  %v846_v24 = vrot.slane %v6354_v51, 5  ;;  %4708 = vmatprep.subr.bf16.mxu1 %v5258_v12 }
  0xa9   : > { %2871 = vst [vmem:[#allocation2 + $0x80] sm:$0xf] %v833_v19  ;;  %2872 = vst [vmem:[#allocation2 + $0x8c] sm:$0xf] %v836_v16  ;;  %v849_v23 = vrot.slane %v6359_v50, 5  ;;  %v5259_v4 = vld [vmem:[%s7627_s1 + $0x20] sm:$0xff]   ;;  %v843_v19 = vsel %vm6087_vm5, %v841_v20, %v842_v45  ;;  %4999 = vmatmul.mubr.bf16.gmra.mxu1 %v5251_v3 }
  0xaa   : > { %v506_v26 = vrot.slane %v505_v53, 4  ;;  %v1231_v9 = vld [vmem:[#allocation2 + $0xa8] sm:$0xff]  ;;  %1184 = vst [vmem:[#allocation2 + $0xa4] sm:$0xf] %v836_v16  ;;  %v6404_v38 = vld [vmem:[#allocation2 + $0xb0] sm:$0xf]  ;;  %v6410_v50 = vsel %vm6087_vm5, %v4171_v46, %v846_v24  ;;  %4709 = vmatpush3.bf16.msra.mxu1 %v5259_v4 }
  0xab   : > { %v516_v6 = vrot.slane %v515_v34, 4  ;;  %942 = vst [vmem:[#allocation2 + $0xd4] sm:$0xf] %v843_v19  ;;  %v848_v8 = vrot.slane %v846_v24, 4  ;;  %1185 = vst [vmem:[#allocation2 + $0xb0] sm:$0xf] %v6387_v54 }
  0xac   : > { %v511_v39 = vsel %vm5680_vm2, %v506_v26, %v510_v61  ;;  %v1233_v45 = vld [vmem:[#allocation2 + $0xb4] sm:$0xff]  ;;  %943 = vst [vmem:[#allocation2 + $0xe0] sm:$0xf] %v6410_v50  ;;  %v4174_v16 = vrot.slane %v5659_v27, 9  ;;  %2773 = vst [vmem:[#allocation2 + $0xa8] sm:$0xf] %v6351_v41 }
  0xad   : > { %v5254_v20 = vld [vmem:[#allocation2 + $0xac] ss:$12 sps:$4 sm:$0xff]   ;;  %v521_v12 = vsel %vm5680_vm2, %v516_v6, %v520_v47  ;;  %2774 = vst [vmem:[#allocation2 + $0xb4] sm:$0xf] %v6354_v51  ;;  %716 = vst [vmem:[#allocation2 + $0xdc] sm:$0xf] %v511_v39  ;;  %v4200_v53 = vcombine.low %v1231_v9, %v1233_v45  ;;  %v6423_v61 = vsel %vm6087_vm5, %v848_v8, %v849_v23 }
  0xae   : > { %2831 = vst [vmem:[#allocation2 + $0xac] sm:$0xf] %v511_v39  ;;  %v6425_v34 = vld [vmem:[#allocation2 + $0xbc] sm:$0xf]  ;;  %1803 = vmatprep.mubr.bf16.mxu0 %v5254_v20  ;;  %2832 = vst [vmem:[#allocation2 + $0xb8] sm:$0xf] %v521_v12 }
  0xaf   : > { %717 = vst [vmem:[#allocation2 + $0xe8] sm:$0xf] %v521_v12  ;;  %1186 = vst [vmem:[#allocation2 + $0xbc] sm:$0xf] %v843_v19  ;;  %v5260_v47 = vld [vmem:[%s7627_s1 + $0x90] sm:$0xff]   ;;  %1804 = vmatmul.mubr.bf16.gmra.mxu0 %v4200_v53  ;;  %v6446_v20 = vld [vmem:[#allocation2 + $0xc0] sm:$0xff] }
  0xb0   : > { %944 = vst [vmem:[#allocation2 + $0xec] sm:$0xf] %v6423_v61  ;;  %v6432_v46 = vld [vmem:[%s5608_s6 + $0x78] sm:$0xf]  ;;  %v6438_v4 = vld [vmem:[%s5608_s6 + $0x7c] sm:$0xf]  ;;  %5032 = vmatprep.subr.bf16.mxu0 %v5260_v47 }
  0xb1   : > { %v225_v3 = vld [vmem:[%s5608_s6 + $0x80] sm:$0x1]  ;;  %v523_v26 = vshrl.u32 %v6432_v46, 16  ;;  %v526_v9 = vshll.u32 %v6432_v46, 16  ;;  %267 = vst [vmem:[#allocation2 + $0xf0] sm:$0xf] %v6432_v46  ;;  %5033 = vmatpush3.bf16.msra.mxu0 %v5260_v47 }
  0xb2   : > { %v532_v6 = vshll.u32 %v6438_v4, 16  ;;  %v536_v8 = vshrl.u32 %v6438_v4, 16  ;;  %v542_v45 = vshll.u32 %v225_v3, 16  ;;  %7710 = vst [vmem:[#allocation35_spill] sm:$0xff] %v6446_v20  ;;  %v6448_v18 = vld [vmem:[#allocation2 + $0xcc] sm:$0xff]  ;;  %v4172_v53 = vrot.slane %v6432_v46, 9 }
  0xb3   : > { %7711 = vst [vmem:[#allocation36_spill] sm:$0xff] %v6448_v18  ;;  %268 = vst [vmem:[#allocation2 + $0xfc] sm:$0xf] %v6438_v4  ;;  %v5256_v23 = vld [vmem:[#allocation2 + $0x98] ss:$12 sps:$4 sm:$0xff]   ;;  %v525_v22 = vrot.slane %v523_v26, 4 }
  0xb4   : > { %v528_v24 = vrot.slane %v526_v9, 5  ;;  %1085 = vst [vmem:[#allocation2 + $0xc0] sm:$0xf] %v6351_v41  ;;  %1086 = vst [vmem:[#allocation2 + $0xcc] sm:$0xf] %v6354_v51  ;;  %v7712_v59 = vrot.slane %v5664_v32, 5  ;;  %5002 = vmatprep.mubr.bf16.mxu1 %v5256_v23 }
  0xb5   : > { %1143 = vst [vmem:[#allocation2 + $0xc4] sm:$0xf] %v511_v39  ;;  %1144 = vst [vmem:[#allocation2 + $0xd0] sm:$0xf] %v521_v12  ;;  %v534_v47 = vrot.slane %v532_v6, 5  ;;  %v538_v26 = vrot.slane %v536_v8, 4 }
  0xb6   : > { %v6458_v56 = vsel %vm6087_vm5, %v4174_v16, %v7712_v59  ;;  %2873 = vst [vmem:[#allocation2 + $0x98] sm:$0xf] %v6387_v54  ;;  %2874 = vst [vmem:[#allocation2 + $0xa4] sm:$0xf] %v843_v19  ;;  %v544_v41 = vrot.slane %v542_v45, 5  ;;  %v853_v51 = vrot.slane %v6438_v4, 5  ;;  %v529_v39 = vor.u32 %v528_v24, %v525_v22 }
  0xb7   : > { %949 = vst [vmem:[#allocation2 + $0x128] sm:$0xf] %v6458_v56  ;;  %v856_v12 = vrot.slane %v225_v3, 5  ;;  %v6465_v59 = vld [vmem:[#allocation2 + $0xc8] sm:$0xf]  ;;  %v5265_v54 = vld [vmem:[%s7627_s1 + $0x58] sm:$0xff]   ;;  %v539_v9 = vor.u32 %v538_v26, %v534_v47 }
  0xb8   : > { %v6467_v16 = vld [vmem:[#allocation2 + $0xd4] sm:$0xf]  ;;  %v854_v6 = vsel %vm6087_vm5, %v4172_v53, %v853_v51  ;;  %v855_v8 = vrot.slane %v853_v51, 4  ;;  %1187 = vst [vmem:[#allocation2 + $0xc8] sm:$0xf] %v6410_v50  ;;  %v5266_v23 = vld [vmem:[%s7627_s1 + $0x18] sm:$0xff]   ;;  %4710 = vmatprep.subr.bf16.mxu1 %v5265_v54 }
  0xb9   : > { %1188 = vst [vmem:[#allocation2 + $0xd4] sm:$0xf] %v6423_v61  ;;  %v6479_v22 = vld [vmem:[%s5608_s6 + $0x84] sm:$0xf]  ;;  %v6482_v24 = vld [vmem:[%s5608_s6 + $0x88] sm:$0xf]  ;;  %4711 = vmatpush3.bf16.msra.mxu1 %v5266_v23 }
  0xba   : > { %v5257_v45 = vld [vmem:[#allocation2 + $0xb0] ss:$12 sps:$4 sm:$0xff]   ;;  %v530_v26 = vrot.slane %v529_v39, 4  ;;  %945 = vst [vmem:[#allocation2 + $0xf8] sm:$0xf] %v854_v6  ;;  %v4173_v53 = vrot.slane %v6479_v22, 9  ;;  %v857_v19 = vsel %vm6087_vm5, %v855_v8, %v856_v12 }
  0xbb   : > { %269 = vst [vmem:[#allocation2 + $0x108] sm:$0xf] %v6479_v22  ;;  %270 = vst [vmem:[#allocation2 + $0x114] sm:$0xf] %v6482_v24  ;;  %v540_v51 = vrot.slane %v539_v9, 4  ;;  %v860_v3 = vrot.slane %v6482_v24, 5  ;;  %5003 = vmatmul.mubr.bf16.gmra.mxu1 %v5257_v45 }
  0xbc   : > { %2875 = vst [vmem:[#allocation2 + $0xb0] sm:$0xf] %v6410_v50  ;;  %2876 = vst [vmem:[#allocation2 + $0xbc] sm:$0xf] %v6423_v61  ;;  %v228_v13 = vld [vmem:[%s5608_s6 + $0x8c] sm:$0x1]  ;;  %v535_v18 = vsel %vm5680_vm2, %v530_v26, %v534_v47 }
  0xbd   : > { %v6498_v39 = vld [vmem:[#allocation2 + $0xe0] sm:$0xf]  ;;  %946 = vst [vmem:[#allocation2 + $0x104] sm:$0xf] %v857_v19  ;;  %v566_v54 = vshll.u32 %v228_v13, 16  ;;  %v863_v20 = vrot.slane %v228_v13, 5  ;;  %v545_v61 = vsel %vm5680_vm2, %v540_v51, %v544_v41  ;;  %v861_v23 = vsel %vm6087_vm5, %v4173_v53, %v860_v3 }
  0xbe   : > { %v6502_v50 = vld [vmem:[#allocation2 + $0xec] sm:$0xf]  ;;  %1189 = vst [vmem:[#allocation2 + $0xe0] sm:$0xf] %v854_v6  ;;  %v1235_v12 = vld [vmem:[#allocation2 + $0xc0] sm:$0xff]  ;;  %v862_v45 = vrot.slane %v860_v3, 4 }
  0xbf   : > { %v1237_v9 = vld [vmem:[#allocation2 + $0xcc] sm:$0xff]  ;;  %718 = vst [vmem:[#allocation2 + $0xf4] sm:$0xf] %v535_v18  ;;  %1190 = vst [vmem:[#allocation2 + $0xec] sm:$0xf] %v857_v19  ;;  %v547_v47 = vshrl.u32 %v6479_v22, 16 }
  0xc0   : > { %v5261_v8 = vld [vmem:[#allocation2 + $0xc4] ss:$12 sps:$4 sm:$0xff]   ;;  %2775 = vst [vmem:[#allocation2 + $0xc0] sm:$0xf] %v6432_v46  ;;  %2776 = vst [vmem:[#allocation2 + $0xcc] sm:$0xf] %v6438_v4  ;;  %v4203_v13 = vcombine.low %v1235_v12, %v1237_v9  ;;  %v864_v3 = vsel %vm6087_vm5, %v862_v45, %v863_v20 }
  0xc1   : > { %2833 = vst [vmem:[#allocation2 + $0xc4] sm:$0xf] %v535_v18  ;;  %2834 = vst [vmem:[#allocation2 + $0xd0] sm:$0xf] %v545_v61  ;;  %v568_v41 = vrot.slane %v566_v54, 5  ;;  %v550_v26 = vshll.u32 %v6479_v22, 16  ;;  %1811 = vmatprep.mubr.bf16.mxu0 %v5261_v8 }
  0xc2   : > { %719 = vst [vmem:[#allocation2 + $0x100] sm:$0xf] %v545_v61  ;;  %947 = vst [vmem:[#allocation2 + $0x110] sm:$0xf] %v861_v23  ;;  %v549_v53 = vrot.slane %v547_v47, 4  ;;  %v556_v43 = vshll.u32 %v6482_v24, 16  ;;  %1812 = vmatmul.mubr.bf16.gmra.mxu0 %v4203_v13 }
  0xc3   : > { %v560_v7 = vshrl.u32 %v6482_v24, 16  ;;  %v6518_v31 = vld [vmem:[#allocation2 + $0xd8] sm:$0xff]  ;;  %v5263_v29 = vld [vmem:[#allocation2 + $0xc8] ss:$12 sps:$4 sm:$0xff]   ;;  %948 = vst [vmem:[#allocation2 + $0x11c] sm:$0xf] %v864_v3 }
  0xc4   : > { %1087 = vst [vmem:[#allocation2 + $0xd8] sm:$0xf] %v6432_v46  ;;  %1145 = vst [vmem:[#allocation2 + $0xdc] sm:$0xf] %v535_v18  ;;  %v552_v54 = vrot.slane %v550_v26, 5  ;;  %v558_v12 = vrot.slane %v556_v43, 5  ;;  %5006 = vmatprep.mubr.bf16.mxu1 %v5263_v29 }
  0xc5   : > { %2877 = vst [vmem:[#allocation2 + $0xc8] sm:$0xf] %v854_v6  ;;  %2878 = vst [vmem:[#allocation2 + $0xd4] sm:$0xf] %v857_v19  ;;  %v562_v9 = vrot.slane %v560_v7, 4  ;;  %v6521_v20 = vld [vmem:[#allocation2 + $0xe4] sm:$0xff] }
  0xc6   : > { %7713 = vst [vmem:[#allocation37_spill] sm:$0xff] %v6521_v20  ;;  %v7714_v8 = vrot.slane %v5664_v32, 5  ;;  %v5270_v47 = vld [vmem:[%s7627_s1 + $0x88] sm:$0xff]   ;;  %1088 = vst [vmem:[#allocation2 + $0xe4] sm:$0xf] %v6438_v4  ;;  %v4175_v7 = vrot.slane %v5673_v42, 9  ;;  %v553_v13 = vor.u32 %v552_v54, %v549_v53 }
  0xc7   : > { %1146 = vst [vmem:[#allocation2 + $0xe8] sm:$0xf] %v545_v61  ;;  %v5375_v18 = vld [vmem:[%s5608_s6 + $0x98] sm:$0x1]  ;;  %v563_v26 = vor.u32 %v562_v9, %v558_v12  ;;  %5034 = vmatprep.subr.bf16.mxu0 %v5270_v47  ;;  %v5264_v29 = vld [vmem:[#allocation2 + $0xe0] ss:$12 sps:$4 sm:$0xff]  }
  0xc8   : > { %v869_v45 = vrot.slane %v7714_v8, 4  ;;  %v870_v46 = vrot.slane %v5375_v18, 5  ;;  %v6530_v19 = vld [vmem:[#allocation2 + $0xf8] sm:$0xf]  ;;  %v6537_v8 = vld [vmem:[#allocation2 + $0x104] sm:$0xf]  ;;  %5035 = vmatpush3.bf16.msra.mxu0 %v5270_v47  ;;  %5007 = vmatmul.mubr.bf16.gmra.mxu1 %v5264_v29 }
  0xc9   : > { %1191 = vst [vmem:[#allocation2 + $0xf8] sm:$0xf] %v861_v23  ;;  %1192 = vst [vmem:[#allocation2 + $0x104] sm:$0xf] %v864_v3  ;;  %v874_v61 = vrot.slane %v5688_v49, 5  ;;  %v554_v53 = vrot.slane %v553_v13, 4 }
  0xca   : > { %v6541_v4 = vsel %vm6087_vm5, %v869_v45, %v870_v46  ;;  %v5376_v18 = vld [vmem:[%s5608_s6 + $0xa4] sm:$0x1]  ;;  %2879 = vst [vmem:[#allocation2 + $0xe0] sm:$0xf] %v861_v23  ;;  %2880 = vst [vmem:[#allocation2 + $0xec] sm:$0xf] %v864_v3 }
  0xcb   : > { %v877_v51 = vrot.slane %v5376_v18, 5  ;;  %v564_v54 = vrot.slane %v563_v26, 4  ;;  %950 = vst [vmem:[#allocation2 + $0x134] sm:$0xf] %v6541_v4  ;;  %v6548_v9 = vld [vmem:[#allocation2 + $0x110] sm:$0xf]  ;;  %v6552_v45 = vsel %vm6087_vm5, %v4175_v7, %v874_v61  ;;  %v559_v23 = vsel %vm5680_vm2, %v554_v53, %v558_v12 }
  0xcc   : > { %v876_v46 = vrot.slane %v874_v61, 4  ;;  %1193 = vst [vmem:[#allocation2 + $0x110] sm:$0xf] %v6458_v56  ;;  %v5272_v47 = vld [vmem:[%s7627_s1 + $0x50] sm:$0xff]   ;;  %v1239_v13 = vld [vmem:[#allocation2 + $0xd8] sm:$0xff]  ;;  %v4176_v7 = vrot.slane %v5700_v60, 9 }
  0xcd   : > { %v569_v3 = vsel %vm5680_vm2, %v564_v54, %v568_v41  ;;  %v6562_v26 = vld [vmem:[#allocation2 + $0x11c] sm:$0xf]  ;;  %951 = vst [vmem:[#allocation2 + $0x140] sm:$0xf] %v6552_v45  ;;  %720 = vst [vmem:[#allocation2 + $0x10c] sm:$0xf] %v559_v23  ;;  %4712 = vmatprep.subr.bf16.mxu1 %v5272_v47 }
  0xce   : > { %721 = vst [vmem:[#allocation2 + $0x118] sm:$0xf] %v569_v3  ;;  %v878_v29 = vsel %vm6087_vm5, %v876_v46, %v877_v51  ;;  %1194 = vst [vmem:[#allocation2 + $0x11c] sm:$0xf] %v6541_v4  ;;  %v6572_v41 = vld [vmem:[#allocation2 + $0xf0] sm:$0xff]  ;;  %v6574_v12 = vld [vmem:[#allocation2 + $0xfc] sm:$0xff]  ;;  %4713 = vmatpush3.bf16.msra.mxu1 %v5273_v44 }
  0xcf   : > { %v881_v61 = vrot.slane %v5706_v2, 5  ;;  %v5377_v18 = vld [vmem:[%s5608_s6 + $0xb0] sm:$0x1]  ;;  %v4177_v53 = vrot.slane %v5755_v55, 9  ;;  %v1241_v54 = vld [vmem:[#allocation2 + $0xe4] sm:$0xff]  ;;  %v888_v46 = vrot.slane %v5765_v62, 5  ;;  %v4281_v47 = vcombine.low %v6572_v41, %v6574_v12 }
  0xd0   : > { %v884_v60 = vrot.slane %v5377_v18, 5  ;;  %v5267_v43 = vld [vmem:[#allocation2 + $0xdc] ss:$12 sps:$4 sm:$0xff]   ;;  %952 = vst [vmem:[#allocation2 + $0x14c] sm:$0xf] %v878_v29  ;;  %v4206_v18 = vcombine.low %v1239_v13, %v1241_v54  ;;  %v1164_v44 = vrot.slane %v5892_v30, 5 }
  0xd1   : > { %1089 = vst [vmem:[#allocation2 + $0xf0] sm:$0xf] %v6479_v22  ;;  %1090 = vst [vmem:[#allocation2 + $0xfc] sm:$0xf] %v6482_v24  ;;  %v6581_v51 = vld [vmem:[#allocation2 + $0x128] sm:$0xf]  ;;  %v6594_v62 = vsel %vm6087_vm5, %v4176_v7, %v881_v61  ;;  %1819 = vmatprep.mubr.bf16.mxu0 %v5267_v43 }
  0xd2   : > { %1147 = vst [vmem:[#allocation2 + $0xf4] sm:$0xf] %v559_v23  ;;  %1148 = vst [vmem:[#allocation2 + $0x100] sm:$0xf] %v569_v3  ;;  %v883_v6 = vrot.slane %v881_v61, 4  ;;  %1820 = vmatmul.mubr.bf16.gmra.mxu0 %v4206_v18  ;;  %v5288_v0 = vld [vmem:[%s7627_s1 + $0x1b8] sm:$0xff]  }
  0xd3   : > { %2777 = vst [vmem:[#allocation2 + $0xd8] sm:$0xf] %v6479_v22  ;;  %2778 = vst [vmem:[#allocation2 + $0xe4] sm:$0xf] %v6482_v24  ;;  %v5378_v2 = vld [vmem:[%s5608_s6 + $0xbc] sm:$0x1]  ;;  %v6601_v22 = vsel %vm6087_vm5, %v4177_v53, %v888_v46 }
  0xd4   : > { %2835 = vst [vmem:[#allocation2 + $0xdc] sm:$0xf] %v559_v23  ;;  %2836 = vst [vmem:[#allocation2 + $0xe8] sm:$0xf] %v569_v3  ;;  %v891_v55 = vrot.slane %v5378_v2, 5  ;;  %v890_v24 = vrot.slane %v888_v46, 4  ;;  %v885_v43 = vsel %vm6087_vm5, %v883_v6, %v884_v60 }
  0xd5   : > { %1195 = vst [vmem:[#allocation2 + $0x128] sm:$0xf] %v6552_v45  ;;  %v5269_v20 = vld [vmem:[#allocation2 + $0xf8] ss:$12 sps:$4 sm:$0xff]   ;;  %953 = vst [vmem:[#allocation2 + $0x158] sm:$0xf] %v6594_v62 }
  0xd6   : > { %v5278_v23 = vld [vmem:[%s7627_s1 + $0x48] sm:$0xff]   ;;  %2881 = vst [vmem:[#allocation2 + $0xf8] sm:$0xf] %v6458_v56  ;;  %2882 = vst [vmem:[#allocation2 + $0x104] sm:$0xf] %v6541_v4  ;;  %5010 = vmatprep.mubr.bf16.mxu1 %v5269_v20  ;;  %v6615_v13 = vsel %vm6087_vm5, %v890_v24, %v891_v55  ;;  %v4178_v4 = vrot.slane %v5881_v10, 9 }
  0xd7   : > { %v6610_v3 = vld [vmem:[#allocation2 + $0x134] sm:$0xf]  ;;  %955 = vst [vmem:[#allocation2 + $0x170] sm:$0xf] %v6601_v22  ;;  %954 = vst [vmem:[#allocation2 + $0x164] sm:$0xf] %v885_v43  ;;  %4714 = vmatprep.subr.bf16.mxu1 %v5278_v23 }
  0xd8   : > { %1196 = vst [vmem:[#allocation2 + $0x134] sm:$0xf] %v878_v29  ;;  %v5279_v56 = vld [vmem:[%s7627_s1 + $0x8] sm:$0xff]   ;;  %v6621_v6 = vld [vmem:[#allocation2 + $0x140] sm:$0xf]  ;;  %v6641_v18 = vld [vmem:[#allocation2 + $0x114] sm:$0xff] }
  0xd9   : > { %956 = vst [vmem:[#allocation2 + $0x17c] sm:$0xf] %v6615_v13  ;;  %v5271_v7 = vld [vmem:[#allocation2 + $0x110] ss:$12 sps:$4 sm:$0xff]   ;;  %1197 = vst [vmem:[#allocation2 + $0x140] sm:$0xf] %v6594_v62  ;;  %4715 = vmatpush3.bf16.msra.mxu1 %v5279_v56 }
  0xda   : > { %v5280_v20 = vld [vmem:[%s7627_s1 + $0x80] sm:$0xff]   ;;  %2883 = vst [vmem:[#allocation2 + $0x110] sm:$0xf] %v6552_v45  ;;  %2884 = vst [vmem:[#allocation2 + $0x11c] sm:$0xf] %v878_v29  ;;  %v1243_v61 = vld [vmem:[#allocation2 + $0xf0] sm:$0xff]  ;;  %5011 = vmatmul.mubr.bf16.gmra.mxu1 %v5271_v7  ;;  %v1165_v45 = vsel %vm6087_vm5, %v4178_v4, %v1164_v44 }
  0xdb   : > { %v1245_v60 = vld [vmem:[#allocation2 + $0xfc] sm:$0xff]  ;;  %v5379_v53 = vld [vmem:[%s5608_s6 + $0xc8] sm:$0x1]  ;;  %2779 = vst [vmem:[#allocation2 + $0xf0] sm:$0xf] %v5659_v27  ;;  %5036 = vmatprep.subr.bf16.mxu0 %v5280_v20  ;;  %v1166_v29 = vrot.slane %v1164_v44, 4 }
  0xdc   : > { %v5274_v10 = vld [vmem:[#allocation2 + $0xf4] ss:$12 sps:$4 sm:$0xff]   ;;  %v1167_v54 = vrot.slane %v5379_v53, 5  ;;  %2780 = vst [vmem:[#allocation2 + $0xfc] sm:$0xf] %v5664_v32  ;;  %v4209_v2 = vcombine.low %v1243_v61, %v1245_v60  ;;  %v6637_v30 = vld [vmem:[#allocation2 + $0x108] sm:$0xff]  ;;  %5037 = vmatpush3.bf16.msra.mxu0 %v5280_v20 }
  0xdd   : > { %2837 = vst [vmem:[#allocation2 + $0xf4] sm:$0xf] %v5775_v1  ;;  %v7715_v46 = vld [vmem:[#allocation13_spill] sm:$0xff]  ;;  %v6635_v55 = vld [vmem:[#allocation2 + $0x14c] sm:$0xf]  ;;  %1827 = vmatprep.mubr.bf16.mxu0 %v5274_v10  ;;  %v4323_v23 = vrot.slane %v5975_v52, 9  ;;  %v4285_v52 = vcombine.high %v6637_v30, %v6641_v18 }
  0xde   : > { %2838 = vst [vmem:[#allocation2 + $0x100] sm:$0xf] %v7715_v46  ;;  %1198 = vst [vmem:[#allocation2 + $0x14c] sm:$0xf] %v885_v43  ;;  %v6645_v24 = vld [vmem:[#allocation2 + $0x158] sm:$0xf]  ;;  %v4292_v7 = vcombine.low %v6621_v6, %v6635_v55  ;;  %1828 = vmatmul.mubr.bf16.gmra.mxu0 %v4209_v2 }
  0xdf   : > { %1091 = vst [vmem:[#allocation2 + $0x108] sm:$0xf] %v5659_v27  ;;  %1149 = vst [vmem:[#allocation2 + $0x10c] sm:$0xf] %v5775_v1  ;;  %v2854_v56 = vrot.slane %v5984_v35, 5  ;;  %v5285_v4 = vld [vmem:[%s7627_s1 + $0x40] sm:$0xff]   ;;  %v1168_v27 = vsel %vm6087_vm5, %v1166_v29, %v1167_v54  ;;  %v4284_v35 = vcombine.low %v6637_v30, %v6641_v18 }
  0xe0   : > { %1092 = vst [vmem:[#allocation2 + $0x114] sm:$0xf] %v5664_v32  ;;  %1150 = vst [vmem:[#allocation2 + $0x118] sm:$0xf] %v7715_v46  ;;  %v6659_v1 = vld [vmem:[#allocation2 + $0x170] sm:$0xf]  ;;  %4716 = vmatprep.subr.bf16.mxu1 %v5285_v4 }
  0xe1   : > { %1199 = vst [vmem:[#allocation2 + $0x158] sm:$0xf] %v6601_v22  ;;  %v5276_v20 = vld [vmem:[#allocation2 + $0x128] ss:$12 sps:$4 sm:$0xff]   ;;  %v6665_v44 = vld [vmem:[#allocation2 + $0x164] sm:$0xf] }
  0xe2   : > { %1201 = vst [vmem:[#allocation2 + $0x170] sm:$0xf] %v1165_v45  ;;  %2885 = vst [vmem:[#allocation2 + $0x128] sm:$0xf] %v6594_v62  ;;  %v6669_v32 = vld [vmem:[#allocation2 + $0x17c] sm:$0xf]  ;;  %5014 = vmatprep.mubr.bf16.mxu1 %v5276_v20 }
  0xe3   : > { %2886 = vst [vmem:[#allocation2 + $0x134] sm:$0xf] %v885_v43  ;;  %1200 = vst [vmem:[#allocation2 + $0x164] sm:$0xf] %v6615_v13  ;;  %v5380_v61 = vld [vmem:[%s5608_s6 + $0xd4] sm:$0x1]  ;;  %v4298_v53 = vcombine.low %v6659_v1, %v6669_v32 }
  0xe4   : > { %v2857_v60 = vrot.slane %v5380_v61, 5  ;;  %v5286_v10 = vld [vmem:[%s7627_s1] sm:$0xff]   ;;  %1202 = vst [vmem:[#allocation2 + $0x17c] sm:$0xf] %v1168_v27  ;;  %v2856_v54 = vrot.slane %v2854_v56, 4  ;;  %v5287_v62 = vld [vmem:[%s7627_s1 + $0x1f8] sm:$0xff]  }
  0xe5   : > { %4717 = vmatpush3.bf16.msra.mxu1 %v5286_v10  ;;  %v5277_v43 = vld [vmem:[#allocation2 + $0x140] ss:$12 sps:$4 sm:$0xff]   ;;  %4838 = vmatprep.subr.bf16.mxu0 %v5287_v62  ;;  %v7716_v4 = vld [vmem:[#allocation14_spill] sm:$0xff]  ;;  %v7717_v20 = vld [vmem:[#allocation16_spill] sm:$0xff]  ;;  %v2855_v10 = vsel %vm6087_vm5, %v4323_v23, %v2854_v56 }
  0xe6   : > { %v1247_v46 = vld [vmem:[#allocation2 + $0x108] sm:$0xff]  ;;  %2887 = vst [vmem:[#allocation2 + $0x140] sm:$0xf] %v6601_v22  ;;  %2888 = vst [vmem:[#allocation2 + $0x14c] sm:$0xf] %v6615_v13  ;;  %5015 = vmatmul.mubr.bf16.gmra.mxu1 %v5277_v43  ;;  %v2858_v22 = vsel %vm6087_vm5, %v2856_v54, %v2857_v60  ;;  %v5289_v13 = vld [vmem:[%s7627_s1 + $0x238] sm:$0xff]   ;;  %v7722_v60 = vcombine.low %v6197_v5, %v6219_v40 }
  0xe7   : > { %v1249_v2 = vld [vmem:[#allocation2 + $0x114] sm:$0xff]  ;;  %2781 = vst [vmem:[#allocation2 + $0x108] sm:$0xf] %v5673_v42  ;;  %5070 = vmatprep.subr.bf16.mxu1 %v5289_v13  ;;  %v7719_v23 = vld [vmem:[#allocation10_spill] sm:$0xff]  ;;  %v7720_v56 = vld [vmem:[#allocation11_spill] sm:$0xff] }
  0xe8   : > { %v5281_v29 = vld [vmem:[#allocation2 + $0x10c] ss:$12 sps:$4 sm:$0xff]   ;;  %2782 = vst [vmem:[#allocation2 + $0x114] sm:$0xf] %v5688_v49  ;;  %v4212_v61 = vcombine.low %v1247_v46, %v1249_v2  ;;  %v7718_v49 = vcombine.low %v6187_v11, %v6205_v17  ;;  %v7723_v11 = vcombine.low %v6222_v14, %v6252_v21  ;;  %v5291_v17 = vld [vmem:[%s7627_s1 + $0x1b0] sm:$0xff]   ;;  %v7724_v40 = vcombine.low %v7719_v23, %v7720_v56  ;;  %v5295_v14 = vld [vmem:[%s7627_s1 + $0x1e0] sm:$0xff]  }
  0xe9   : > { %2839 = vst [vmem:[#allocation2 + $0x10c] sm:$0xf] %v7716_v4  ;;  %2840 = vst [vmem:[#allocation2 + $0x118] sm:$0xf] %v7717_v20  ;;  %1835 = vmatprep.mubr.bf16.mxu0 %v5281_v29  ;;  %v5292_v54 = vld [vmem:[%s7627_s1 + $0x1e8] sm:$0xff]   ;;  %v5294_v43 = vld [vmem:[%s7627_s1 + $0x230] sm:$0xff]   ;;  %v7727_v2 = vcombine.low %v6278_v37, %v6292_v58  ;;  %v7728_v4 = vcombine.low %v6314_v36, %v6316_v48 }
  0xea   : > { %v5283_v62 = vld [vmem:[#allocation2 + $0x158] ss:$12 sps:$4 sm:$0xff]   ;;  %1836 = vmatmul.mubr.bf16.gmra.mxu0 %v4212_v61  ;;  %v5293_v5 = vld [vmem:[%s7627_s1 + $0x1a8] sm:$0xff]   ;;  %v5300_v61 = vld [vmem:[%s7627_s1 + $0x1d0] sm:$0xff]  }
  0xeb   : > { %2889 = vst [vmem:[#allocation2 + $0x158] sm:$0xf] %v1165_v45  ;;  %2890 = vst [vmem:[#allocation2 + $0x164] sm:$0xf] %v1168_v27  ;;  %v5284_v42 = vld [vmem:[#allocation2 + $0x170] ss:$12 sps:$4 sm:$0xff]   ;;  %5018 = vmatprep.mubr.bf16.mxu1 %v5283_v62  ;;  %5038 = vmatprep.mubr.bf16.mxu0 %v7718_v49  ;;  %v7721_v27 = vcombine.high %v7719_v23, %v7720_v56  ;;  %v7733_v62 = vcombine.low %v6332_v28, %v6338_v15 }
  0xec   : > { %2891 = vst [vmem:[#allocation2 + $0x170] sm:$0xf] %v2855_v10  ;;  %2892 = vst [vmem:[#allocation2 + $0x17c] sm:$0xf] %v2858_v22  ;;  %v5290_v45 = vld [vmem:[%s7627_s1 + $0x1f0] sm:$0xff]   ;;  %v5299_v29 = vld [vmem:[%s7627_s1 + $0x228] sm:$0xff]  }
  0xed   : > { %v7725_v21 = vld [vmem:[#allocation12_spill] sm:$0xff]  ;;  %v5296_v20 = vld [vmem:[%s7627_s1 + $0x1a0] sm:$0xff]   ;;  %v7730_v10 = vld [vmem:[#allocation15_spill] sm:$0xff] }
  0xee   : > { %5019 = vmatmul.mubr.bf16.gmra.mxu1 %v5284_v42  ;;  %v7726_v46 = vcombine.high %v5769_v63, %v7725_v21  ;;  %v5297_v37 = vld [vmem:[%s7627_s1 + $0x1d8] sm:$0xff]   ;;  %v5304_v58 = vld [vmem:[%s7627_s1 + $0x220] sm:$0xff]   ;;  %v7729_v48 = vcombine.low %v5769_v63, %v7725_v21  ;;  %v7734_v42 = vcombine.low %v6373_v33, %v6394_v25  ;;  %v5301_v49 = vld [vmem:[%s7627_s1 + $0x190] sm:$0xff]  }
  0xef   : > { %2469 = vmatprep.mubr.bf16.mxu1 %v7721_v27  ;;  %v5298_v36 = vld [vmem:[%s7627_s1 + $0x198] sm:$0xff]   ;;  %v7731_v22 = vld [vmem:[#allocation18_spill] sm:$0xff]  ;;  %v5317_v15 = vld [vmem:[%s7627_s1 + $0x210] sm:$0xff]   ;;  %v7739_v27 = vcombine.low %v6404_v38, %v6425_v34 }
  0xf0   : > { %v5310_v63 = vld [vmem:[%s7627_s1 + $0x218] sm:$0xff]   ;;  %v5302_v28 = vld [vmem:[%s7627_s1 + $0x1c8] sm:$0xff]   ;;  %v7735_v25 = vcombine.low %v7730_v10, %v7731_v22  ;;  %v5331_v38 = vld [vmem:[%s7627_s1 + $0x200] sm:$0xff]  }
  0xf1   : > { %v5303_v33 = vld [vmem:[%s7627_s1 + $0x188] sm:$0xff]   ;;  %v7737_v23 = vld [vmem:[#allocation25_spill] sm:$0xff]  ;;  %v7771_v30 = vld [vmem:[#allocation20_spill] sm:$0xff] }
  0xf2   : > { %5039 = vmatmul.mubr.bf16.vlgmr.msra.gmra.mxu0 %v7722_v60  ;;  %v5324_v60 = vld [vmem:[%s7627_s1 + $0x208] sm:$0xff]   ;;  %v7764_v1 = vld [vmem:[#allocation37_spill] sm:$0xff] }
  0xf3   : > { %4839 = vmatpush3.bf16.msra.mxu0 %v5288_v0  ;;  %5042 = vmatprep.mubr.bf16.mxu0 %v7723_v11  ;;  %v5305_v0 = vld [vmem:[%s7627_s1 + $0x1c0] sm:$0xff]   ;;  %v7740_v11 = vcombine.low %v6465_v59, %v6467_v16  ;;  %v7742_v59 = vld [vmem:[#allocation28_spill] sm:$0xff]  ;;  %v7760_v55 = vld [vmem:[#allocation35_spill] sm:$0xff]  ;;  %v7765_v32 = vcombine.high %v6518_v31, %v7764_v1 }
  0xf4   : > { %4840 = vmatprep.subr.bf16.mxu0 %v5290_v45  ;;  %v7736_v45 = vld [vmem:[#allocation24_spill] sm:$0xff]  ;;  %v7743_v16 = vcombine.high %v6029_v57, %v7742_v59  ;;  %v7748_v21 = vld [vmem:[#allocation30_spill] sm:$0xff] }
  0xf5   : > { %v7738_v56 = vcombine.high %v7736_v45, %v7737_v23  ;;  %v7741_v34 = vcombine.low %v7736_v45, %v7737_v23 }
  0xf6   : > { %2470 = vmatmul.mubr.bf16.vlgmr.msra.gmra.mxu1 %v7724_v40  ;;  %v7746_v40 = vcombine.low %v6029_v57, %v7742_v59 }
  0xf7   : > { %4841 = vmatpush3.bf16.msra.mxu0 %v5291_v17  ;;  %5071 = vmatpush3.bf16.msra.mxu1 %v5289_v13  ;;  %v7732_v13 = vcombine.high %v7730_v10, %v7731_v22  ;;  %v5306_v17 = vld [vmem:[%s7627_s1 + $0x180] sm:$0xff]   ;;  %v7767_v22 = vcombine.high %v6572_v41, %v6574_v12 }
  0xf8   : > { %4842 = vmatprep.subr.bf16.mxu0 %v5292_v54  ;;  %2477 = vmatprep.mubr.bf16.mxu1 %v7726_v46  ;;  %v7744_v54 = vcombine.low %v6498_v39, %v6502_v50  ;;  %v7750_v39 = vcombine.low %v6548_v9, %v6562_v26  ;;  %v4295_v50 = vcombine.low %v6645_v24, %v6665_v44  ;;  %v7756_v26 = vld [vmem:[#allocation33_spill] sm:$0xff]  ;;  %v7757_v24 = vld [vmem:[#allocation34_spill] sm:$0xff] }
  0xf9   : > { %5072 = vmatprep.subr.bf16.mxu1 %v5294_v43  ;;  %v7758_v44 = vcombine.high %v7756_v26, %v7757_v24  ;;  %v7759_v6 = vcombine.low %v7756_v26, %v7757_v24 }
  0xfa   : > { %5043 = vmatmul.mubr.bf16.gmra.mxu0 %v7727_v2  ;;  %v5307_v2 = vld [vmem:[#allocation2] ss:$12 sps:$4 sm:$0xff]  }
  0xfb   : > { %5046 = vmatprep.mubr.bf16.mxu0 %v7728_v4  ;;  %4843 = vmatpush3.bf16.msra.mxu0 %v5293_v5  ;;  %v4289_v5 = vcombine.low %v6581_v51, %v6610_v3  ;;  %v7753_v51 = vld [vmem:[#allocation32_spill] sm:$0xff]  ;;  %v5309_v3 = vld [vmem:[#allocation2 + $0x4] ss:$12 sps:$4 sm:$0xff]  }
  0xfc   : > { %4844 = vmatprep.subr.bf16.mxu0 %v5295_v14  ;;  %5073 = vmatpush3.bf16.msra.mxu1 %v5294_v43  ;;  %v7745_v43 = vcombine.low %v6530_v19, %v6537_v8  ;;  %v7747_v14 = vld [vmem:[#allocation29_spill] sm:$0xff]  ;;  %v7752_v8 = vld [vmem:[#allocation31_spill] sm:$0xff] }
  0xfd   : > { %5074 = vmatprep.subr.bf16.mxu1 %v5299_v29  ;;  %v7749_v46 = vcombine.high %v7747_v14, %v7748_v21  ;;  %v7751_v19 = vcombine.low %v7747_v14, %v7748_v21  ;;  %v7754_v57 = vcombine.high %v7752_v8, %v7753_v51  ;;  %v7755_v9 = vcombine.low %v7752_v8, %v7753_v51  ;;  %v5328_v51 = vld [vmem:[#allocation2 + $0x94] ss:$12 sps:$4 sm:$0xff]  }
  0xfe   : > { %2478 = vmatmul.mubr.bf16.gmra.mxu1 %v7729_v48  ;;  %v5318_v48 = vld [vmem:[#allocation2 + $0x4c] ss:$12 sps:$4 sm:$0xff]  }
  0xff   : > { %4845 = vmatpush3.bf16.msra.mxu0 %v5296_v20  ;;  %2485 = vmatprep.mubr.bf16.mxu1 %v7732_v13  ;;  %v5313_v20 = vld [vmem:[#allocation2 + $0x18] ss:$12 sps:$4 sm:$0xff]  }
 0x100   : > { %4846 = vmatprep.subr.bf16.mxu0 %v5297_v37  ;;  %5075 = vmatpush3.bf16.msra.mxu1 %v5299_v29  ;;  %v5311_v29 = vld [vmem:[#allocation2 + $0x1c] ss:$12 sps:$4 sm:$0xff]   ;;  %v5314_v37 = vld [vmem:[#allocation2 + $0x34] ss:$12 sps:$4 sm:$0xff]  }
 0x101   : > { %5076 = vmatprep.subr.bf16.mxu1 %v5304_v58 }
 0x102   : > { %5047 = vmatmul.mubr.bf16.gmra.mxu0 %v7733_v62 }
 0x103   : > { %5050 = vmatprep.mubr.bf16.mxu0 %v7734_v42  ;;  %4847 = vmatpush3.bf16.msra.mxu0 %v5298_v36  ;;  %v4582_v36 = vpop.f32.mrf.mxu0 }
 0x104   : > { %4848 = vmatprep.subr.bf16.mxu0 %v5300_v61  ;;  %5077 = vmatpush3.bf16.msra.mxu1 %v5304_v58  ;;  %v7766_v61 = vcombine.low %v6518_v31, %v7764_v1 }
 0x105   : > { %5078 = vmatprep.subr.bf16.mxu1 %v5310_v63  ;;  %v4583_v10 = vpop.f32.mrf.mxu0 }
 0x106   : > { %2486 = vmatmul.mubr.bf16.gmra.mxu1 %v7735_v25  ;;  %v6868_v13 = vadd.f32 %v4583_v10, %v4582_v36 }
 0x107   : > { %4849 = vmatpush3.bf16.msra.mxu0 %v5301_v49  ;;  %2493 = vmatprep.mubr.bf16.mxu1 %v7738_v56  ;;  %v4585_v62 = vpop.f32.mrf.mxu0  ;;  %v5320_v49 = vld [vmem:[#allocation2 + $0x48] ss:$12 sps:$4 sm:$0xff]  }
 0x108   : > { %4850 = vmatprep.subr.bf16.mxu0 %v5302_v28  ;;  %5079 = vmatpush3.bf16.msra.mxu1 %v5310_v63 }
 0x109   : > { %5080 = vmatprep.subr.bf16.mxu1 %v5317_v15  ;;  %v4586_v63 = vpop.f32.mrf.mxu0 }
 0x10a   : > { %5051 = vmatmul.mubr.bf16.gmra.mxu0 %v7739_v27  ;;  %v6870_v42 = vadd.f32 %v4586_v63, %v4585_v62  ;;  %v7768_v27 = vld [vmem:[#allocation19_spill] sm:$0xff] }
 0x10b   : > { %5054 = vmatprep.mubr.bf16.mxu0 %v7740_v11  ;;  %4851 = vmatpush3.bf16.msra.mxu0 %v5303_v33  ;;  %v4588_v28 = vpop.f32.mrf.mxu0 }
 0x10c   : > { %4852 = vmatprep.subr.bf16.mxu0 %v5305_v0  ;;  %5081 = vmatpush3.bf16.msra.mxu1 %v5317_v15  ;;  %v5321_v15 = vld [vmem:[#allocation2 + $0x64] ss:$12 sps:$4 sm:$0xff]  }
 0x10d   : > { %5082 = vmatprep.subr.bf16.mxu1 %v5324_v60  ;;  %v4589_v31 = vpop.f32.mrf.mxu0 }
 0x10e   : > { %2494 = vmatmul.mubr.bf16.gmra.mxu1 %v7741_v34  ;;  %v6878_v25 = vadd.f32 %v4589_v31, %v4588_v28  ;;  %v7775_v28 = vld [vmem:[#allocation26_spill] sm:$0xff] }
 0x10f   : > { %4853 = vmatpush3.bf16.msra.mxu0 %v5306_v17  ;;  %2501 = vmatprep.mubr.bf16.mxu1 %v7743_v16  ;;  %v4591_v0 = vpop.f32.mrf.mxu0 }
 0x110   : > { %5083 = vmatpush3.bf16.msra.mxu1 %v5324_v60  ;;  %v7769_v60 = vld [vmem:[#allocation17_spill] sm:$0xff] }
 0x111   : > { %5084 = vmatprep.subr.bf16.mxu1 %v5331_v38  ;;  %v4592_v56 = vpop.f32.mrf.mxu0  ;;  %v4288_v11 = vcombine.high %v7769_v60, %v7768_v27 }
 0x112   : > { %5055 = vmatmul.mubr.bf16.gmra.mxu0 %v7744_v54  ;;  %v6884_v12 = vadd.f32 %v4592_v56, %v4591_v0  ;;  %v5334_v0 = vld [vmem:[#allocation2 + $0xa8] ss:$12 sps:$4 sm:$0xff]   ;;  %v5337_v56 = vld [vmem:[#allocation2 + $0xc4] ss:$12 sps:$4 sm:$0xff]  }
 0x113   : > { %5058 = vmatprep.mubr.bf16.mxu0 %v7745_v43 }
 0x114   : > { %5085 = vmatpush3.bf16.msra.mxu1 %v5331_v38 }
 0x115   : > { %v4654_v33 = vpop.f32.mrf.mxu1 }
 0x116   : > { %2502 = vmatmul.mubr.bf16.gmra.mxu1 %v7746_v40  ;;  %v4287_v40 = vcombine.low %v7769_v60, %v7768_v27 }
 0x117   : > { %2509 = vmatprep.mubr.bf16.mxu1 %v7749_v46  ;;  %v4655_v45 = vpop.f32.mrf.mxu1  ;;  %v7770_v46 = vld [vmem:[#allocation21_spill] sm:$0xff] }
 0x118   : > { %v6880_v23 = vadd.f32 %v4655_v45, %v4654_v33  ;;  %v4291_v18 = vcombine.high %v7771_v30, %v7770_v46 }
 0x119   : > { %v4657_v41 = vpop.f32.mrf.mxu1 }
 0x11a   : > { %5059 = vmatmul.mubr.bf16.gmra.mxu0 %v7750_v39 }
 0x11b   : > { %5062 = vmatprep.mubr.bf16.mxu0 %v4289_v5  ;;  %v4658_v38 = vpop.f32.mrf.mxu1 }
 0x11c   : > { %v6889_v34 = vadd.f32 %v4658_v38, %v4657_v41  ;;  %v5338_v38 = vld [vmem:[#allocation2 + $0x8] ss:$12 sps:$4 sm:$0xff]  }
 0x11d   : > { %v4594_v17 = vpop.f32.mrf.mxu0 }
 0x11e   : > { %2510 = vmatmul.mubr.bf16.gmra.mxu1 %v7751_v19 }
 0x11f   : > { %2517 = vmatprep.mubr.bf16.mxu1 %v7754_v57  ;;  %v4595_v59 = vpop.f32.mrf.mxu0 }
 0x120   : > { %v6891_v54 = vadd.f32 %v4595_v59, %v4594_v17  ;;  %v5335_v59 = vld [vmem:[#allocation2 + $0xc0] ss:$12 sps:$4 sm:$0xff]  }
 0x121   : > { %v4597_v43 = vpop.f32.mrf.mxu0 }
 0x122   : > { %5063 = vmatmul.mubr.bf16.gmra.mxu0 %v4292_v7  ;;  %v7761_v7 = vld [vmem:[#allocation36_spill] sm:$0xff] }
 0x123   : > { %5066 = vmatprep.mubr.bf16.mxu0 %v4295_v50  ;;  %v7762_v4 = vcombine.high %v7760_v55, %v7761_v7  ;;  %v7763_v58 = vcombine.low %v7760_v55, %v7761_v7  ;;  %v4598_v21 = vpop.f32.mrf.mxu0  ;;  %v5327_v50 = vld [vmem:[#allocation2 + $0x78] ss:$12 sps:$4 sm:$0xff]   ;;  %v7772_v55 = vld [vmem:[#allocation23_spill] sm:$0xff] }
 0x124   : > { %v6899_v39 = vadd.f32 %v4598_v21, %v4597_v43  ;;  %v7773_v7 = vld [vmem:[#allocation22_spill] sm:$0xff] }
 0x125   : > { %v4660_v16 = vpop.f32.mrf.mxu1  ;;  %v5342_v43 = vld [vmem:[#allocation2 + $0xdc] ss:$12 sps:$4 sm:$0xff]  }
 0x126   : > { %2518 = vmatmul.mubr.bf16.gmra.mxu1 %v7755_v9 }
 0x127   : > { %2525 = vmatprep.mubr.bf16.mxu1 %v7758_v44  ;;  %v4661_v5 = vpop.f32.mrf.mxu1 }
 0x128   : > { %v6895_v14 = vadd.f32 %v4661_v5, %v4660_v16 }
 0x12a   : > { %5067 = vmatmul.mubr.bf16.gmra.mxu0 %v4298_v53  ;;  %v5316_v53 = vld [vmem:[#allocation2 + $0x30] ss:$12 sps:$4 sm:$0xff]  }
 0x12b   : > { %3437 = vmatprep.mubr.bf16.mxu0 %v5309_v3 }
 0x12c   : > { %v4600_v19 = vpop.f32.mrf.mxu0 }
 0x12e   : > { %2526 = vmatmul.mubr.bf16.gmra.mxu1 %v7759_v6  ;;  %v4601_v3 = vpop.f32.mrf.mxu0 }
 0x12f   : > { %2533 = vmatprep.mubr.bf16.mxu1 %v7762_v4  ;;  %v6903_v26 = vadd.f32 %v4601_v3, %v4600_v19  ;;  %v4294_v4 = vcombine.high %v7773_v7, %v7772_v55 }
 0x130   : > { %v4603_v24 = vpop.f32.mrf.mxu0 }
 0x132   : > { %3438 = vmatmul.mubr.bf16.vlgmr.msra.gmra.mxu0 %v5307_v2  ;;  %v4290_v2 = vcombine.low %v7771_v30, %v7770_v46  ;;  %v4604_v6 = vpop.f32.mrf.mxu0 }
 0x133   : > { %3445 = vmatprep.mubr.bf16.mxu0 %v5311_v29 }
 0x136   : > { %2534 = vmatmul.mubr.bf16.gmra.mxu1 %v7763_v58  ;;  %v5330_v58 = vld [vmem:[#allocation2 + $0x90] ss:$12 sps:$4 sm:$0xff]  }
 0x137   : > { %2541 = vmatprep.mubr.bf16.mxu1 %v7765_v32  ;;  %v5332_v32 = vld [vmem:[#allocation2 + $0xac] ss:$12 sps:$4 sm:$0xff]  }
 0x13a   : > { %3446 = vmatmul.mubr.bf16.gmra.mxu0 %v5313_v20 }
 0x13b   : > { %3453 = vmatprep.mubr.bf16.mxu0 %v5314_v37  ;;  %v6911_v37 = vadd.f32 %v4604_v6, %v4603_v24 }
 0x13e   : > { %2542 = vmatmul.mubr.bf16.gmra.mxu1 %v7766_v61 }
 0x13f   : > { %2549 = vmatprep.mubr.bf16.mxu1 %v7767_v22  ;;  %v4293_v22 = vcombine.low %v7773_v7, %v7772_v55 }
 0x142   : > { %3454 = vmatmul.mubr.bf16.gmra.mxu0 %v5316_v53 }
 0x143   : > { %3461 = vmatprep.mubr.bf16.mxu0 %v5318_v48  ;;  %v4606_v48 = vpop.f32.mrf.mxu0 }
 0x145   : > { %v4607_v10 = vpop.f32.mrf.mxu0 }
 0x146   : > { %2550 = vmatmul.mubr.bf16.gmra.mxu1 %v4281_v47  ;;  %v5323_v47 = vld [vmem:[#allocation2 + $0x60] ss:$12 sps:$4 sm:$0xff]   ;;  %v6919_v63 = vadd.f32 %v4607_v10, %v4606_v48  ;;  %v5345_v48 = vld [vmem:[#allocation2 + $0xf0] ss:$12 sps:$4 sm:$0xff]  }
 0x147   : > { %2557 = vmatprep.mubr.bf16.mxu1 %v4285_v52  ;;  %v5325_v52 = vld [vmem:[#allocation2 + $0x7c] ss:$12 sps:$4 sm:$0xff]   ;;  %v4609_v33 = vpop.f32.mrf.mxu0 }
 0x149   : > { %v4610_v27 = vpop.f32.mrf.mxu0 }
 0x14a   : > { %3462 = vmatmul.mubr.bf16.gmra.mxu0 %v5320_v49  ;;  %v7774_v49 = vld [vmem:[#allocation27_spill] sm:$0xff] }
 0x14b   : > { %3469 = vmatprep.mubr.bf16.mxu0 %v5321_v15  ;;  %v4297_v15 = vcombine.high %v7775_v28, %v7774_v49  ;;  %v4612_v41 = vpop.f32.mrf.mxu0 }
 0x14d   : > { %v4613_v17 = vpop.f32.mrf.mxu0 }
 0x14e   : > { %2558 = vmatmul.mubr.bf16.gmra.mxu1 %v4284_v35  ;;  %v4663_v35 = vpop.f32.mrf.mxu1 }
 0x14f   : > { %2565 = vmatprep.mubr.bf16.mxu1 %v4288_v11  ;;  %v6925_v11 = vadd.f32 %v4610_v27, %v4609_v33  ;;  %v4615_v16 = vpop.f32.mrf.mxu0  ;;  %v5350_v27 = vld [vmem:[#allocation2 + $0x108] ss:$12 sps:$4 sm:$0xff]  }
 0x150   : > { %v4664_v8 = vpop.f32.mrf.mxu1 }
 0x151   : > { %v6901_v57 = vadd.f32 %v4664_v8, %v4663_v35  ;;  %v5339_v35 = vld [vmem:[#allocation2 + $0x20] ss:$12 sps:$4 sm:$0xff]  }
 0x152   : > { %3470 = vmatmul.mubr.bf16.gmra.mxu0 %v5323_v47  ;;  %v4666_v9 = vpop.f32.mrf.mxu1  ;;  %v4296_v47 = vcombine.low %v7775_v28, %v7774_v49 }
 0x153   : > { %3477 = vmatprep.mubr.bf16.mxu0 %v5325_v52  ;;  %v4614_v52 = vadd.f32 %v4613_v17, %v4612_v41  ;;  %v5357_v17 = vld [vmem:[#allocation2 + $0x124] ss:$12 sps:$4 sm:$0xff]  }
 0x154   : > { %v4667_v44 = vpop.f32.mrf.mxu1 }
 0x155   : > { %v6907_v29 = vadd.f32 %v4667_v44, %v4666_v9  ;;  %v5340_v9 = vld [vmem:[#allocation2 + $0xd8] ss:$12 sps:$4 sm:$0xff]   ;;  %v5347_v44 = vld [vmem:[#allocation2 + $0xf4] ss:$12 sps:$4 sm:$0xff]  }
 0x156   : > { %2566 = vmatmul.mubr.bf16.gmra.mxu1 %v4287_v40  ;;  %v4669_v20 = vpop.f32.mrf.mxu1  ;;  %v4616_v40 = vpop.f32.mrf.mxu0 }
 0x157   : > { %2573 = vmatprep.mubr.bf16.mxu1 %v4291_v18  ;;  %v4617_v46 = vadd.f32 %v4616_v40, %v4615_v16  ;;  %v5354_v16 = vld [vmem:[#allocation2 + $0xb0] ss:$12 sps:$4 sm:$0xff]   ;;  %v5358_v40 = vld [vmem:[#allocation2 + $0xc8] ss:$12 sps:$4 sm:$0xff]  }
 0x158   : > { %v4670_v1 = vpop.f32.mrf.mxu1 }
 0x159   : > { %v6913_v53 = vadd.f32 %v4670_v1, %v4669_v20 }
 0x15a   : > { %3478 = vmatmul.mubr.bf16.gmra.mxu0 %v5327_v50  ;;  %v4672_v36 = vpop.f32.mrf.mxu1 }
 0x15b   : > { %3485 = vmatprep.mubr.bf16.mxu0 %v5328_v51  ;;  %v4618_v19 = vpop.f32.mrf.mxu0  ;;  %v5343_v51 = vld [vmem:[#allocation2 + $0x38] ss:$12 sps:$4 sm:$0xff]  }
 0x15c   : > { %v4673_v61 = vpop.f32.mrf.mxu1 }
 0x15d   : > { %v6917_v62 = vadd.f32 %v4673_v61, %v4672_v36  ;;  %v4619_v24 = vpop.f32.mrf.mxu0 }
 0x15e   : > { %2574 = vmatmul.mubr.bf16.gmra.mxu1 %v4290_v2  ;;  %v4675_v31 = vpop.f32.mrf.mxu1  ;;  %v4620_v2 = vadd.f32 %v4619_v24, %v4618_v19  ;;  %v5362_v19 = vld [vmem:[#allocation2 + $0x13c] ss:$12 sps:$4 sm:$0xff]  }
 0x15f   : > { %2581 = vmatprep.mubr.bf16.mxu1 %v4294_v4 }
 0x160   : > { %v4676_v45 = vpop.f32.mrf.mxu1 }
 0x161   : > { %v6923_v60 = vadd.f32 %v4676_v45, %v4675_v31 }
 0x162   : > { %3486 = vmatmul.mubr.bf16.gmra.mxu0 %v5330_v58  ;;  %v4992_v5 = vpop.f32.mrf.mxu1  ;;  %v5344_v58 = vld [vmem:[#allocation2 + $0x50] ss:$12 sps:$4 sm:$0xff]  }
 0x163   : > { %3493 = vmatprep.mubr.bf16.mxu0 %v5332_v32  ;;  %v6930_v21 = vadd.f32 %v4992_v5, %v6878_v25  ;;  %v5348_v32 = vld [vmem:[#allocation2 + $0x68] ss:$12 sps:$4 sm:$0xff]  }
 0x164   : > { %v1910_v30 = vpop.f32.mrf.mxu1 }
 0x165   : > { %v6933_v18 = vadd.f32 %v6868_v13, %v1910_v30  ;;  %v4621_v13 = vpop.f32.mrf.mxu0 }
 0x166   : > { %2582 = vmatmul.mubr.bf16.gmra.mxu1 %v4293_v22  ;;  %v4993_v50 = vpop.f32.mrf.mxu1 }
 0x167   : > { %2589 = vmatprep.mubr.bf16.mxu1 %v4297_v15  ;;  %v6936_v8 = vadd.f32 %v4993_v50, %v6884_v12  ;;  %v4622_v12 = vpop.f32.mrf.mxu0  ;;  %v5349_v15 = vld [vmem:[#allocation2 + $0x80] ss:$12 sps:$4 sm:$0xff]  }
 0x168   : > { %v1913_v3 = vpop.f32.mrf.mxu1  ;;  %v4623_v20 = vadd.f32 %v4622_v12, %v4621_v13 }
 0x169   : > { %v6939_v25 = vadd.f32 %v6870_v42, %v1913_v3 }
 0x16a   : > { %3494 = vmatmul.mubr.bf16.gmra.mxu0 %v5334_v0  ;;  %v4996_v6 = vpop.f32.mrf.mxu1 }
 0x16b   : > { %3501 = vmatprep.mubr.bf16.mxu0 %v5337_v56  ;;  %v6942_v55 = vadd.f32 %v4996_v6, %v6903_v26  ;;  %v5352_v26 = vld [vmem:[#allocation2 + $0x10c] ss:$12 sps:$4 sm:$0xff]  }
 0x16c   : > { %v1926_v7 = vpop.f32.mrf.mxu1 }
 0x16d   : > { %v6945_v4 = vadd.f32 %v6891_v54, %v1926_v7  ;;  %v5363_v7 = vld [vmem:[#allocation2 + $0xf8] ss:$12 sps:$4 sm:$0xff]  }
 0x16e   : > { %2590 = vmatmul.mubr.bf16.gmra.mxu1 %v4296_v47  ;;  %v4997_v42 = vpop.f32.mrf.mxu1 }
 0x16f   : > { %5086 = vmatprep.mubr.bf16.mxu1 %v5338_v38  ;;  %v6948_v1 = vadd.f32 %v4997_v42, %v6911_v37  ;;  %v4624_v54 = vpop.f32.mrf.mxu0 }
 0x170   : > { %v1929_v36 = vpop.f32.mrf.mxu1 }
 0x171   : > { %v6951_v61 = vadd.f32 %v6899_v39, %v1929_v36  ;;  %v4625_v37 = vpop.f32.mrf.mxu0  ;;  %v5353_v39 = vld [vmem:[#allocation2 + $0x98] ss:$12 sps:$4 sm:$0xff]  }
 0x172   : > { %3502 = vmatmul.mubr.bf16.gmra.mxu0 %v5335_v59  ;;  %v5000_v10 = vpop.f32.mrf.mxu1  ;;  %v4626_v33 = vadd.f32 %v4625_v37, %v4624_v54  ;;  %v5368_v37 = vld [vmem:[#allocation2 + $0x128] ss:$12 sps:$4 sm:$0xff]  }
 0x173   : > { %3509 = vmatprep.mubr.bf16.mxu0 %v5342_v43  ;;  %v6953_v22 = vadd.f32 %v5000_v10, %v4614_v52  ;;  %v4627_v45 = vpop.f32.mrf.mxu0  ;;  %v5364_v10 = vld [vmem:[#allocation2 + $0x110] ss:$12 sps:$4 sm:$0xff]  }
 0x174   : > { %v1942_v49 = vpop.f32.mrf.mxu1 }
 0x175   : > { %v6956_v28 = vadd.f32 %v6919_v63, %v1942_v49  ;;  %v4628_v47 = vpop.f32.mrf.mxu0 }
 0x176   : > { %5087 = vmatmul.mubr.bf16.vlgmr.msra.gmra.mxu1 %v5339_v35  ;;  %v5001_v31 = vpop.f32.mrf.mxu1  ;;  %v4629_v38 = vadd.f32 %v4628_v47, %v4627_v45  ;;  %v5372_v45 = vld [vmem:[#allocation2 + $0x16c] ss:$12 sps:$4 sm:$0xff]  }
 0x177   : > { %5090 = vmatprep.mubr.bf16.mxu1 %v5343_v51  ;;  %v6958_v0 = vadd.f32 %v5001_v31, %v4617_v46 }
 0x178   : > { %v1945_v56 = vpop.f32.mrf.mxu1 }
 0x179   : > { %v6961_v41 = vadd.f32 %v6925_v11, %v1945_v56  ;;  %v5355_v11 = vld [vmem:[#allocation2 + $0x120] ss:$12 sps:$4 sm:$0xff]  }
 0x17a   : > { %3510 = vmatmul.mubr.bf16.gmra.mxu0 %v5340_v9 }
 0x17b   : > { %3517 = vmatprep.mubr.bf16.mxu0 %v5347_v44  ;;  %v5004_v63 = vpop.f32.mrf.mxu1 }
 0x17c   : > { %v6963_v52 = vadd.f32 %v5004_v63, %v4626_v33  ;;  %v5365_v33 = vld [vmem:[#allocation2 + $0x150] ss:$12 sps:$4 sm:$0xff]  }
 0x17d   : > { %v1958_v59 = vpop.f32.mrf.mxu1 }
 0x17e   : > { %5091 = vmatmul.mubr.bf16.gmra.mxu1 %v5344_v58  ;;  %v6965_v43 = vadd.f32 %v4620_v2, %v1958_v59  ;;  %v5359_v2 = vld [vmem:[#allocation2 + $0xe0] ss:$12 sps:$4 sm:$0xff]   ;;  %v5360_v58 = vld [vmem:[#allocation2 + $0x138] ss:$12 sps:$4 sm:$0xff]  }
 0x17f   : > { %5094 = vmatprep.mubr.bf16.mxu1 %v5348_v32  ;;  %v5005_v5 = vpop.f32.mrf.mxu1  ;;  %v5367_v32 = vld [vmem:[#allocation2 + $0x154] ss:$12 sps:$4 sm:$0xff]  }
 0x180   : > { %v6967_v30 = vadd.f32 %v5005_v5, %v4629_v38 }
 0x181   : > { %v1961_v35 = vpop.f32.mrf.mxu1 }
 0x182   : > { %3518 = vmatmul.mubr.bf16.gmra.mxu0 %v5345_v48  ;;  %v4630_v46 = vpop.f32.mrf.mxu0  ;;  %v6969_v51 = vadd.f32 %v4623_v20, %v1961_v35  ;;  %v5370_v35 = vld [vmem:[#allocation2 + $0x168] ss:$12 sps:$4 sm:$0xff]  }
 0x183   : > { %3525 = vmatprep.mubr.bf16.mxu0 %v5352_v26 }
 0x184   : > { %v4631_v50 = vpop.f32.mrf.mxu0 }
 0x185   : > { %v4632_v3 = vadd.f32 %v4631_v50, %v4630_v46  ;;  %v5373_v46 = vld [vmem:[#allocation2 + $0x158] ss:$12 sps:$4 sm:$0xff]  }
 0x186   : > { %5095 = vmatmul.mubr.bf16.gmra.mxu1 %v5349_v15  ;;  %v4633_v9 = vpop.f32.mrf.mxu0 }
 0x187   : > { %5098 = vmatprep.mubr.bf16.mxu1 %v5353_v39 }
 0x188   : > { %v5008_v24 = vpop.f32.mrf.mxu1  ;;  %v4634_v44 = vpop.f32.mrf.mxu0 }
 0x189   : > { %v4635_v6 = vadd.f32 %v4634_v44, %v4633_v9 }
 0x18a   : > { %3526 = vmatmul.mubr.bf16.gmra.mxu0 %v5350_v27  ;;  %v1974_v13 = vpop.f32.mrf.mxu1 }
 0x18b   : > { %3533 = vmatprep.mubr.bf16.mxu0 %v5357_v17  ;;  %v6971_v12 = vadd.f32 %v4632_v3, %v1974_v13 }
 0x18c   : > { %v5009_v42 = vpop.f32.mrf.mxu1 }
 0x18e   : > { %5099 = vmatmul.mubr.bf16.gmra.mxu1 %v5354_v16  ;;  %v1977_v36 = vpop.f32.mrf.mxu1  ;;  %v5369_v16 = vld [vmem:[#allocation2 + $0x140] ss:$12 sps:$4 sm:$0xff]  }
 0x18f   : > { %5102 = vmatprep.mubr.bf16.mxu1 %v5358_v40  ;;  %v6973_v48 = vadd.f32 %v4635_v6, %v1977_v36 }
 0x192   : > { %3534 = vmatmul.mubr.bf16.gmra.mxu0 %v5355_v11  ;;  %v4636_v20 = vpop.f32.mrf.mxu0 }
 0x193   : > { %3541 = vmatprep.mubr.bf16.mxu0 %v5362_v19 }
 0x194   : > { %v4637_v26 = vpop.f32.mrf.mxu0 }
 0x195   : > { %v4638_v54 = vadd.f32 %v4637_v26, %v4636_v20 }
 0x196   : > { %5103 = vmatmul.mubr.bf16.gmra.mxu1 %v5359_v2  ;;  %v4639_v49 = vpop.f32.mrf.mxu0 }
 0x197   : > { %5106 = vmatprep.mubr.bf16.mxu1 %v5363_v7  ;;  %v6975_v31 = vadd.f32 %v5008_v24, %v4638_v54  ;;  %v5374_v7 = vld [vmem:[#allocation2 + $0x170] ss:$12 sps:$4 sm:$0xff]  }
 0x198   : > { %v4640_v39 = vpop.f32.mrf.mxu0 }
 0x199   : > { %v4641_v27 = vadd.f32 %v4640_v39, %v4639_v49 }
 0x19a   : > { %3542 = vmatmul.mubr.bf16.gmra.mxu0 %v5360_v58  ;;  %v5012_v15 = vpop.f32.mrf.mxu1 }
 0x19b   : > { %3549 = vmatprep.mubr.bf16.mxu0 %v5367_v32  ;;  %v6977_v38 = vadd.f32 %v5009_v42, %v4641_v27 }
 0x19c   : > { %v1990_v56 = vpop.f32.mrf.mxu1 }
 0x19e   : > { %5107 = vmatmul.mubr.bf16.gmra.mxu1 %v5364_v10  ;;  %v4642_v47 = vpop.f32.mrf.mxu0  ;;  %v5013_v17 = vpop.f32.mrf.mxu1 }
 0x19f   : > { %5110 = vmatprep.mubr.bf16.mxu1 %v5368_v37 }
 0x1a0   : > { %v4643_v63 = vpop.f32.mrf.mxu0  ;;  %v1993_v59 = vpop.f32.mrf.mxu1 }
 0x1a1   : > { %v4644_v5 = vadd.f32 %v4643_v63, %v4642_v47 }
 0x1a2   : > { %3550 = vmatmul.mubr.bf16.gmra.mxu0 %v5365_v33  ;;  %v4645_v40 = vpop.f32.mrf.mxu0 }
 0x1a3   : > { %3557 = vmatprep.mubr.bf16.mxu0 %v5372_v45  ;;  %v6979_v11 = vadd.f32 %v4644_v5, %v1990_v56 }
 0x1a4   : > { %v4646_v50 = vpop.f32.mrf.mxu0 }
 0x1a5   : > { %v4647_v3 = vadd.f32 %v4646_v50, %v4645_v40 }
 0x1a6   : > { %v5016_v19 = vpop.f32.mrf.mxu1  ;;  %5111 = vmatmul.mubr.bf16.gmra.mxu1 %v5369_v16 }
 0x1a7   : > { %v6982_v9 = vadd.f32 %v5016_v19, %v6895_v14  ;;  %5114 = vmatprep.mubr.bf16.mxu1 %v5373_v46  ;;  %v6984_v44 = vadd.f32 %v4647_v3, %v1993_v59 }
 0x1a8   : > { %v2006_v24 = vpop.f32.mrf.mxu1 }
 0x1a9   : > { %v6987_v6 = vadd.f32 %v6880_v23, %v2006_v24 }
 0x1aa   : > { %v4648_v2 = vpop.f32.mrf.mxu0  ;;  %3558 = vmatmul.mubr.bf16.gmra.mxu0 %v5370_v35  ;;  %v5017_v13 = vpop.f32.mrf.mxu1 }
 0x1ab   : > { %v6990_v42 = vadd.f32 %v5017_v13, %v6901_v57 }
 0x1ac   : > { %v4649_v58 = vpop.f32.mrf.mxu0  ;;  %v2009_v36 = vpop.f32.mrf.mxu1 }
 0x1ad   : > { %v4650_v32 = vadd.f32 %v4649_v58, %v4648_v2  ;;  %v6993_v14 = vadd.f32 %v6889_v34, %v2009_v36 }
 0x1ae   : > { %v4651_v20 = vpop.f32.mrf.mxu0  ;;  %v5020_v10 = vpop.f32.mrf.mxu1  ;;  %5115 = vmatmul.mubr.bf16.gmra.mxu1 %v5374_v7 }
 0x1af   : > { %v6995_v26 = vadd.f32 %v5012_v15, %v4650_v32  ;;  %v6998_v23 = vadd.f32 %v5020_v10, %v6917_v62 }
 0x1b0   : > { %v4652_v54 = vpop.f32.mrf.mxu0  ;;  %v2022_v37 = vpop.f32.mrf.mxu1 }
 0x1b1   : > { %v4653_v49 = vadd.f32 %v4652_v54, %v4651_v20  ;;  %v7001_v57 = vadd.f32 %v6907_v29, %v2022_v37 }
 0x1b2   : > { %v5040_v33 = vpop.f32.mrf.mxu0  ;;  %v5021_v45 = vpop.f32.mrf.mxu1 }
 0x1b3   : > { %v7003_v39 = vadd.f32 %v5013_v17, %v4653_v49  ;;  %v7006_v34 = vadd.f32 %v5021_v45, %v6923_v60 }
 0x1b4   : > { %v2632_v56 = vpop.f32.mrf.mxu0  ;;  %v2025_v15 = vpop.f32.mrf.mxu1 }
 0x1b5   : > { %7776 = vst [vmem:[#allocation13_spill] sm:$0xff] %v7006_v34  ;;  %v7009_v47 = vadd.f32 %v6913_v53, %v2025_v15 }
 0x1b6   : > { %v5041_v27 = vpop.f32.mrf.mxu0  ;;  %v4718_v62 = vpop.f32.mrf.mxu1 }
 0x1b8   : > { %v2635_v63 = vpop.f32.mrf.mxu0  ;;  %v4719_v59 = vpop.f32.mrf.mxu1 }
 0x1b9   : > { %v4720_v5 = vadd.f32 %v4719_v59, %v4718_v62 }
 0x1ba   : > { %v5044_v16 = vpop.f32.mrf.mxu0  ;;  %v4721_v40 = vpop.f32.mrf.mxu1 }
 0x1bb   : > { %v2472_v17 = vadd.f32 %v4720_v5, %v6933_v18 }
 0x1bc   : > { %v2648_v29 = vpop.f32.mrf.mxu0  ;;  %v4722_v46 = vpop.f32.mrf.mxu1 }
 0x1bd   : > { %v7012_v50 = vadd.f32 %v2632_v56, %v2472_v17  ;;  %v4723_v60 = vadd.f32 %v4722_v46, %v4721_v40 }
 0x1be   : > { %v5045_v35 = vpop.f32.mrf.mxu0  ;;  %v4724_v19 = vpop.f32.mrf.mxu1 }
 0x1bf   : > { %v2475_v24 = vadd.f32 %v4723_v60, %v6939_v25 }
 0x1c0   : > { %v2651_v3 = vpop.f32.mrf.mxu0  ;;  %v4725_v53 = vpop.f32.mrf.mxu1 }
 0x1c1   : > { %v7017_v13 = vadd.f32 %v2635_v63, %v2475_v24  ;;  %v4726_v7 = vadd.f32 %v4725_v53, %v4724_v19 }
 0x1c2   : > { %v7015_v2 = vpop.f32.mrf.mxu0  ;;  %v4727_v58 = vpop.f32.mrf.mxu1 }
 0x1c3   : > { %v2480_v36 = vadd.f32 %v4726_v7, %v6930_v21 }
 0x1c4   : > { %v2664_v32 = vpop.f32.mrf.mxu0  ;;  %v4728_v18 = vpop.f32.mrf.mxu1 }
 0x1c5   : > { %v4729_v10 = vadd.f32 %v4728_v18, %v4727_v58  ;;  %v7022_v54 = vadd.f32 %v5040_v33, %v2480_v36 }
 0x1c6   : > { %v7020_v20 = vpop.f32.mrf.mxu0  ;;  %v4730_v49 = vpop.f32.mrf.mxu1 }
 0x1c7   : > { %v2483_v25 = vadd.f32 %v4729_v10, %v6936_v8 }
 0x1c8   : > { %v2667_v37 = vpop.f32.mrf.mxu0  ;;  %v4731_v45 = vpop.f32.mrf.mxu1 }
 0x1c9   : > { %v4732_v15 = vadd.f32 %v4731_v45, %v4730_v49  ;;  %v7027_v62 = vadd.f32 %v5041_v27, %v2483_v25 }
 0x1ca   : > { %v7025_v56 = vpop.f32.mrf.mxu0  ;;  %v4733_v63 = vpop.f32.mrf.mxu1 }
 0x1cb   : > { %v2488_v21 = vadd.f32 %v4732_v15, %v6945_v4 }
 0x1cc   : > { %v2680_v59 = vpop.f32.mrf.mxu0  ;;  %v4734_v5 = vpop.f32.mrf.mxu1 }
 0x1cd   : > { %v4735_v17 = vadd.f32 %v4734_v5, %v4733_v63  ;;  %v7032_v33 = vadd.f32 %v2648_v29, %v2488_v21 }
 0x1ce   : > { %v7030_v40 = vpop.f32.mrf.mxu0  ;;  %v4736_v46 = vpop.f32.mrf.mxu1 }
 0x1cf   : > { %v2491_v8 = vadd.f32 %v4735_v17, %v6951_v61 }
 0x1d0   : > { %v2683_v60 = vpop.f32.mrf.mxu0  ;;  %v4737_v19 = vpop.f32.mrf.mxu1 }
 0x1d1   : > { %v4738_v53 = vadd.f32 %v4737_v19, %v4736_v46  ;;  %v7037_v27 = vadd.f32 %v2651_v3, %v2491_v8 }
 0x1d2   : > { %v7035_v24 = vpop.f32.mrf.mxu0  ;;  %v4739_v7 = vpop.f32.mrf.mxu1 }
 0x1d3   : > { %v2496_v4 = vadd.f32 %v4738_v53, %v6942_v55 }
 0x1d4   : > { %v7039_v58 = vpop.f32.mrf.mxu0  ;;  %v4740_v36 = vpop.f32.mrf.mxu1 }
 0x1d5   : > { %v4741_v29 = vadd.f32 %v4740_v36, %v4739_v7  ;;  %v7044_v10 = vadd.f32 %v5044_v16, %v2496_v4 }
 0x1d6   : > { %v7042_v18 = vpop.f32.mrf.mxu0  ;;  %v4742_v49 = vpop.f32.mrf.mxu1 }
 0x1d7   : > { %v2499_v61 = vadd.f32 %v4741_v29, %v6948_v1 }
 0x1d8   : > { %v7046_v25 = vpop.f32.mrf.mxu0  ;;  %v4743_v45 = vpop.f32.mrf.mxu1 }
 0x1d9   : > { %v4744_v3 = vadd.f32 %v4743_v45, %v4742_v49  ;;  %v7051_v63 = vadd.f32 %v5045_v35, %v2499_v61 }
 0x1da   : > { %v7049_v15 = vpop.f32.mrf.mxu0  ;;  %v4745_v21 = vpop.f32.mrf.mxu1 }
 0x1db   : > { %v2504_v55 = vadd.f32 %v4744_v3, %v6956_v28 }
 0x1dc   : > { %v7053_v5 = vpop.f32.mrf.mxu0  ;;  %v4746_v17 = vpop.f32.mrf.mxu1 }
 0x1dd   : > { %v4747_v16 = vadd.f32 %v4746_v17, %v4745_v21  ;;  %v7058_v8 = vadd.f32 %v2664_v32, %v2504_v55 }
 0x1de   : > { %v7056_v46 = vpop.f32.mrf.mxu0  ;;  %v4748_v19 = vpop.f32.mrf.mxu1 }
 0x1df   : > { %v2507_v1 = vadd.f32 %v4747_v16, %v6961_v41 }
 0x1e0   : > { %v7060_v53 = vpop.f32.mrf.mxu0  ;;  %v4749_v7 = vpop.f32.mrf.mxu1 }
 0x1e1   : > { %v4750_v35 = vadd.f32 %v4749_v7, %v4748_v19  ;;  %v7065_v36 = vadd.f32 %v2667_v37, %v2507_v1 }
 0x1e2   : > { %v7063_v4 = vpop.f32.mrf.mxu0  ;;  %v4751_v29 = vpop.f32.mrf.mxu1 }
 0x1e3   : > { %7777 = vst [vmem:[#allocation14_spill] sm:$0xff] %v7063_v4  ;;  %v2512_v28 = vadd.f32 %v4750_v35, %v6953_v22 }
 0x1e4   : > { %v7067_v49 = vpop.f32.mrf.mxu0  ;;  %v4752_v61 = vpop.f32.mrf.mxu1 }
 0x1e5   : > { %v4753_v32 = vadd.f32 %v4752_v61, %v4751_v29  ;;  %v7073_v3 = vadd.f32 %v7015_v2, %v2512_v28 }
 0x1e6   : > { %v7070_v45 = vpop.f32.mrf.mxu0  ;;  %v4754_v21 = vpop.f32.mrf.mxu1 }
 0x1e7   : > { %7778 = vst [vmem:[#allocation16_spill] sm:$0xff] %v7070_v45  ;;  %v2515_v55 = vadd.f32 %v4753_v32, %v6958_v0 }
 0x1e8   : > { %v7075_v41 = vpop.f32.mrf.mxu0  ;;  %v4755_v17 = vpop.f32.mrf.mxu1 }
 0x1e9   : > { %v4756_v16 = vadd.f32 %v4755_v17, %v4754_v21  ;;  %v7081_v19 = vadd.f32 %v7020_v20, %v2515_v55 }
 0x1ea   : > { %v7078_v37 = vpop.f32.mrf.mxu0  ;;  %v4757_v22 = vpop.f32.mrf.mxu1 }
 0x1eb   : > { %7779 = vst [vmem:[#allocation10_spill] sm:$0xff] %v7078_v37  ;;  %v2520_v7 = vadd.f32 %v4756_v16, %v6965_v43 }
 0x1ec   : > { %v7083_v1 = vpop.f32.mrf.mxu0  ;;  %v4758_v35 = vpop.f32.mrf.mxu1 }
 0x1ed   : > { %7780 = vst [vmem:[#allocation11_spill] sm:$0xff] %v7083_v1  ;;  %v4759_v29 = vadd.f32 %v4758_v35, %v4757_v22  ;;  %v7088_v28 = vadd.f32 %v2680_v59, %v2520_v7 }
 0x1ee   : > { %v7086_v2 = vpop.f32.mrf.mxu0  ;;  %v4760_v61 = vpop.f32.mrf.mxu1 }
 0x1ef   : > { %7781 = vst [vmem:[#allocation12_spill] sm:$0xff] %v7086_v2  ;;  %v2523_v32 = vadd.f32 %v4759_v29, %v6969_v51 }
 0x1f0   : > { %v7090_v0 = vpop.f32.mrf.mxu0  ;;  %v4761_v21 = vpop.f32.mrf.mxu1 }
 0x1f1   : > { %7782 = vst [vmem:[#allocation15_spill] sm:$0xff] %v7090_v0  ;;  %v4762_v20 = vadd.f32 %v4761_v21, %v4760_v61  ;;  %v7093_v55 = vadd.f32 %v2683_v60, %v2523_v32 }
 0x1f2   : > { %v4854_v17 = vpop.f32.mrf.mxu0  ;;  %v4763_v37 = vpop.f32.mrf.mxu1 }
 0x1f3   : > { %v2528_v43 = vadd.f32 %v4762_v20, %v6963_v52 }
 0x1f4   : > { %v4855_v1 = vpop.f32.mrf.mxu0  ;;  %v4764_v2 = vpop.f32.mrf.mxu1 }
 0x1f5   : > { %v7096_v16 = vadd.f32 %v4855_v1, %v4854_v17  ;;  %v4765_v59 = vadd.f32 %v4764_v2, %v4763_v37  ;;  %v7099_v7 = vadd.f32 %v7025_v56, %v2528_v43 }
 0x1f6   : > { %v4857_v22 = vpop.f32.mrf.mxu0  ;;  %v4766_v35 = vpop.f32.mrf.mxu1 }
 0x1f7   : > { %v2531_v51 = vadd.f32 %v4765_v59, %v6967_v30 }
 0x1f8   : > { %v4858_v0 = vpop.f32.mrf.mxu0  ;;  %v4767_v60 = vpop.f32.mrf.mxu1 }
 0x1f9   : > { %v7102_v29 = vadd.f32 %v4858_v0, %v4857_v22  ;;  %v4768_v32 = vadd.f32 %v4767_v60, %v4766_v35  ;;  %v7107_v52 = vadd.f32 %v7030_v40, %v2531_v51 }
 0x1fa   : > { %v7104_v61 = vpop.f32.mrf.mxu0  ;;  %v4769_v1 = vpop.f32.mrf.mxu1 }
 0x1fb   : > { %v2536_v37 = vadd.f32 %v4768_v32, %v6971_v12 }
 0x1fc   : > { %v7109_v21 = vpop.f32.mrf.mxu0  ;;  %v4770_v56 = vpop.f32.mrf.mxu1 }
 0x1fd   : > { %v4771_v17 = vadd.f32 %v4770_v56, %v4769_v1  ;;  %v7115_v30 = vadd.f32 %v7039_v58, %v2536_v37 }
 0x1fe   : > { %v7112_v2 = vpop.f32.mrf.mxu0  ;;  %v4772_v0 = vpop.f32.mrf.mxu1 }
 0x1ff   : > { %7783 = vst [vmem:[#allocation18_spill] sm:$0xff] %v7115_v30  ;;  %v2539_v43 = vadd.f32 %v4771_v17, %v6973_v48 }
 0x200   : > { %v7117_v20 = vpop.f32.mrf.mxu0  ;;  %v4773_v22 = vpop.f32.mrf.mxu1 }
 0x201   : > { %v4774_v59 = vadd.f32 %v4773_v22, %v4772_v0  ;;  %v7123_v35 = vadd.f32 %v7046_v25, %v2539_v43 }
 0x202   : > { %v7120_v40 = vpop.f32.mrf.mxu0  ;;  %v4775_v12 = vpop.f32.mrf.mxu1 }
 0x203   : > { %7784 = vst [vmem:[#allocation24_spill] sm:$0xff] %v7123_v35  ;;  %v2544_v60 = vadd.f32 %v4774_v59, %v6975_v31 }
 0x204   : > { %v7125_v51 = vpop.f32.mrf.mxu0  ;;  %v4776_v32 = vpop.f32.mrf.mxu1 }
 0x205   : > { %v4777_v1 = vadd.f32 %v4776_v32, %v4775_v12  ;;  %v7131_v37 = vadd.f32 %v7035_v24, %v2544_v60 }
 0x206   : > { %v7128_v58 = vpop.f32.mrf.mxu0  ;;  %v4778_v48 = vpop.f32.mrf.mxu1 }
 0x207   : > { %v2547_v17 = vadd.f32 %v4777_v1, %v6977_v38 }
 0x208   : > { %v7133_v56 = vpop.f32.mrf.mxu0  ;;  %v4779_v0 = vpop.f32.mrf.mxu1 }
 0x209   : > { %v4780_v43 = vadd.f32 %v4779_v0, %v4778_v48  ;;  %v7139_v22 = vadd.f32 %v7042_v18, %v2547_v17 }
 0x20a   : > { %v7136_v25 = vpop.f32.mrf.mxu0  ;;  %v4781_v31 = vpop.f32.mrf.mxu1 }
 0x20b   : > { %v2552_v12 = vadd.f32 %v4780_v43, %v6979_v11 }
 0x20c   : > { %v7141_v59 = vpop.f32.mrf.mxu0  ;;  %v4782_v32 = vpop.f32.mrf.mxu1 }
 0x20d   : > { %v4783_v60 = vadd.f32 %v4782_v32, %v4781_v31  ;;  %v7147_v34 = vadd.f32 %v7053_v5, %v2552_v12 }
 0x20e   : > { %v7144_v24 = vpop.f32.mrf.mxu0  ;;  %v4784_v38 = vpop.f32.mrf.mxu1 }
 0x20f   : > { %7785 = vst [vmem:[#allocation25_spill] sm:$0xff] %v7147_v34  ;;  %v2555_v48 = vadd.f32 %v4783_v60, %v6984_v44 }
 0x210   : > { %v7149_v1 = vpop.f32.mrf.mxu0  ;;  %v4785_v0 = vpop.f32.mrf.mxu1 }
 0x211   : > { %v4786_v17 = vadd.f32 %v4785_v0, %v4784_v38  ;;  %v7155_v45 = vadd.f32 %v7060_v53, %v2555_v48 }
 0x212   : > { %v7152_v18 = vpop.f32.mrf.mxu0  ;;  %v4787_v11 = vpop.f32.mrf.mxu1 }
 0x213   : > { %7786 = vst [vmem:[#allocation28_spill] sm:$0xff] %v7155_v45  ;;  %v2560_v31 = vadd.f32 %v4786_v17, %v6995_v26 }
 0x214   : > { %v7157_v43 = vpop.f32.mrf.mxu0  ;;  %v4788_v32 = vpop.f32.mrf.mxu1 }
 0x215   : > { %v4789_v12 = vadd.f32 %v4788_v32, %v4787_v11  ;;  %v7163_v4 = vadd.f32 %v7049_v15, %v2560_v31 }
 0x216   : > { %v7160_v5 = vpop.f32.mrf.mxu0  ;;  %v4790_v44 = vpop.f32.mrf.mxu1 }
 0x217   : > { %7787 = vst [vmem:[#allocation29_spill] sm:$0xff] %v7163_v4  ;;  %v2563_v38 = vadd.f32 %v4789_v12, %v7003_v39 }
 0x218   : > { %v7165_v60 = vpop.f32.mrf.mxu0  ;;  %v4791_v0 = vpop.f32.mrf.mxu1 }
 0x219   : > { %v4792_v48 = vadd.f32 %v4791_v0, %v4790_v44  ;;  %v7171_v45 = vadd.f32 %v7056_v46, %v2563_v38 }
 0x21a   : > { %v7168_v53 = vpop.f32.mrf.mxu0  ;;  %v4793_v26 = vpop.f32.mrf.mxu1 }
 0x21b   : > { %7788 = vst [vmem:[#allocation30_spill] sm:$0xff] %v7171_v45  ;;  %v2568_v11 = vadd.f32 %v4792_v48, %v6987_v6 }
 0x21c   : > { %v7173_v17 = vpop.f32.mrf.mxu0  ;;  %v4794_v32 = vpop.f32.mrf.mxu1 }
 0x21d   : > { %v4795_v31 = vadd.f32 %v4794_v32, %v4793_v26  ;;  %v7179_v34 = vadd.f32 %v7067_v49, %v2568_v11 }
 0x21e   : > { %v7176_v15 = vpop.f32.mrf.mxu0  ;;  %v4796_v39 = vpop.f32.mrf.mxu1 }
 0x21f   : > { %7789 = vst [vmem:[#allocation31_spill] sm:$0xff] %v7179_v34  ;;  %v2571_v44 = vadd.f32 %v4795_v31, %v6993_v14 }
 0x220   : > { %v7181_v12 = vpop.f32.mrf.mxu0  ;;  %v4797_v0 = vpop.f32.mrf.mxu1 }
 0x221   : > { %v4798_v38 = vadd.f32 %v4797_v0, %v4796_v39  ;;  %v7187_v45 = vadd.f32 %v7075_v41, %v2571_v44 }
 0x222   : > { %v7184_v46 = vpop.f32.mrf.mxu0  ;;  %v4799_v6 = vpop.f32.mrf.mxu1 }
 0x223   : > { %7790 = vst [vmem:[#allocation32_spill] sm:$0xff] %v7187_v45  ;;  %v7192_v26 = vadd.f32 %v4798_v38, %v6982_v9 }
 0x224   : > { %v7189_v48 = vpop.f32.mrf.mxu0  ;;  %v4800_v49 = vpop.f32.mrf.mxu1 }
 0x225   : > { %7791 = vst [vmem:[#allocation33_spill] sm:$0xff] %v7192_v26  ;;  %v4801_v32 = vadd.f32 %v4800_v49, %v4799_v6 }
 0x226   : > { %v7194_v11 = vpop.f32.mrf.mxu0  ;;  %v4802_v34 = vpop.f32.mrf.mxu1 }
 0x227   : > { %v7199_v14 = vadd.f32 %v4801_v32, %v6990_v42 }
 0x228   : > { %v7196_v4 = vpop.f32.mrf.mxu0  ;;  %v4803_v31 = vpop.f32.mrf.mxu1 }
 0x229   : > { %7792 = vst [vmem:[#allocation34_spill] sm:$0xff] %v7199_v14  ;;  %v4804_v41 = vadd.f32 %v4803_v31, %v4802_v34 }
 0x22a   : > { %v7201_v39 = vpop.f32.mrf.mxu0  ;;  %v4805_v44 = vpop.f32.mrf.mxu1 }
 0x22b   : > { %v7206_v9 = vadd.f32 %v4804_v41, %v7001_v57 }
 0x22c   : > { %v7203_v0 = vpop.f32.mrf.mxu0  ;;  %v4806_v38 = vpop.f32.mrf.mxu1 }
 0x22d   : > { %7793 = vst [vmem:[#allocation35_spill] sm:$0xff] %v7206_v9  ;;  %v4807_v6 = vadd.f32 %v4806_v38, %v4805_v44 }
 0x22e   : > { %v7208_v45 = vpop.f32.mrf.mxu0  ;;  %v4808_v49 = vpop.f32.mrf.mxu1 }
 0x22f   : > { %v7213_v42 = vadd.f32 %v4807_v6, %v7009_v47  ;;  %v4862_v47 = vadd.f32 %v7109_v21, %v7104_v61 }
 0x230   : > { %v7210_v26 = vpop.f32.mrf.mxu0  ;;  %v4809_v32 = vpop.f32.mrf.mxu1 }
 0x231   : > { %7794 = vst [vmem:[#allocation36_spill] sm:$0xff] %v7213_v42  ;;  %v4810_v34 = vadd.f32 %v4809_v32, %v4808_v49  ;;  %v4865_v32 = vadd.f32 %v7117_v20, %v7112_v2 }
 0x232   : > { %v7215_v14 = vpop.f32.mrf.mxu0  ;;  %v7217_v31 = vpop.f32.mrf.mxu1 }
 0x233   : > { %7795 = vst [vmem:[#allocation37_spill] sm:$0xff] %v7217_v31  ;;  %v7222_v57 = vadd.f32 %v4810_v34, %v6998_v23 }
 0x234   : > { %v7219_v35 = vpop.f32.mrf.mxu0  ;;  %v7224_v41 = vpop.f32.mrf.mxu1 }
 0x235   : > { %7796 = vst [vmem:[#allocation19_spill] sm:$0xff] %v7222_v57  ;;  %7797 = vst [vmem:[#allocation17_spill] sm:$0xff] %v7224_v41 }
 0x236   : > { %v7226_v44 = vpop.f32.mrf.mxu0  ;;  %v5088_v38 = vpop.f32.mrf.mxu1 }
 0x237   : > { %v3609_v42 = vadd.f32 %v5088_v38, %v4862_v47  ;;  %v4874_v47 = vadd.f32 %v7141_v59, %v7136_v25 }
 0x238   : > { %v7228_v9 = vpop.f32.mrf.mxu0  ;;  %v3600_v6 = vpop.f32.mrf.mxu1 }
 0x239   : > { %v3601_v23 = vadd.f32 %v7096_v16, %v3600_v6  ;;  %v7248_v30 = vadd.f32 %v3609_v42, %v7022_v54 }
 0x23a   : > { %v7233_v49 = vpop.f32.mrf.mxu0  ;;  %v5089_v34 = vpop.f32.mrf.mxu1 }
 0x23b   : > { %v7241_v41 = vadd.f32 %v3601_v23, %v7012_v50  ;;  %v3612_v31 = vadd.f32 %v5089_v34, %v4865_v32  ;;  %v4868_v50 = vadd.f32 %v7125_v51, %v7120_v40 }
 0x23c   : > { %v7238_v57 = vpop.f32.mrf.mxu0  ;;  %v3603_v61 = vpop.f32.mrf.mxu1 }
 0x23d   : > { %v7251_v2 = vadd.f32 %v3612_v31, %v7027_v62  ;;  %v3604_v16 = vadd.f32 %v7102_v29, %v3603_v61  ;;  %v4877_v29 = vadd.f32 %v7149_v1, %v7144_v24 }
 0x23e   : > { %v7245_v21 = vpop.f32.mrf.mxu0  ;;  %v5092_v20 = vpop.f32.mrf.mxu1 }
 0x23f   : > { %v4479_v6 = vpack.c.bf16 %v7251_v2, %v7248_v30  ;;  %v7263_v54 = vadd.f32 %v3604_v16, %v7017_v13  ;;  %v3625_v51 = vadd.f32 %v5092_v20, %v4874_v47  ;;  %v4871_v13 = vadd.f32 %v7133_v56, %v7128_v58 }
 0x240   : > { %v7254_v38 = vpop.f32.mrf.mxu0  ;;  %v3616_v42 = vpop.f32.mrf.mxu1 }
 0x241   : > { %4551 = vst [vmem:[%s7269_s29 + $0x8] sm:$0xff] %v4479_v6   ;;  %v4474_v40 = vpack.c.bf16 %v7263_v54, %v7241_v41  ;;  %v3617_v25 = vadd.f32 %v4868_v50, %v3616_v42  ;;  %v7285_v34 = vadd.f32 %v3625_v51, %v7044_v10  ;;  %v4889_v6 = vadd.f32 %v7181_v12, %v7176_v15 }
 0x242   : > { %v7265_v62 = vpop.f32.mrf.mxu0  ;;  %v5093_v59 = vpop.f32.mrf.mxu1 }
 0x243   : > { %4475 = vst [vmem:[%s7269_s29] sm:$0xff] %v4474_v40   ;;  %v7280_v32 = vadd.f32 %v3617_v25, %v7032_v33  ;;  %v3628_v24 = vadd.f32 %v5093_v59, %v4877_v29  ;;  %v4886_v33 = vadd.f32 %v7173_v17, %v7168_v53 }
 0x244   : > { %v7274_v31 = vpop.f32.mrf.mxu0  ;;  %v3619_v1 = vpop.f32.mrf.mxu1 }
 0x245   : > { %v7288_v61 = vadd.f32 %v3628_v24, %v7051_v63  ;;  %v3620_v16 = vadd.f32 %v4871_v13, %v3619_v1  ;;  %v4880_v63 = vadd.f32 %v7157_v43, %v7152_v18  ;;  %v4898_v24 = vadd.f32 %v7203_v0, %v7201_v39 }
 0x246   : > { %v7282_v23 = vpop.f32.mrf.mxu0  ;;  %v5096_v20 = vpop.f32.mrf.mxu1 }
 0x247   : > { %v4489_v58 = vpack.c.bf16 %v7288_v61, %v7285_v34  ;;  %v7297_v56 = vadd.f32 %v3620_v16, %v7037_v27  ;;  %v3641_v53 = vadd.f32 %v5096_v20, %v4886_v33  ;;  %v4883_v27 = vadd.f32 %v7165_v60, %v7160_v5 }
 0x248   : > { %v7290_v50 = vpop.f32.mrf.mxu0  ;;  %v3632_v47 = vpop.f32.mrf.mxu1  ;;  %v4901_v20 = vadd.f32 %v7210_v26, %v7208_v45 }
 0x249   : > { %4553 = vst [vmem:[%s7269_s29 + $0x18] sm:$0xff] %v4489_v58   ;;  %v4484_v42 = vpack.c.bf16 %v7297_v56, %v7280_v32  ;;  %v3633_v40 = vadd.f32 %v4880_v63, %v3632_v47  ;;  %v7312_v18 = vadd.f32 %v3641_v53, %v7073_v3 }
 0x24a   : > { %v7299_v10 = vpop.f32.mrf.mxu0  ;;  %v5097_v17 = vpop.f32.mrf.mxu1 }
 0x24b   : > { %4552 = vst [vmem:[%s7269_s29 + $0x10] sm:$0xff] %v4484_v42   ;;  %v3644_v51 = vadd.f32 %v5097_v17, %v4889_v6  ;;  %v7320_v5 = vadd.f32 %v3633_v40, %v7058_v8  ;;  %v4913_v40 = vadd.f32 %v7254_v38, %v7245_v21 }
 0x24c   : > { %v4921_v29 = vpop.f32.mrf.mxu0  ;;  %v3635_v25 = vpop.f32.mrf.mxu1 }
 0x24d   : > { %v7315_v43 = vadd.f32 %v3644_v51, %v7081_v19  ;;  %v3636_v15 = vadd.f32 %v4883_v27, %v3635_v25  ;;  %v4892_v19 = vadd.f32 %v7189_v48, %v7184_v46  ;;  %v4904_v27 = vadd.f32 %v7219_v35, %v7215_v14 }
 0x24e   : > { %v4923_v59 = vpop.f32.mrf.mxu0  ;;  %v5100_v12 = vpop.f32.mrf.mxu1  ;;  %v4907_v25 = vadd.f32 %v7228_v9, %v7226_v44 }
 0x24f   : > { %v4499_v60 = vpack.c.bf16 %v7315_v43, %v7312_v18  ;;  %v7325_v1 = vadd.f32 %v3636_v15, %v7065_v36  ;;  %v3657_v39 = vadd.f32 %v5100_v12, %v4898_v24  ;;  %v4895_v36 = vadd.f32 %v7196_v4, %v7194_v11 }
 0x250   : > { %v4924_v13 = vpop.f32.mrf.mxu0  ;;  %v3648_v3 = vpop.f32.mrf.mxu1  ;;  %v4910_v4 = vadd.f32 %v7238_v57, %v7233_v49 }
 0x251   : > { %4555 = vst [vmem:[%s7269_s29 + $0x28] sm:$0xff] %v4499_v60   ;;  %v4494_v8 = vpack.c.bf16 %v7325_v1, %v7320_v5  ;;  %v3649_v58 = vadd.f32 %v4892_v19, %v3648_v3  ;;  %v7344_v45 = vadd.f32 %v3657_v39, %v7099_v7  ;;  %v4922_v3 = vadd.f32 %v4921_v29, %v7299_v10  ;;  %v7798_v19 = vld [vmem:[#allocation18_spill] sm:$0xff] }
 0x252   : > { %v7327_v16 = vpop.f32.mrf.mxu0  ;;  %v5101_v0 = vpop.f32.mrf.mxu1 }
 0x253   : > { %4554 = vst [vmem:[%s7269_s29 + $0x20] sm:$0xff] %v4494_v8   ;;  %v3660_v47 = vadd.f32 %v5101_v0, %v4901_v20  ;;  %v7354_v11 = vadd.f32 %v3649_v58, %v7088_v28  ;;  %v7799_v20 = vld [vmem:[#allocation24_spill] sm:$0xff]  ;;  %v4925_v0 = vadd.f32 %v4924_v13, %v4923_v59 }
 0x254   : > { %v7336_v33 = vpop.f32.mrf.mxu0  ;;  %v3651_v63 = vpop.f32.mrf.mxu1 }
 0x255   : > { %v7347_v48 = vadd.f32 %v3660_v47, %v7107_v52  ;;  %v3652_v26 = vadd.f32 %v4895_v36, %v3651_v63  ;;  %v4919_v47 = vadd.f32 %v7290_v50, %v7282_v23  ;;  %v7803_v50 = vld [vmem:[#allocation28_spill] sm:$0xff] }
 0x256   : > { %v7341_v46 = vpop.f32.mrf.mxu0  ;;  %v5104_v6 = vpop.f32.mrf.mxu1 }
 0x257   : > { %v4509_v53 = vpack.c.bf16 %v7347_v48, %v7344_v45  ;;  %v7359_v7 = vadd.f32 %v3652_v26, %v7093_v55  ;;  %v3673_v28 = vadd.f32 %v5104_v6, %v4910_v4 }
 0x258   : > { %v7349_v42 = vpop.f32.mrf.mxu0  ;;  %v3664_v17 = vpop.f32.mrf.mxu1 }
 0x259   : > { %4557 = vst [vmem:[%s7269_s29 + $0x38] sm:$0xff] %v4509_v53   ;;  %v4504_v57 = vpack.c.bf16 %v7359_v7, %v7354_v11  ;;  %v3665_v55 = vadd.f32 %v4904_v27, %v3664_v17  ;;  %v7372_v35 = vadd.f32 %v3673_v28, %v7131_v37  ;;  %v7800_v53 = vld [vmem:[#allocation29_spill] sm:$0xff] }
 0x25a   : > { %v4932_v52 = vpop.f32.mrf.mxu0  ;;  %v5105_v49 = vpop.f32.mrf.mxu1 }
 0x25b   : > { %4556 = vst [vmem:[%s7269_s29 + $0x30] sm:$0xff] %v4504_v57   ;;  %v3676_v15 = vadd.f32 %v5105_v49, %v4913_v40  ;;  %v7379_v9 = vadd.f32 %v3665_v55, %v7798_v19  ;;  %v7802_v57 = vld [vmem:[#allocation25_spill] sm:$0xff] }
 0x25c   : > { %v4933_v51 = vpop.f32.mrf.mxu0  ;;  %v3667_v12 = vpop.f32.mrf.mxu1  ;;  %v7806_v19 = vld [vmem:[#allocation33_spill] sm:$0xff] }
 0x25d   : > { %v7375_v14 = vadd.f32 %v3676_v15, %v7139_v22  ;;  %v3668_v21 = vadd.f32 %v4907_v25, %v3667_v12  ;;  %v4916_v22 = vadd.f32 %v7274_v31, %v7265_v62  ;;  %v7801_v62 = vld [vmem:[#allocation30_spill] sm:$0xff]  ;;  %v4934_v40 = vadd.f32 %v4933_v51, %v4932_v52 }
 0x25e   : > { %v4935_v24 = vpop.f32.mrf.mxu0  ;;  %v5108_v38 = vpop.f32.mrf.mxu1  ;;  %v4928_v15 = vadd.f32 %v7336_v33, %v7327_v16  ;;  %v7808_v16 = vld [vmem:[#allocation34_spill] sm:$0xff]  ;;  %v7809_v33 = vld [vmem:[#allocation16_spill] sm:$0xff] }
 0x25f   : > { %v4519_v44 = vpack.c.bf16 %v7375_v14, %v7372_v35  ;;  %v7384_v8 = vadd.f32 %v3668_v21, %v7799_v20  ;;  %v3689_v10 = vadd.f32 %v5108_v38, %v4922_v3  ;;  %v7804_v21 = vld [vmem:[#allocation37_spill] sm:$0xff] }
 0x260   : > { %v4936_v60 = vpop.f32.mrf.mxu0  ;;  %v3680_v37 = vpop.f32.mrf.mxu1  ;;  %v7805_v38 = vld [vmem:[#allocation17_spill] sm:$0xff] }
 0x261   : > { %4559 = vst [vmem:[%s7269_s29 + $0x48] sm:$0xff] %v4519_v44   ;;  %v4514_v36 = vpack.c.bf16 %v7384_v8, %v7379_v9  ;;  %v3681_v63 = vadd.f32 %v4916_v22, %v3680_v37  ;;  %v7395_v17 = vadd.f32 %v3689_v10, %v7800_v53  ;;  %v4937_v12 = vadd.f32 %v4936_v60, %v4935_v24  ;;  %v7807_v44 = vld [vmem:[#allocation14_spill] sm:$0xff]  ;;  %v7810_v53 = vld [vmem:[#allocation13_spill] sm:$0xff] }
 0x262   : > { %v4938_v39 = vpop.f32.mrf.mxu0  ;;  %v5109_v29 = vpop.f32.mrf.mxu1  ;;  %v4813_v3 = vadd.f32 %v7805_v38, %v7804_v21  ;;  %v2737_v20 = vadd.f32 %v7807_v44, %v7806_v19  ;;  %v2740_v24 = vadd.f32 %v7809_v33, %v7808_v16  ;;  %v7818_v33 = vld [vmem:[#allocation36_spill] sm:$0xff] }
 0x263   : > { %4558 = vst [vmem:[%s7269_s29 + $0x40] sm:$0xff] %v4514_v36   ;;  %v3692_v26 = vadd.f32 %v5109_v29, %v4925_v0  ;;  %v7401_v28 = vadd.f32 %v3681_v63, %v7802_v57  ;;  %v4931_v0 = vadd.f32 %v7349_v42, %v7341_v46  ;;  %v7811_v42 = vld [vmem:[#allocation31_spill] sm:$0xff]  ;;  %v7812_v57 = vld [vmem:[#allocation32_spill] sm:$0xff] }
 0x264   : > { %v4939_v58 = vpop.f32.mrf.mxu0  ;;  %v3683_v6 = vpop.f32.mrf.mxu1 }
 0x265   : > { %v7398_v31 = vadd.f32 %v3692_v26, %v7801_v62  ;;  %v3684_v59 = vadd.f32 %v4919_v47, %v3683_v6  ;;  %v2595_v62 = vadd.f32 %v4813_v3, %v7810_v53  ;;  %v7815_v3 = vld [vmem:[#allocation12_spill] sm:$0xff] }
 0x266   : > { %v4941_v4 = vpop.f32.mrf.mxu0  ;;  %v5112_v13 = vpop.f32.mrf.mxu1 }
 0x267   : > { %v4529_v23 = vpack.c.bf16 %v7398_v31, %v7395_v17  ;;  %v7406_v49 = vadd.f32 %v3684_v59, %v7803_v50  ;;  %v3705_v51 = vadd.f32 %v5112_v13, %v4934_v40  ;;  %v2756_v19 = vadd.f32 %v7815_v3, %v2595_v62 }
 0x268   : > { %v4942_v27 = vpop.f32.mrf.mxu0  ;;  %v3696_v25 = vpop.f32.mrf.mxu1 }
 0x269   : > { %4561 = vst [vmem:[%s7269_s29 + $0x58] sm:$0xff] %v4529_v23   ;;  %v4524_v52 = vpack.c.bf16 %v7406_v49, %v7401_v28  ;;  %v3697_v36 = vadd.f32 %v4928_v15, %v3696_v25  ;;  %v7422_v47 = vadd.f32 %v3705_v51, %v2737_v20  ;;  %v4940_v15 = vadd.f32 %v4939_v58, %v4938_v39  ;;  %v7814_v51 = vld [vmem:[#allocation10_spill] sm:$0xff] }
 0x26a   : > { %v4944_v55 = vpop.f32.mrf.mxu0  ;;  %v5113_v37 = vpop.f32.mrf.mxu1  ;;  %v4943_v44 = vadd.f32 %v4942_v27, %v4941_v4 }
 0x26b   : > { %4560 = vst [vmem:[%s7269_s29 + $0x50] sm:$0xff] %v4524_v52   ;;  %v3708_v60 = vadd.f32 %v5113_v37, %v4937_v12  ;;  %v7428_v13 = vadd.f32 %v3697_v36, %v7811_v42  ;;  %v7813_v52 = vld [vmem:[#allocation19_spill] sm:$0xff] }
 0x26c   : > { %v4945_v22 = vpop.f32.mrf.mxu0  ;;  %v3699_v10 = vpop.f32.mrf.mxu1  ;;  %v2753_v21 = vadd.f32 %v7814_v51, %v7813_v52 }
 0x26d   : > { %v7424_v63 = vadd.f32 %v3708_v60, %v2740_v24  ;;  %v3700_v26 = vadd.f32 %v4931_v0, %v3699_v10  ;;  %v4946_v6 = vadd.f32 %v4945_v22, %v4944_v55  ;;  %v7816_v22 = vld [vmem:[#allocation35_spill] sm:$0xff] }
 0x26e   : > { %v4947_v29 = vpop.f32.mrf.mxu0  ;;  %v5116_v59 = vpop.f32.mrf.mxu1  ;;  %v7817_v0 = vld [vmem:[#allocation11_spill] sm:$0xff] }
 0x26f   : > { %v4539_v40 = vpack.c.bf16 %v7424_v63, %v7422_v47  ;;  %v7433_v23 = vadd.f32 %v3700_v26, %v7812_v57  ;;  %v3721_v12 = vadd.f32 %v5116_v59, %v4946_v6  ;;  %v2745_v39 = vadd.f32 %v7817_v0, %v7816_v22  ;;  %v7819_v24 = vld [vmem:[#allocation15_spill] sm:$0xff] }
 0x270   : > { %v4948_v46 = vpop.f32.mrf.mxu0  ;;  %v3712_v25 = vpop.f32.mrf.mxu1  ;;  %v2748_v60 = vadd.f32 %v7819_v24, %v7818_v33 }
 0x271   : > { %v4949_v50 = vadd.f32 %v4948_v46, %v4947_v29  ;;  %4563 = vst [vmem:[%s7269_s29 + $0x68] sm:$0xff] %v4539_v40   ;;  %v4534_v55 = vpack.c.bf16 %v7433_v23, %v7428_v13  ;;  %v3713_v20 = vadd.f32 %v4940_v15, %v3712_v25  ;;  %v7444_v36 = vadd.f32 %v3721_v12, %v2753_v21 }
 0x272   : > { %v5117_v38 = vpop.f32.mrf.mxu1 }
 0x273   : > { %4562 = vst [vmem:[%s7269_s29 + $0x60] sm:$0xff] %v4534_v55   ;;  %v3724_v37 = vadd.f32 %v5117_v38, %v4949_v50  ;;  %v7450_v29 = vadd.f32 %v3713_v20, %v2745_v39 }
 0x274   : > { %v3715_v58 = vpop.f32.mrf.mxu1 }
 0x275   : > { %v7446_v16 = vadd.f32 %v3724_v37, %v2756_v19  ;;  %v3716_v10 = vadd.f32 %v4943_v44, %v3715_v58 }
 0x277   : > { %v4549_v4 = vpack.c.bf16 %v7446_v16, %v7444_v36  ;;  %v7454_v27 = vadd.f32 %v3716_v10, %v2748_v60  ;;  %3922 = sbr.rel (%p4428_p11) target bundleno = 638 (0x27e), region = 32 }
 0x279   : > { %4565 = vst [vmem:[%s7269_s29 + $0x78] sm:$0xff] %v4549_v4   ;;  %v4544_v26 = vpack.c.bf16 %v7454_v27, %v7450_v29 }
 0x27b   : > { %4564 = vst [vmem:[%s7269_s29 + $0x70] sm:$0xff] %v4544_v26  }
 0x27c   : > { %v5495_v6 = vmov 0.0  }
 0x27d   : > { %3923 = vst [vmem:[#allocation5] sm:$0x1] %v5495_v6  ;;  %3924 = vst [vmem:[#allocation7] sm:$0x1] %v5495_v6 }
 0x27e PF: > { %v3926_v53 = vadd.f32 %v7263_v54, %v7241_v41  ;;  %s4470_s30 = sshll.u32 %s5547_s19, 11  ;;  %s4051_s8 = sshll.u32 %s7269_s29, 4  ;;  %v3966_v46 = vmul.f32 %v7241_v41, %v7241_v41  ;;  %v3967_v42 = vmul.f32 %v7263_v54, %v7263_v54  ;;  %s7472_s8 = int_to_ptr.vmem [resolvable:$true] %s4051_s8 }
 0x27f   : > { %s7468_s7 = scalar_lea.hbm %s7628_s2, %s4470_s30  ;;  %s7481_s9 = scalar_lea.sflag [#allocation4], %s180_s27 }
 0x280   : > { %v3927_v62 = vadd.f32 %v3926_v53, %v7248_v30  ;;  %s5381_s10 = scalar_lea.vmem %s7472_s8, 2048  ;;  %s5496_s11 = smov [#allocation3]  }
 0x281   : > { %p5382_p12 = scmp.ne.s32.totalorder %s7472_s8, %s5381_s10  ;;  %s5385_s12 = sshll.u32 %s5496_s11, 4  ;;  %s5386_s12 = int_to_ptr.vmem [resolvable:$false] %s5385_s12 }
 0x282   : > { %v3928_v59 = vadd.f32 %v3927_v62, %v7251_v2  ;;  %s5387_s13 = scalar_lea.vmem %s5386_s12, 4096  ;;  %p5388_p1 = scmp.lt.s32.totalorder %s7472_s8, %s5386_s12 }
 0x283   : > { %p5383_p13 = pnand %p5382_p12, %p5566_p5  ;;  %p5389_p3 = scmp.lt.s32.totalorder %s5387_s13, %s5381_s10 }
 0x284   : > { %v3929_v40 = vadd.f32 %v3928_v59, %v7280_v32 }
 0x285   : > { %p5384_p0 = pneg %p5383_p13  ;;  %p5390_p4 = por %p5389_p3, %p5388_p1 }
 0x287   : > { %p5391_p7 = pnand %p5390_p4, %p5384_p0 }
 0x289   : > { %5394 = shalt.err (!%p5391_p7)
}
 0x28a   : > { %s5395_s14 = scalar_lea.hbm %s7468_s7, 2048  ;;  %s5399_s23 = scalar_lea.hbm %s7628_s2, 4096 }
 0x28b   : > { %p5396_p8 = scmp.ne.s32.totalorder %s7468_s7, %s5395_s14  ;;  %p5400_p11 = scmp.lt.s32.totalorder %s7468_s7, %s7628_s2 }
 0x28c   : > { %p5401_p12 = scmp.lt.s32.totalorder %s5399_s23, %s5395_s14 }
 0x28d   : > { %p5397_p9 = pnand %p5396_p8, %p5566_p5 }
 0x28e   : > { %p5402_p13 = por %p5401_p12, %p5400_p11 }
 0x28f   : > { %p5398_p10 = pneg %p5397_p9 }
 0x291   : > { %p5403_p0 = pnand %p5402_p13, %p5398_p10 }
 0x293   : > { %5406 = shalt.err (!%p5403_p0)
}
 0x294   : > { %s5497_s29 = smov 64   ;;  %s5498_s30 = smov 4   ;;  %v3968_v41 = vmul.f32 %v7248_v30, %v7248_v30  ;;  %v3930_v54 = vadd.f32 %v3929_v40, %v7297_v56  ;;  %v3969_v57 = vmul.f32 %v7251_v2, %v7251_v2  ;;  %v3998_v50 = vadd.f32 %v3967_v42, %v3966_v46 }
 0x295   : > { %5135 = dma.vmem_to_hbm [thread:$0]  (%p5566_p5), %s7472_s8, 2048, %s7468_s7, %s7481_s9, %s5497_s29, %s5497_s29, %s5498_s30   ;;  %v3970_v15 = vmul.f32 %v7280_v32, %v7280_v32  ;;  %v3971_v52 = vmul.f32 %v7297_v56, %v7297_v56  ;;  %v3972_v21 = vmul.f32 %v7285_v34, %v7285_v34  ;;  %v3973_v3 = vmul.f32 %v7288_v61, %v7288_v61 }
 0x296   : > { %v3931_v25 = vadd.f32 %v3930_v54, %v7285_v34  ;;  %v3999_v55 = vadd.f32 %v3998_v50, %v3968_v41  ;;  %v3974_v44 = vmul.f32 %v7320_v5, %v7320_v5  ;;  %v3975_v37 = vmul.f32 %v7325_v1, %v7325_v1  ;;  %s5499_s25 = smov [#allocation5]  }
 0x297   : > { %v3976_v0 = vmul.f32 %v7312_v18, %v7312_v18  ;;  %v3977_v58 = vmul.f32 %v7315_v43, %v7315_v43  ;;  %v3978_v24 = vmul.f32 %v7354_v11, %v7354_v11  ;;  %v3979_v10 = vmul.f32 %v7359_v7, %v7359_v7  ;;  %s4065_s5 = sshll.u32 %s5499_s25, 4  ;;  %s4066_s5 = int_to_ptr.vmem [resolvable:$true] %s4065_s5 }
 0x298   : > { %v3932_v12 = vadd.f32 %v3931_v25, %v7288_v61  ;;  %v4000_v51 = vadd.f32 %v3999_v55, %v3969_v57  ;;  %v3980_v26 = vmul.f32 %v7344_v45, %v7344_v45  ;;  %v3981_v53 = vmul.f32 %v7347_v48, %v7347_v48  ;;  %s5407_s6 = scalar_lea.vmem %s4066_s5, 16  ;;  %s5413_s7 = scalar_lea.vmem %s4066_s5, 32 }
 0x299   : > { %v3982_v59 = vmul.f32 %v7379_v9, %v7379_v9  ;;  %v3983_v42 = vmul.f32 %v7384_v8, %v7384_v8  ;;  %v3984_v41 = vmul.f32 %v7372_v35, %v7372_v35  ;;  %v3985_v57 = vmul.f32 %v7375_v14, %v7375_v14  ;;  %p5408_p5 = scmp.ne.s32.totalorder %s4066_s5, %s5407_s6  ;;  %p5414_p4 = scmp.lt.s32.totalorder %s4066_s5, %s4066_s5 }
 0x29a   : > { %v3933_v30 = vadd.f32 %v3932_v12, %v7320_v5  ;;  %v4001_v38 = vadd.f32 %v4000_v51, %v3970_v15  ;;  %v3986_v25 = vmul.f32 %v7401_v28, %v7401_v28  ;;  %v3987_v55 = vmul.f32 %v7406_v49, %v7406_v49  ;;  %p5415_p7 = scmp.lt.s32.totalorder %s5413_s7, %s5407_s6 }
 0x29b   : > { %p5409_p1 = pnand %p5408_p5, %p84_p2 }
 0x29c   : > { %v3934_v2 = vadd.f32 %v3933_v30, %v7325_v1  ;;  %v4002_v19 = vadd.f32 %v4001_v38, %v3971_v52  ;;  %v3988_v52 = vmul.f32 %v7395_v17, %v7395_v17  ;;  %v3989_v30 = vmul.f32 %v7398_v31, %v7398_v31  ;;  %p5416_p8 = por %p5415_p7, %p5414_p4 }
 0x29d   : > { %v3990_v38 = vmul.f32 %v7428_v13, %v7428_v13  ;;  %p5410_p3 = pneg %p5409_p1 }
 0x29e   : > { %v3935_v32 = vadd.f32 %v3934_v2, %v7312_v18  ;;  %v4003_v20 = vadd.f32 %v4002_v19, %v3972_v21 }
 0x29f   : > { %p5417_p9 = pnand %p5416_p8, %p5410_p3 }
 0x2a0   : > { %v3936_v56 = vadd.f32 %v3935_v32, %v7315_v43  ;;  %v4004_v22 = vadd.f32 %v4003_v20, %v3973_v3  ;;  %v3991_v3 = vmul.f32 %v7433_v23, %v7433_v23  ;;  %v3992_v32 = vmul.f32 %v7422_v47, %v7422_v47 }
 0x2a1   : > { %v3993_v20 = vmul.f32 %v7424_v63, %v7424_v63 }
 0x2a2   : > { %v3937_v34 = vadd.f32 %v3936_v56, %v7354_v11  ;;  %v4005_v39 = vadd.f32 %v4004_v22, %v3974_v44 }
 0x2a4   : > { %v3938_v61 = vadd.f32 %v3937_v34, %v7359_v7  ;;  %v4006_v33 = vadd.f32 %v4005_v39, %v3975_v37  ;;  %v3994_v37 = vmul.f32 %v7450_v29, %v7450_v29  ;;  %v3995_v34 = vmul.f32 %v7454_v27, %v7454_v27 }
 0x2a5   : > { %v3996_v39 = vmul.f32 %v7444_v36, %v7444_v36 }
 0x2a6   : > { %v3939_v5 = vadd.f32 %v3938_v61, %v7344_v45  ;;  %v4007_v60 = vadd.f32 %v4006_v33, %v3976_v0 }
 0x2a8   : > { %v3940_v1 = vadd.f32 %v3939_v5, %v7347_v48  ;;  %v4008_v4 = vadd.f32 %v4007_v60, %v3977_v58 }
 0x2aa   : > { %v3941_v18 = vadd.f32 %v3940_v1, %v7379_v9  ;;  %v4009_v6 = vadd.f32 %v4008_v4, %v3978_v24 }
 0x2ac   : > { %v3942_v43 = vadd.f32 %v3941_v18, %v7384_v8  ;;  %v4010_v62 = vadd.f32 %v4009_v6, %v3979_v10  ;;  %v3925_v10 = vld [vmem:[#allocation5] sm:$0x1] }
 0x2ae   : > { %v3943_v11 = vadd.f32 %v3942_v43, %v7372_v35  ;;  %v4011_v46 = vadd.f32 %v4010_v62, %v3980_v26 }
 0x2b0   : > { %v3944_v7 = vadd.f32 %v3943_v11, %v7375_v14  ;;  %v4012_v40 = vadd.f32 %v4011_v46, %v3981_v53 }
 0x2b2   : > { %v3945_v45 = vadd.f32 %v3944_v7, %v7401_v28  ;;  %v4013_v54 = vadd.f32 %v4012_v40, %v3982_v59 }
 0x2b4   : > { %v3946_v48 = vadd.f32 %v3945_v45, %v7406_v49  ;;  %v4014_v50 = vadd.f32 %v4013_v54, %v3983_v42 }
 0x2b6   : > { %v3947_v9 = vadd.f32 %v3946_v48, %v7395_v17  ;;  %v4015_v15 = vadd.f32 %v4014_v50, %v3984_v41 }
 0x2b8   : > { %v3948_v8 = vadd.f32 %v3947_v9, %v7398_v31  ;;  %v4016_v12 = vadd.f32 %v4015_v15, %v3985_v57 }
 0x2ba   : > { %v3949_v35 = vadd.f32 %v3948_v8, %v7428_v13  ;;  %v4017_v51 = vadd.f32 %v4016_v12, %v3986_v25 }
 0x2bc   : > { %v3950_v14 = vadd.f32 %v3949_v35, %v7433_v23  ;;  %v4018_v21 = vadd.f32 %v4017_v51, %v3987_v55 }
 0x2be   : > { %v3951_v28 = vadd.f32 %v3950_v14, %v7422_v47  ;;  %v4019_v2 = vadd.f32 %v4018_v21, %v3988_v52 }
 0x2c0   : > { %v3952_v49 = vadd.f32 %v3951_v28, %v7424_v63  ;;  %v4020_v19 = vadd.f32 %v4019_v2, %v3989_v30  ;;  %v3997_v63 = vmul.f32 %v7446_v16, %v7446_v16 }
 0x2c2   : > { %v3953_v17 = vadd.f32 %v3952_v49, %v7450_v29  ;;  %v4021_v44 = vadd.f32 %v4020_v19, %v3990_v38 }
 0x2c4   : > { %v3954_v31 = vadd.f32 %v3953_v17, %v7454_v27  ;;  %v4022_v56 = vadd.f32 %v4021_v44, %v3991_v3 }
 0x2c6   : > { %v3955_v13 = vadd.f32 %v3954_v31, %v7444_v36  ;;  %v4023_v22 = vadd.f32 %v4022_v56, %v3992_v32 }
 0x2c8   : > { %v3956_v23 = vadd.f32 %v3955_v13, %v7446_v16  ;;  %v4024_v0 = vadd.f32 %v4023_v22, %v3993_v20 }
 0x2ca   : > { %v3957_v47 = vrot.slane %v3956_v23, 4  ;;  %v4025_v61 = vadd.f32 %v4024_v0, %v3994_v37 }
 0x2cc   : > { %v3958_v58 = vadd.f32 %v3957_v47, %v3956_v23  ;;  %v4026_v33 = vadd.f32 %v4025_v61, %v3995_v34 }
 0x2ce   : > { %v3959_v5 = vrot.slane %v3958_v58, 2  ;;  %v4027_v24 = vadd.f32 %v4026_v33, %v3996_v39 }
 0x2d0   : > { %v3960_v29 = vadd.f32 %v3959_v5, %v3958_v58  ;;  %v4028_v60 = vadd.f32 %v4027_v24, %v3997_v63 }
 0x2d2   : > { %v3961_v1 = vrot.slane %v3960_v29, 1  ;;  %v4029_v4 = vrot.slane %v4028_v60, 4 }
 0x2d4   : > { %v3962_v27 = vadd.f32 %v3961_v1, %v3960_v29  ;;  %v4030_v18 = vadd.f32 %v4029_v4, %v4028_v60 }
 0x2d6   : > { %v3963_v26 = vadd.f32 %v3962_v27, %v3925_v10  ;;  %v4031_v36 = vrot.slane %v4030_v18, 2 }
 0x2d8   : > { %3964 = vst [vmem:[#allocation5] sm:$0x1] %v3963_v26  ;;  %v4032_v6 = vadd.f32 %v4031_v36, %v4030_v18 }
 0x2d9   : > { %5420 = shalt.err (!%p5417_p9)
}
 0x2da   : > { %5137 = dma.vmem_to_hbm [thread:$0]  (%p84_p2), %s4066_s5, 16, %s7629_s3, [#allocation6]   ;;  %v4033_v16 = vrot.slane %v4032_v6, 1  ;;  %v3965_v43 = vld [vmem:[#allocation7] sm:$0x1] }
 0x2db   : > { %s5500_s10 = smov [#allocation7]  }
 0x2dc   : > { %s4076_s11 = sshll.u32 %s5500_s10, 4  ;;  %v4034_v53 = vadd.f32 %v4033_v16, %v4032_v6  ;;  %s4077_s11 = int_to_ptr.vmem [resolvable:$true] %s4076_s11 }
 0x2dd   : > { %s5431_s12 = scalar_lea.vmem %s4077_s11, 16  ;;  %s5437_s13 = scalar_lea.vmem %s4077_s11, 32 }
 0x2de   : > { %v4035_v62 = vadd.f32 %v4034_v53, %v3965_v43  ;;  %p5432_p10 = scmp.ne.s32.totalorder %s4077_s11, %s5431_s12  ;;  %p5438_p13 = scmp.lt.s32.totalorder %s4077_s11, %s4077_s11 }
 0x2df   : > { %p5439_p0 = scmp.lt.s32.totalorder %s5437_s13, %s5431_s12 }
 0x2e0   : > { %4036 = vst [vmem:[#allocation7] sm:$0x1] %v4035_v62  ;;  %p5433_p11 = pnand %p5432_p10, %p84_p2 }
 0x2e1   : > { %p5440_p5 = por %p5439_p0, %p5438_p13 }
 0x2e2   : > { %p5434_p12 = pneg %p5433_p11 }
 0x2e4   : > { %p5441_p1 = pnand %p5440_p5, %p5434_p12 }
 0x2e6   : > { %5444 = shalt.err (!%p5441_p1)
}
 0x2e7   : > { %5139 = dma.vmem_to_hbm [thread:$0]  (%p84_p2), %s4077_s11, 16, %s7630_s4, [#allocation6]  }
 0x2e8   : > { %5472 = dma.done.wait (%p84_p2), [#allocation6], 32  }
 0x2e9   : > { %5474 = vsyncadd (%p84_p2), [#allocation6], 4294967264 }
 0x2ea PF: > { %p5153_p3 = scmp.ge.s32.totalorder %s5493_s18, 2  ;;  %s4096_s22 = sand.u32 1, %s5481_s15  }
 0x2eb   : > { %s4097_s23 = scalar_lea.sflag [#allocation4], %s4096_s22 }
 0x2ec   : > { %p5146_p4 = pnand %p5153_p3, %p5570_p6 }
 0x2ee   : > { %p5147_p7 = pneg %p5146_p4 }
 0x2f0   : > { %5476 = dma.done.wait (%p5147_p7), %s4097_s23, 2048  }
 0x2f1   : > { %5478 = vsyncadd (%p5147_p7), %s4097_s23, 4294965248  ;;  %p16_p8 = scmp.ge.s32.totalorder %s5551_s21, 4   ;;  %s7820_s15 = smov %s5485_s16 }
 0x2f2   : > { %s7821_s16 = smov %s5489_s17  ;;  %s7822_s17 = smov %s5562_s24 }
 0x2f3   : > { %s7823_s18 = smov %s5551_s21  ;;  %18 = sbr.rel (!%p16_p8) target bundleno = 4 (0x4), region = 83 }
 0x2f8   :  { %4102 = vsyncpa [#allocation4], 1 }
 0x2f9   :  { %4104 = vsyncpa [#allocation4 + $0x1], 1 }
 0x2fa   :  { %4105 = vsyncpa [#allocation6], 1 }

</bundles_post_ra>
